<compile_context>
chip_gen: v6e
topology: v6e:2x2x1
jax: 0.10.0
libtpu: 0.0.40
codegen_flags: <defaults>
</compile_context>

<pallas_src>
import numpy as np
import jax
import jax.numpy as jnp
from jax import lax
from jax.experimental import pallas as pl
from jax.experimental.pallas import tpu as pltpu

PERIODS = (0.25, 0.5, 1.0, 2.0)   # matches register_buffer('periods', ...)
TWO_PI = 2.0 * np.pi
_LANE = 128


# --------------------------------------------------------------------------
# Pallas kernel: fused message passing + signal synthesis
# --------------------------------------------------------------------------
def _enhanced_spatial_forward_kernel(w_ref, params_ref, trow_ref, sinb_ref,
                                     cosb_ref, out_ref):
    f32 = jnp.float32
    params = params_ref[...]              # (N, 16) f32 packed station params
    n = params.shape[0]

    phases = params[:, 0:4]               # seasonal_phases
    amps = params[:, 8:12]                # seasonal_amplitudes
    offset = params[:, 12:13]             # constant_offset
    trend = params[:, 13:14]              # linear_trend (ps00 rates)
    singleton = params[:, 14:15]          # 1.0 if station is a singleton cluster

    # --- ONE fused MXU matmul for all message-passing paths -----------------
    # RHS lanes: [0:4]=sin(phase) [4:8]=cos(phase) [8:12]=amps [12:16]=aux(junk)
    col = lax.broadcasted_iota(jnp.int32, params.shape, 1)
    rhs = jnp.where(col < 4, jnp.sin(params),
                    jnp.where(col < 8, jnp.cos(params), params))
    mixed = jnp.dot(w_ref[...], rhs.astype(jnp.bfloat16),
                    preferred_element_type=f32)          # (3N, 16) f32

    loc = mixed[0:n, :]        # wl @ rhs
    reg = mixed[n:2 * n, :]    # wr @ rhs
    clu = mixed[2 * n:, :]     # wc @ rhs

    # --- amplitude message passing (regional carries the inner 0.7 factor) --
    comb_a = 0.5 * loc[:, 8:12] + 0.21 * reg[:, 8:12] + 0.2 * clu[:, 8:12]
    amps_mp = 0.7 * amps + 0.3 * comb_a                  # mixing_factor = 0.3

    # --- phase message passing (complex circular mean -> atan2) -------------
    local_p = jnp.arctan2(loc[:, 0:4], loc[:, 4:8])
    regional_p = jnp.arctan2(reg[:, 0:4], reg[:, 4:8])
    cluster_p = jnp.arctan2(clu[:, 0:4], clu[:, 4:8])
    # Singleton clusters copy the raw parameter (no angle wrapping), as in torch.
    cluster_p = jnp.where(singleton > 0.5, phases, cluster_p)
    comb_p = 0.5 * local_p + 0.3 * regional_p + 0.2 * cluster_p
    phases_mp = 0.7 * phases + 0.3 * comb_p

    # NOTE: softmax(spatial_adaptation_weights) is computed but unused in the
    # PyTorch forward -> intentionally omitted (dead code).

    # --- signal synthesis via angle addition + basis matmuls -----------------
    #   a*sin(w t + p) = (a cos p) * sin(w t) + (a sin p) * cos(w t)
    a_cos = amps_mp * jnp.cos(phases_mp)                 # (N, 4)
    a_sin = amps_mp * jnp.sin(phases_mp)                 # (N, 4)
    signals = offset + trend * trow_ref[...]             # (N,1)+(N,1)*(1,Tp)
    signals = signals + jnp.dot(a_cos, sinb_ref[...],
                                preferred_element_type=f32)
    signals = signals + jnp.dot(a_sin, cosb_ref[...],
                                preferred_element_type=f32)
    out_ref[...] = signals


def enhanced_spatial_forward(wl, wr, wc, singleton, offset, trend,
                             amps, phases, time_vec):
    """Wrapper: pack inputs, build time-only basis, call the Pallas kernel."""
    n = wl.shape[0]
    t_len = int(np.asarray(time_vec).shape[0])
    t_pad = max(_LANE, ((t_len + _LANE - 1) // _LANE) * _LANE)

    # Pack per-station tensors into one lane-contiguous (N, 16) buffer.
    params = np.zeros((n, 16), dtype=np.float32)
    params[:, 0:4] = phases
    params[:, 4:8] = phases
    params[:, 8:12] = amps
    params[:, 12] = offset
    params[:, 13] = trend
    params[:, 14] = singleton

    # Stack the three graph-weight matrices into one (3N, N) MXU operand.
    w_stack = np.concatenate([wl, wr, wc], axis=0).astype(np.float32)

    # Time-only basis (lane-dense, padded to a multiple of 128).
    tp = np.zeros((t_pad,), dtype=np.float32)
    tp[:t_len] = time_vec
    freqs = np.array([1.0 / p for p in PERIODS], dtype=np.float32)
    arg = TWO_PI * freqs[:, None] * tp[None, :]          # (4, T_pad)
    sinb = np.sin(arg).astype(np.float32)
    cosb = np.cos(arg).astype(np.float32)
    trow = tp.reshape(1, t_pad)

    args = (jnp.asarray(w_stack, dtype=jnp.bfloat16),    # bf16 MXU operand
            jnp.asarray(params),
            jnp.asarray(trow),
            jnp.asarray(sinb),
            jnp.asarray(cosb))
    vmem_specs = [pl.BlockSpec(memory_space=pltpu.MemorySpace.VMEM)
                  for _ in args]
    out = pl.pallas_call(
        _enhanced_spatial_forward_kernel,
        out_shape=jax.ShapeDtypeStruct((n, t_pad), jnp.float32),
        in_specs=vmem_specs,
        out_specs=pl.BlockSpec(memory_space=pltpu.MemorySpace.VMEM),
        cost_estimate=pl.CostEstimate(
            flops=int(2 * 3 * n * n * 16 + 2 * 2 * n * 4 * t_pad),
            transcendentals=int(n * (2 * 16 + 3 * 4 + 2 * 4)),
            bytes_accessed=int(3 * n * n * 2 + n * 16 * 4
                               + 9 * t_pad * 4 + n * t_pad * 4)),
    )(*args)
    return out[:, :t_len]


# --------------------------------------------------------------------------
# Glue: deterministic replacements for the sklearn-based graph construction
# (NearestNeighbors / KMeans / StandardScaler) done once in __init__.
# --------------------------------------------------------------------------
def _adaptive_weights(distances, factor):
    w = np.exp(-distances / np.mean(distances) * factor)
    w = w / (np.sum(w, axis=1, keepdims=True) + 1e-6)
    return w.astype(np.float32)


def build_knn_graphs(coords):
    n = coords.shape[0]
    d = np.sqrt(((coords[:, None, :] - coords[None, :, :]) ** 2).sum(-1))
    order = np.argsort(d, axis=1, kind="stable")
    local_idx = order[:, 1:6]       # 5 local neighbours (self excluded)
    regional_idx = order[:, 1:16]   # 15 regional neighbours
    local_w = _adaptive_weights(np.take_along_axis(d, local_idx, axis=1), 2.0)
    regional_w = _adaptive_weights(np.take_along_axis(d, regional_idx, axis=1), 1.0)
    wl = np.zeros((n, n), dtype=np.float32)
    wr = np.zeros((n, n), dtype=np.float32)
    rows = np.arange(n)[:, None]
    wl[rows, local_idx] = local_w
    wr[rows, regional_idx] = regional_w
    return wl, wr


def build_cluster_matrix(coords, trend):
    # TODO(synk): sklearn KMeans replaced by a deterministic Lloyd iteration.
    n = coords.shape[0]
    feats = np.column_stack([coords, trend]).astype(np.float64)
    feats = (feats - feats.mean(0)) / (feats.std(0) + 1e-12)
    n_clusters = min(5, max(3, n // 20))
    rng = np.random.RandomState(42)
    centroids = feats[rng.choice(n, n_clusters, replace=False)].copy()
    labels = np.zeros(n, dtype=np.int64)
    for _ in range(20):
        dist = ((feats[:, None, :] - centroids[None, :, :]) ** 2).sum(-1)
        labels = dist.argmin(1)
        for c in range(n_clusters):
            m = labels == c
            if m.any():
                centroids[c] = feats[m].mean(0)
    wc = np.zeros((n, n), dtype=np.float32)
    singleton = np.zeros((n,), dtype=np.float32)
    for c in range(n_clusters):
        members = np.where(labels == c)[0]
        if len(members) > 1:
            wc[np.ix_(members, members)] = 1.0 / len(members)
        elif len(members) == 1:
            wc[members[0], members[0]] = 1.0
            singleton[members[0]] = 1.0
    return wc, singleton


# --------------------------------------------------------------------------
# Pure-numpy reference of the original forward semantics (sanity check)
# --------------------------------------------------------------------------
def reference_forward(wl, wr, wc, singleton, offset, trend, amps, phases, t):
    local_a = wl @ amps
    regional_a = (wr @ amps) * 0.7
    cluster_a = wc @ amps
    amps_mp = 0.7 * amps + 0.3 * (0.5 * local_a + 0.3 * regional_a + 0.2 * cluster_a)
    cosp, sinp = np.cos(phases), np.sin(phases)
    lp = np.arctan2(wl @ sinp, wl @ cosp)
    rp = np.arctan2(wr @ sinp, wr @ cosp)
    cp = np.where(singleton > 0.5, phases, np.arctan2(wc @ sinp, wc @ cosp))
    phases_mp = 0.7 * phases + 0.3 * (0.5 * lp + 0.3 * rp + 0.2 * cp)
    sig = offset + trend * t
    for k, period in enumerate(PERIODS):
        sig = sig + amps_mp[:, k:k + 1] * np.sin(TWO_PI / period * t + phases_mp[:, k:k + 1])
    return sig.astype(np.float32)


if __name__ == "__main__":
    N = 64     # n_stations
    T = 48     # n_timepoints

    key = jax.random.PRNGKey(0)
    k1, k2, k3 = jax.random.split(key, 3)

    coords = np.asarray(jax.random.uniform(k1, (N, 2), minval=0.0, maxval=50.0),
                        dtype=np.float64)
    ps00_rates = np.asarray(jax.random.normal(k2, (N,)) * 10.0, dtype=np.float32)

    # Parameter init following the module's __init__:
    offset_init = np.zeros((N,), dtype=np.float32)                    # constant_offset
    amps_init = np.full((N, 4), 3.0, dtype=np.float32)                # ones * 3.0
    phases_init = np.asarray(jax.random.uniform(k3, (N, 4)) * TWO_PI,
                             dtype=np.float32)                        # rand * 2*pi
    # spatial_adaptation_weights = ones(N): unused in forward (dead softmax).

    wl, wr = build_knn_graphs(coords)
    wc, singleton = build_cluster_matrix(coords, ps00_rates)

    time_vec = np.linspace(0.0, 2.0, T, dtype=np.float32)   # years

    out = enhanced_spatial_forward(wl, wr, wc, singleton, offset_init,
                                   ps00_rates, amps_init, phases_init,
                                   time_vec)
    out = jax.block_until_ready(out)

    ref = reference_forward(wl, wr, wc, singleton.reshape(N, 1),
                            offset_init.reshape(N, 1),
                            ps00_rates.reshape(N, 1),
                            amps_init, phases_init,
                            time_vec.reshape(1, T))

    out_np = np.asarray(out)
    assert out_np.shape == (N, T)
    assert np.all(np.isfinite(out_np))
    # Slightly widened tolerance accounts for deliberate bf16 MXU operands in
    # the fused message-passing matmul (f32 accumulation).
    np.testing.assert_allclose(out_np, ref, rtol=2e-2, atol=2e-1)
    print("KERNEL_OK")
</pallas_src>

<mosaic_0001>
module attributes {stable_mosaic.version = 11 : i64} {
  func.func @_enhanced_spatial_forward_kernel(%arg0: memref<192x64xbf16, #tpu.memory_space<vmem>>, %arg1: memref<64x16xf32, #tpu.memory_space<vmem>>, %arg2: memref<1x128xf32, #tpu.memory_space<vmem>>, %arg3: memref<4x128xf32, #tpu.memory_space<vmem>>, %arg4: memref<4x128xf32, #tpu.memory_space<vmem>>, %arg5: memref<64x128xf32, #tpu.memory_space<vmem>>) attributes {dimension_semantics = [], scalar_prefetch = 0 : i64, scratch_operands = 0 : i64, tpu.core_type = #tpu.core_type<tc>} {
    %c0 = arith.constant 0 : index
    %c0_0 = arith.constant 0 : index
    %0 = vector.load %arg1[%c0, %c0_0] : memref<64x16xf32, #tpu.memory_space<vmem>>, vector<64x16xf32>
    %1 = vector.extract_strided_slice %0 {offsets = [0, 0], sizes = [64, 4], strides = [1, 1]} : vector<64x16xf32> to vector<64x4xf32>
    %2 = vector.extract_strided_slice %0 {offsets = [0, 8], sizes = [64, 4], strides = [1, 1]} : vector<64x16xf32> to vector<64x4xf32>
    %3 = vector.extract_strided_slice %0 {offsets = [0, 12], sizes = [64, 1], strides = [1, 1]} : vector<64x16xf32> to vector<64x1xf32>
    %4 = vector.extract_strided_slice %0 {offsets = [0, 13], sizes = [64, 1], strides = [1, 1]} : vector<64x16xf32> to vector<64x1xf32>
    %5 = vector.extract_strided_slice %0 {offsets = [0, 14], sizes = [64, 1], strides = [1, 1]} : vector<64x16xf32> to vector<64x1xf32>
    %6 = tpu.iota {dimensions = array<i32: 1>} : vector<64x16xi32>
    %c4_i32 = arith.constant 4 : i32
    %7 = vector.broadcast %c4_i32 : i32 to vector<64x16xi32>
    %8 = arith.cmpi slt, %6, %7 : vector<64x16xi32>
    %9 = math.sin %0 : vector<64x16xf32>
    %c8_i32 = arith.constant 8 : i32
    %10 = vector.broadcast %c8_i32 : i32 to vector<64x16xi32>
    %11 = arith.cmpi slt, %6, %10 : vector<64x16xi32>
    %12 = math.cos %0 : vector<64x16xf32>
    %13 = arith.select %11, %12, %0 : vector<64x16xi1>, vector<64x16xf32>
    %14 = arith.select %8, %9, %13 : vector<64x16xi1>, vector<64x16xf32>
    %c0_1 = arith.constant 0 : index
    %c0_2 = arith.constant 0 : index
    %15 = vector.load %arg0[%c0_1, %c0_2] : memref<192x64xbf16, #tpu.memory_space<vmem>>, vector<192x64xbf16>
    %16 = arith.truncf %14 : vector<64x16xf32> to vector<64x16xbf16>
    %cst = arith.constant dense<0.000000e+00> : vector<192x16xf32>
    %17 = tpu.matmul %15, %16, %cst {dimension_numbers = #tpu.dot_dimension_numbers<[1], [0], [0], [1], [0, 0, 1, 1], [], []>} : vector<192x64xbf16>, vector<64x16xbf16>, vector<192x16xf32> -> vector<192x16xf32>
    %18 = vector.extract_strided_slice %17 {offsets = [0, 0], sizes = [64, 16], strides = [1, 1]} : vector<192x16xf32> to vector<64x16xf32>
    %19 = vector.extract_strided_slice %17 {offsets = [64, 0], sizes = [64, 16], strides = [1, 1]} : vector<192x16xf32> to vector<64x16xf32>
    %20 = vector.extract_strided_slice %17 {offsets = [128, 0], sizes = [64, 16], strides = [1, 1]} : vector<192x16xf32> to vector<64x16xf32>
    %21 = vector.extract_strided_slice %18 {offsets = [0, 8], sizes = [64, 4], strides = [1, 1]} : vector<64x16xf32> to vector<64x4xf32>
    %cst_3 = arith.constant 5.000000e-01 : f32
    %22 = vector.broadcast %cst_3 : f32 to vector<64x4xf32>
    %23 = arith.mulf %22, %21 : vector<64x4xf32>
    %24 = vector.extract_strided_slice %19 {offsets = [0, 8], sizes = [64, 4], strides = [1, 1]} : vector<64x16xf32> to vector<64x4xf32>
    %cst_4 = arith.constant 2.100000e-01 : f32
    %25 = vector.broadcast %cst_4 : f32 to vector<64x4xf32>
    %26 = arith.mulf %25, %24 : vector<64x4xf32>
    %27 = arith.addf %23, %26 : vector<64x4xf32>
    %28 = vector.extract_strided_slice %20 {offsets = [0, 8], sizes = [64, 4], strides = [1, 1]} : vector<64x16xf32> to vector<64x4xf32>
    %cst_5 = arith.constant 2.000000e-01 : f32
    %29 = vector.broadcast %cst_5 : f32 to vector<64x4xf32>
    %30 = arith.mulf %29, %28 : vector<64x4xf32>
    %31 = arith.addf %27, %30 : vector<64x4xf32>
    %cst_6 = arith.constant 0.699999988 : f32
    %32 = vector.broadcast %cst_6 : f32 to vector<64x4xf32>
    %33 = arith.mulf %32, %2 : vector<64x4xf32>
    %cst_7 = arith.constant 3.000000e-01 : f32
    %34 = vector.broadcast %cst_7 : f32 to vector<64x4xf32>
    %35 = arith.mulf %34, %31 : vector<64x4xf32>
    %36 = arith.addf %33, %35 : vector<64x4xf32>
    %37 = vector.extract_strided_slice %18 {offsets = [0, 0], sizes = [64, 4], strides = [1, 1]} : vector<64x16xf32> to vector<64x4xf32>
    %38 = vector.extract_strided_slice %18 {offsets = [0, 4], sizes = [64, 4], strides = [1, 1]} : vector<64x16xf32> to vector<64x4xf32>
    %39 = math.atan2 %37, %38 : vector<64x4xf32>
    %40 = vector.extract_strided_slice %19 {offsets = [0, 0], sizes = [64, 4], strides = [1, 1]} : vector<64x16xf32> to vector<64x4xf32>
    %41 = vector.extract_strided_slice %19 {offsets = [0, 4], sizes = [64, 4], strides = [1, 1]} : vector<64x16xf32> to vector<64x4xf32>
    %42 = math.atan2 %40, %41 : vector<64x4xf32>
    %43 = vector.extract_strided_slice %20 {offsets = [0, 0], sizes = [64, 4], strides = [1, 1]} : vector<64x16xf32> to vector<64x4xf32>
    %44 = vector.extract_strided_slice %20 {offsets = [0, 4], sizes = [64, 4], strides = [1, 1]} : vector<64x16xf32> to vector<64x4xf32>
    %45 = math.atan2 %43, %44 : vector<64x4xf32>
    %cst_8 = arith.constant 5.000000e-01 : f32
    %46 = vector.broadcast %cst_8 : f32 to vector<64x1xf32>
    %47 = arith.cmpf ogt, %5, %46 : vector<64x1xf32>
    %48 = vector.shape_cast %47 : vector<64x1xi1> to vector<64x1xi1>
    %49 = vector.broadcast %48 : vector<64x1xi1> to vector<64x4xi1>
    %50 = arith.select %49, %1, %45 : vector<64x4xi1>, vector<64x4xf32>
    %cst_9 = arith.constant 5.000000e-01 : f32
    %51 = vector.broadcast %cst_9 : f32 to vector<64x4xf32>
    %52 = arith.mulf %51, %39 : vector<64x4xf32>
    %cst_10 = arith.constant 3.000000e-01 : f32
    %53 = vector.broadcast %cst_10 : f32 to vector<64x4xf32>
    %54 = arith.mulf %53, %42 : vector<64x4xf32>
    %55 = arith.addf %52, %54 : vector<64x4xf32>
    %cst_11 = arith.constant 2.000000e-01 : f32
    %56 = vector.broadcast %cst_11 : f32 to vector<64x4xf32>
    %57 = arith.mulf %56, %50 : vector<64x4xf32>
    %58 = arith.addf %55, %57 : vector<64x4xf32>
    %cst_12 = arith.constant 0.699999988 : f32
    %59 = vector.broadcast %cst_12 : f32 to vector<64x4xf32>
    %60 = arith.mulf %59, %1 : vector<64x4xf32>
    %cst_13 = arith.constant 3.000000e-01 : f32
    %61 = vector.broadcast %cst_13 : f32 to vector<64x4xf32>
    %62 = arith.mulf %61, %58 : vector<64x4xf32>
    %63 = arith.addf %60, %62 : vector<64x4xf32>
    %64 = math.cos %63 : vector<64x4xf32>
    %65 = arith.mulf %36, %64 : vector<64x4xf32>
    %66 = math.sin %63 : vector<64x4xf32>
    %67 = arith.mulf %36, %66 : vector<64x4xf32>
    %c0_14 = arith.constant 0 : index
    %c0_15 = arith.constant 0 : index
    %68 = vector.load %arg2[%c0_14, %c0_15] : memref<1x128xf32, #tpu.memory_space<vmem>>, vector<1x128xf32>
    %69 = vector.broadcast %4 : vector<64x1xf32> to vector<64x128xf32>
    %70 = vector.broadcast %68 : vector<1x128xf32> to vector<64x128xf32>
    %71 = arith.mulf %69, %70 : vector<64x128xf32>
    %72 = vector.broadcast %3 : vector<64x1xf32> to vector<64x128xf32>
    %73 = arith.addf %72, %71 : vector<64x128xf32>
    %c0_16 = arith.constant 0 : index
    %c0_17 = arith.constant 0 : index
    %74 = vector.load %arg3[%c0_16, %c0_17] : memref<4x128xf32, #tpu.memory_space<vmem>>, vector<4x128xf32>
    %cst_18 = arith.constant dense<0.000000e+00> : vector<64x128xf32>
    %75 = tpu.matmul %65, %74, %cst_18 {dimension_numbers = #tpu.dot_dimension_numbers<[1], [0], [0], [1], [0, 0, 1, 1], [], []>} : vector<64x4xf32>, vector<4x128xf32>, vector<64x128xf32> -> vector<64x128xf32>
    %76 = arith.addf %73, %75 : vector<64x128xf32>
    %c0_19 = arith.constant 0 : index
    %c0_20 = arith.constant 0 : index
    %77 = vector.load %arg4[%c0_19, %c0_20] : memref<4x128xf32, #tpu.memory_space<vmem>>, vector<4x128xf32>
    %cst_21 = arith.constant dense<0.000000e+00> : vector<64x128xf32>
    %78 = tpu.matmul %67, %77, %cst_21 {dimension_numbers = #tpu.dot_dimension_numbers<[1], [0], [0], [1], [0, 0, 1, 1], [], []>} : vector<64x4xf32>, vector<4x128xf32>, vector<64x128xf32> -> vector<64x128xf32>
    %79 = arith.addf %76, %78 : vector<64x128xf32>
    %c0_22 = arith.constant 0 : index
    %c0_23 = arith.constant 0 : index
    %80 = vector.load %arg5[%c0_22, %c0_23] : memref<64x128xf32, #tpu.memory_space<vmem>>, vector<64x128xf32>
    tpu.vector_store %arg5[%c0_22, %c0_23], %79 {strides = array<i32>} : memref<64x128xf32, #tpu.memory_space<vmem>>, vector<64x128xf32>,
    return
  }
}

</mosaic_0001>

<bundles_post_ra>
// kernel: tpu_custom_call.1
= control target key start
LH: loop header
LB: loop body
LE: loop exit
PB: predicated region body
PF: predicated region fallthrough
CT: control target
= control target key end

     0   :  { %v10271_v31 = vmov 683565275   ;;  %v10275_v33 = vmov 2475754826   ;;  %v10273_v35 = vmov 2131351028   ;;  %s10259_s0 = inlined_call_operand.vmem [shape: bf16[192,64], index: 0, kind: input, shape index: {}]   ;;  %s10260_s1 = inlined_call_operand.vmem [shape: f32[64,16], index: 1, kind: input, shape index: {}]   ;;  %s10261_s2 = inlined_call_operand.vmem [shape: f32[1,128], index: 2, kind: input, shape index: {}]   ;;  %s10262_s3 = inlined_call_operand.vmem [shape: f32[4,128], index: 3, kind: input, shape index: {}]   ;;  %s10263_s4 = inlined_call_operand.vmem [shape: f32[4,128], index: 4, kind: input, shape index: {}]   ;;  %s10264_s5 = inlined_call_operand.hbm [shape: f32[64,128], index: 5, kind: output, shape index: {}]  }
   0x1   :  { %v6112_v0 = vld [vmem:[%s10260_s1 + $0x30] sm:$0xff]  ;;  %v6117_v1 = vld [vmem:[%s10260_s1 + $0x38] sm:$0xff]  ;;  %v6126_v6 = vld [vmem:[%s10260_s1 + $0x20] sm:$0xff]  ;;  %v10269_v37 = vmov 2102212464  }
   0x2   :  { %v657_v2 = vand.u32 2147483647, %v6112_v0  ;;  %v660_v3 = vand.u32 2139095040, %v6112_v0  ;;  %v761_v4 = vand.u32 2147483647, %v6117_v1  ;;  %v764_v5 = vand.u32 2139095040, %v6117_v1 }
   0x3   :  { %v452_v13 = vand.u32 2139095040, %v6126_v6  ;;  %v449_v22 = vand.u32 2147483647, %v6126_v6  ;;  %v10267_v39 = vmov 920167782  }
   0x4   :  { %v661_v7 = vshrl.u32 %v660_v3, 23  ;;  %v664_v8 = vand.u32 8388607, %v657_v2  ;;  %v765_v9 = vshrl.u32 %v764_v5, 23  ;;  %v768_v10 = vand.u32 8388607, %v761_v4 }
   0x5   :  { %v453_v17 = vshrl.u32 %v452_v13, 23  ;;  %v10265_v46 = vmov 1326507024  }
   0x6   :  { %v5555_v11 = vadd.s32 4294967169, %v661_v7  ;;  %v5559_v12 = vadd.s32 4294967169, %v765_v9  ;;  %v665_v14 = vor.u32 8388608, %v664_v8  ;;  %v769_v18 = vor.u32 8388608, %v768_v10 }
   0x7   :  { %v5547_v19 = vadd.s32 4294967169, %v453_v17 }
   0x8   :  { %v667_v15 = vadd.s32 1, %v5555_v11  ;;  %v771_v16 = vadd.s32 1, %v5559_v12  ;;  %v6134_v25 = vshll.u32 %v665_v14, 8  ;;  %v6138_v28 = vshll.u32 %v769_v18, 8 }
   0x9   :  { %v6140_v29 = vadd.s32 1, %v5547_v19 }
   0xa   :  { %vm668_vm0 = vcmp.gt.s32.totalorder %v667_v15, 0  ;;  %vm772_vm1 = vcmp.gt.s32.totalorder %v771_v16, 0 }
   0xb   :  { %v669_v20 = vsel %vm668_vm0, %v667_v15, 0  ;;  %v773_v21 = vsel %vm772_vm1, %v771_v16, 0 }
   0xc   :  { %v670_v23 = vshrl.u32 %v669_v20, 5  ;;  %v671_v24 = vand.u32 31, %v669_v20  ;;  %v6136_v26 = vshrl.u32 %v773_v21, 5  ;;  %v775_v27 = vand.u32 31, %v773_v21 }
   0xe   :  { %v672_v30 = vsub.s32 32, %v671_v24  ;;  %v674_v32 = vshll.u32 %v10271_v31, %v671_v24  ;;  %v677_v34 = vshll.u32 %v10275_v33, %v671_v24  ;;  %v680_v36 = vshll.u32 %v10273_v35, %v671_v24 }
   0xf   :  { %v683_v38 = vshll.u32 %v10269_v37, %v671_v24  ;;  %v686_v40 = vshll.u32 %v10267_v39, %v671_v24  ;;  %vm689_vm2 = vcmp.lt.s32.totalorder %v670_v23, 1  ;;  %vm690_vm3 = vcmp.lt.s32.totalorder %v670_v23, 2 }
  0x10   :  { %v673_v41 = vshrl.u32 %v10271_v31, %v672_v30  ;;  %v675_v42 = vshrl.u32 %v10275_v33, %v672_v30  ;;  %v678_v43 = vshrl.u32 %v10273_v35, %v672_v30  ;;  %v681_v44 = vshrl.u32 %v10269_v37, %v672_v30 }
  0x11   :  { %v684_v45 = vshrl.u32 %v10267_v39, %v672_v30  ;;  %v687_v47 = vshrl.u32 %v10265_v46, %v672_v30  ;;  %vm691_vm4 = vcmp.lt.s32.totalorder %v670_v23, 3  ;;  %vm692_vm5 = vcmp.lt.s32.totalorder %v670_v23, 4 }
  0x12   :  { %v676_v48 = vor.u32 %v675_v42, %v674_v32  ;;  %v679_v49 = vor.u32 %v678_v43, %v677_v34  ;;  %v682_v50 = vor.u32 %v681_v44, %v680_v36  ;;  %v776_v51 = vsub.s32 32, %v775_v27 }
  0x13   :  { %v685_v52 = vor.u32 %v684_v45, %v683_v38  ;;  %v688_v53 = vor.u32 %v687_v47, %v686_v40  ;;  %v778_v54 = vshll.u32 %v10271_v31, %v775_v27  ;;  %v781_v62 = vshll.u32 %v10275_v33, %v775_v27 }
  0x14   :  { %v693_v55 = vsel %vm689_vm2, %v673_v41, %v676_v48  ;;  %v694_v56 = vsel %vm692_vm5, %v682_v50, 2102212464  ;;  %v697_v57 = vsel %vm689_vm2, %v676_v48, %v679_v49  ;;  %v701_v58 = vsel %vm689_vm2, %v679_v49, %v682_v50 }
  0x15   :  { %v695_v59 = vsel %vm691_vm4, %v679_v49, %v694_v56  ;;  %v698_v60 = vsel %vm692_vm5, %v685_v52, 920167782  ;;  %v702_v61 = vsel %vm692_vm5, %v688_v53, 1326507024  ;;  %v777_v5 = vshrl.u32 %v10271_v31, %v776_v51 }
  0x16   :  { %v699_v63 = vsel %vm691_vm4, %v682_v50, %v698_v60  ;;  %v703_v3 = vsel %vm691_vm4, %v685_v52, %v702_v61  ;;  %v779_v7 = vshrl.u32 %v10275_v33, %v776_v51  ;;  %v696_v8 = vsel %vm690_vm3, %v693_v55, %v695_v59 }
  0x17   :  { %v700_v9 = vsel %vm690_vm3, %v697_v57, %v699_v63  ;;  %v704_v10 = vsel %vm690_vm3, %v701_v58, %v703_v3  ;;  %v782_v11 = vshrl.u32 %v10273_v35, %v776_v51 }
  0x18   :  { %10 = vsyncpa [#allocation3], 0  ;;  %v6168_v12 = vmul.u32.u64.low %v6134_v25, %v704_v10  ;;  %v6169_v13 = vmul.u32.u64.high %v6134_v25, %v704_v10, %v6168_v12  ;;  %v6172_v14 = vmul.u32.u64.low %v6134_v25, %v700_v9  ;;  %v6173_v15 = vmul.u32.u64.high %v6134_v25, %v700_v9, %v6172_v14  ;;  %v6205_v56 = vld [vmem:[%s10260_s1 + $0x28] sm:$0xff]  ;;  %s6069_s12 = smov 124   ;;  %s6073_s16 = smov 8  }
  0x19   :  { %v780_v16 = vor.u32 %v779_v7, %v778_v54  ;;  %v783_v17 = vor.u32 %v782_v11, %v781_v62  ;;  %v784_v18 = vshll.u32 %v10273_v35, %v775_v27  ;;  %v785_v19 = vshrl.u32 %v10269_v37, %v776_v51  ;;  %s6074_s17 = smov 120  }
  0x1a   :  { %v787_v20 = vshll.u32 %v10269_v37, %v775_v27  ;;  %v788_v21 = vshrl.u32 %v10267_v39, %v776_v51  ;;  %v790_v23 = vshll.u32 %v10267_v39, %v775_v27  ;;  %v791_v24 = vshrl.u32 %v10265_v46, %v776_v51 }
  0x1b   :  { %v712_v30 = vmul.u32 %v6134_v25, %v696_v8  ;;  %v786_v32 = vor.u32 %v785_v19, %v784_v18  ;;  %vm793_vm6 = vcmp.lt.s32.totalorder %v6136_v26, 1  ;;  %vm794_vm7 = vcmp.lt.s32.totalorder %v6136_v26, 2 }
  0x1c   :  { %vm714_vm8 = vc.u32 %v6169_v13, %v6172_v14  ;;  %v715_v34 = vadd.s32 1, %v6173_v15  ;;  %v789_v36 = vor.u32 %v788_v21, %v787_v20  ;;  %vm795_vm9 = vcmp.lt.s32.totalorder %v6136_v26, 3  ;;  %v6239_v21 = vld [vmem:[%s10260_s1 + $0x10] sm:$0xff] }
  0x1d   :  { %v792_v38 = vor.u32 %v791_v24, %v790_v23  ;;  %vm796_vm10 = vcmp.lt.s32.totalorder %v6136_v26, 4  ;;  %v797_v27 = vsel %vm793_vm6, %v777_v5, %v780_v16  ;;  %v801_v40 = vsel %vm793_vm6, %v780_v16, %v783_v17 }
  0x1e   :  { %v716_v25 = vsel %vm714_vm8, %v715_v34, %v6173_v15  ;;  %v798_v41 = vsel %vm796_vm10, %v786_v32, 2102212464  ;;  %v802_v42 = vsel %vm796_vm10, %v789_v36, 920167782  ;;  %v805_v43 = vsel %vm793_vm6, %v783_v17, %v786_v32 }
  0x1f   :  { %v717_v44 = vadd.s32 %v716_v25, %v712_v30  ;;  %v799_v45 = vsel %vm795_vm9, %v783_v17, %v798_v41  ;;  %v803_v47 = vsel %vm795_vm9, %v786_v32, %v802_v42  ;;  %v806_v48 = vsel %vm796_vm10, %v792_v38, 1326507024 }
  0x20   :  { %v800_v49 = vsel %vm794_vm7, %v797_v27, %v799_v45  ;;  %v804_v50 = vsel %vm794_vm7, %v801_v40, %v803_v47  ;;  %v807_v51 = vsel %vm795_vm9, %v789_v36, %v806_v48  ;;  %vm460_vm11 = vcmp.gt.s32.totalorder %v6140_v29, 0 }
  0x21   :  { %v718_v52 = vadd.s32 536870912, %v717_v44  ;;  %v808_v53 = vsel %vm794_vm7, %v805_v43, %v807_v51  ;;  %v6199_v54 = vmul.u32.u64.low %v6138_v28, %v804_v50  ;;  %v6200_v55 = vmul.u32.u64.high %v6138_v28, %v804_v50, %v6199_v54 }
  0x22   :  { %v6208_v57 = vmul.u32.u64.low %v6138_v28, %v808_v53  ;;  %v6209_v58 = vmul.u32.u64.high %v6138_v28, %v808_v53, %v6208_v57  ;;  %v456_v60 = vand.u32 8388607, %v449_v22  ;;  %v461_v26 = vsel %vm460_vm11, %v6140_v29, 0 }
  0x23   :  { %v719_v59 = vshrl.u32 %v718_v52, 30  ;;  %v816_v61 = vmul.u32 %v6138_v28, %v800_v49  ;;  %v556_v62 = vand.u32 2139095040, %v6205_v56  ;;  %v30_v63 = vlaneseq }
  0x24   :  { %v819_v5 = vadd.s32 1, %v6200_v55  ;;  %v553_v7 = vand.u32 2147483647, %v6205_v56  ;;  %vm818_vm12 = vc.u32 %v6209_v58, %v6199_v54  ;;  %v463_v8 = vand.u32 31, %v461_v26 }
  0x25   :  { %v720_v3 = vshll.u32 %v719_v59, 30  ;;  %v743_v10 = vsub.s32 4, %v719_v59  ;;  %v457_v12 = vor.u32 8388608, %v456_v60  ;;  %v557_v15 = vshrl.u32 %v556_v62, 23 }
  0x26   :  { %v820_v11 = vsel %vm818_vm12, %v819_v5, %v6200_v55  ;;  %v6222_v28 = vand.u32 127, %v30_v63  ;;  %v6227_v17 = vand.u32 8388607, %v553_v7  ;;  %vm6231_vm13 = vcmp.le.f32.partialorder %v657_v2, 0.7853982 }
  0x27   :  { %v6219_v9 = vsub.s32 %v717_v44, %v720_v3  ;;  %v821_v29 = vadd.s32 %v820_v11, %v816_v61  ;;  %vm659_vm14 = vcmp.lt.s32.totalorder %v6112_v0, 0  ;;  %v464_v20 = vsub.s32 32, %v463_v8 }
  0x28   :  { %v744_v24 = vsel %vm659_vm14, %v743_v10, %v719_v59  ;;  %v6244_v30 = vshll.u32 %v457_v12, 8  ;;  %v241_v2 = vand.u32 2147483647, %v6239_v21  ;;  %v713_v32 = vadd.s32 %v6172_v14, %v6169_v13 }
  0x29   :  { %v723_v16 = vsub.s32 0, %v6219_v9  ;;  %v822_v19 = vadd.s32 536870912, %v821_v29  ;;  %v6249_v36 = vshrl.u32 %v461_v26, 5  ;;  %v6251_v38 = vadd.s32 4294967169, %v557_v15 }
  0x2a   :  { %v466_v40 = vshll.u32 %v10271_v31, %v463_v8  ;;  %v469_v25 = vshll.u32 %v10275_v33, %v463_v8  ;;  %v561_v41 = vor.u32 8388608, %v6227_v17  ;;  %v6258_v42 = vsel %vm6231_vm13, 0, %v744_v24 }
  0x2b   :  { %v5556_v23 = vmin.u32 %v723_v16, %v6219_v9  ;;  %v823_v34 = vshrl.u32 %v822_v19, 30  ;;  %v467_v44 = vshrl.u32 %v10275_v33, %v464_v20  ;;  %v470_v13 = vshrl.u32 %v10273_v35, %v464_v20 }
  0x2c   :  { %v817_v45 = vadd.s32 %v6199_v54, %v6209_v58  ;;  %v472_v47 = vshll.u32 %v10273_v35, %v463_v8  ;;  %v473_v48 = vshrl.u32 %v10269_v37, %v464_v20  ;;  %v465_v50 = vshrl.u32 %v10271_v31, %v464_v20 }
  0x2d   :  { %v725_v27 = vclz %v5556_v23  ;;  %v824_v43 = vshll.u32 %v823_v34, 30  ;;  %v475_v51 = vshll.u32 %v10269_v37, %v463_v8  ;;  %v476_v52 = vshrl.u32 %v10267_v39, %v464_v20 }
  0x2e   :  { %v750_v53 = vadd.s32 3, %v6258_v42  ;;  %vm763_vm0 = vcmp.lt.s32.totalorder %v6117_v1, 0  ;;  %v478_v55 = vshll.u32 %v10267_v39, %v463_v8  ;;  %v479_v54 = vshrl.u32 %v10265_v46, %v464_v20 }
  0x2f   :  { %v5557_v14 = vadd.s32 4294967294, %v725_v27  ;;  %v6265_v49 = vsub.s32 %v821_v29, %v824_v43  ;;  %v468_v59 = vor.u32 %v467_v44, %v466_v40  ;;  %v471_v60 = vor.u32 %v470_v13, %v469_v25 }
  0x30   :  { %v474_v63 = vor.u32 %v473_v48, %v472_v47  ;;  %v477_v5 = vor.u32 %v476_v52, %v475_v51  ;;  %vm481_vm1 = vcmp.lt.s32.totalorder %v6249_v36, 1  ;;  %vm484_vm2 = vcmp.lt.s32.totalorder %v6249_v36, 4 }
  0x31   :  { %vm5558_vm15 = vcmp.lt.s32.totalorder %v5557_v14, 0  ;;  %v827_v58 = vsub.s32 0, %v6265_v49  ;;  %v480_v11 = vor.u32 %v479_v54, %v478_v55  ;;  %v847_v15 = vsub.s32 4, %v823_v34 }
  0x32   :  { %v728_v57 = vsel %vm5558_vm15, 0, %v5557_v14  ;;  %v486_v12 = vsel %vm484_vm2, %v474_v63, 2102212464  ;;  %vm482_vm3 = vcmp.lt.s32.totalorder %v6249_v36, 2  ;;  %vm483_vm4 = vcmp.lt.s32.totalorder %v6249_v36, 3 }
  0x33   :  { %v729_v26 = vsub.s32 32, %v728_v57  ;;  %v730_v61 = vshll.u32 %v6219_v9, %v728_v57  ;;  %v733_v62 = vsub.s32 4294967266, %v728_v57  ;;  %v5560_v3 = vmin.u32 %v827_v58, %v6265_v49 }
  0x34   :  { %v485_v19 = vsel %vm481_vm1, %v465_v50, %v468_v59  ;;  %v489_v20 = vsel %vm481_vm1, %v468_v59, %v471_v60  ;;  %vm6289_vm5 = vcmp.le.f32.partialorder %v761_v4, 0.7853982  ;;  %v490_v27 = vsel %vm484_vm2, %v477_v5, 920167782 }
  0x35   :  { %v731_v8 = vshrl.u32 %v713_v32, %v729_v26  ;;  %v734_v10 = vadd.s32 127, %v733_v62  ;;  %v829_v29 = vclz %v5560_v3  ;;  %v487_v32 = vsel %vm483_vm4, %v471_v60, %v486_v12 }
  0x36   :  { %v493_v40 = vsel %vm481_vm1, %v471_v60, %v474_v63  ;;  %v491_v44 = vsel %vm483_vm4, %v474_v63, %v490_v27  ;;  %v494_v4 = vsel %vm484_vm2, %v480_v11, 1326507024  ;;  %v848_v13 = vsel %vm763_vm0, %v847_v15, %v823_v34 }
  0x37   :  { %v732_v9 = vor.u32 %v731_v8, %v730_v61  ;;  %v735_v16 = vshll.u32 %v734_v10, 23  ;;  %v5561_v24 = vadd.s32 4294967294, %v829_v29  ;;  %v492_v14 = vsel %vm482_vm3, %v489_v20, %v491_v44 }
  0x38   :  { %v495_v47 = vsel %vm483_vm4, %v477_v5, %v494_v4  ;;  %v563_v52 = vadd.s32 1, %v6251_v38  ;;  %v488_v34 = vsel %vm482_vm3, %v485_v19, %v487_v32  ;;  %v244_v36 = vand.u32 2139095040, %v6239_v21 }
  0x39   :  { %v736_v25 = vor.u32 4788187, %v735_v16  ;;  %v739_v43 = vcvt.s32.f32 %v732_v9  ;;  %vm5562_vm6 = vcmp.lt.s32.totalorder %v5561_v24, 0  ;;  %v496_v51 = vsel %vm482_vm3, %v493_v40, %v495_v47 }
  0x3a   :  { %v832_v50 = vsel %vm5562_vm6, 0, %v5561_v24  ;;  %v6316_v59 = vmul.u32.u64.low %v6244_v30, %v496_v51  ;;  %v6317_v60 = vmul.u32.u64.high %v6244_v30, %v496_v51, %v6316_v59  ;;  %vm564_vm7 = vcmp.gt.s32.totalorder %v563_v52, 0 }
  0x3b   :  { %v737_v48 = vand.u32 2147483647, %v736_v25  ;;  %v833_v55 = vsub.s32 32, %v832_v50  ;;  %v834_v54 = vshll.u32 %v6265_v49, %v832_v50  ;;  %v837_v57 = vsub.s32 4294967266, %v832_v50 }
  0x3c   :  { %v6320_v62 = vmul.u32.u64.low %v6244_v30, %v492_v14  ;;  %v6321_v63 = vmul.u32.u64.high %v6244_v30, %v492_v14, %v6320_v62  ;;  %v6325_v49 = vand.u32 3, %v6258_v42  ;;  %v565_v3 = vsel %vm564_vm7, %v563_v52, 0 }
  0x3d   :  { %v740_v58 = vmul.f32 %v739_v43, %v737_v48  ;;  %v835_v26 = vshrl.u32 %v817_v45, %v833_v55  ;;  %v838_v61 = vadd.s32 127, %v837_v57  ;;  %v6328_v5 = vand.u32 3, %v750_v53 }
  0x3e   :  { %v567_v11 = vand.u32 31, %v565_v3  ;;  %v850_v12 = vsel %vm6289_vm5, 0, %v848_v13  ;;  %v504_v29 = vmul.u32 %v6244_v30, %v488_v34  ;;  %vm506_vm8 = vc.u32 %v6317_v60, %v6320_v62 }
  0x3f   :  { %v741_v38 = vxor.u32 2147483648, %v740_v58  ;;  %v836_v8 = vor.u32 %v835_v26, %v834_v54  ;;  %v839_v10 = vshll.u32 %v838_v61, 23  ;;  %v507_v9 = vadd.s32 1, %v6321_v63 }
  0x40   :  { %v6341_v16 = vshrl.u32 %v565_v3, 5  ;;  %v568_v19 = vsub.s32 32, %v567_v11  ;;  %v570_v20 = vshll.u32 %v10271_v31, %v567_v11  ;;  %v573_v32 = vshll.u32 %v10275_v33, %v567_v11 }
  0x41   :  { %v742_v45 = vsel %vm659_vm14, %v741_v38, %v740_v58  ;;  %v840_v53 = vor.u32 4788187, %v839_v10  ;;  %v843_v15 = vcvt.s32.f32 %v836_v8  ;;  %v508_v30 = vsel %vm506_vm8, %v507_v9, %v6321_v63 }
  0x42   :  { %v745_v42 = vsel %vm6231_vm13, %v6112_v0, %v742_v45  ;;  %v509_v27 = vadd.s32 %v508_v30, %v504_v29  ;;  %v571_v18 = vshrl.u32 %v10275_v33, %v568_v19  ;;  %v574_v40 = vshrl.u32 %v10273_v35, %v568_v19 }
  0x43   :  { %5903 = vcosq.f32 %v745_v42  ;;  %v841_v24 = vand.u32 2147483647, %v840_v53  ;;  %v576_v25 = vshll.u32 %v10273_v35, %v567_v11  ;;  %v577_v44 = vshrl.u32 %v10269_v37, %v568_v19 }
  0x44   :  { %5905 = vsinq.f32 %v745_v42  ;;  %v579_v4 = vshll.u32 %v10269_v37, %v567_v11  ;;  %v580_v13 = vshrl.u32 %v10267_v39, %v568_v19  ;;  %v854_v14 = vadd.s32 3, %v850_v12 }
  0x45   :  { %v844_v43 = vmul.f32 %v843_v15, %v841_v24  ;;  %v510_v47 = vadd.s32 536870912, %v509_v27  ;;  %v572_v48 = vor.u32 %v571_v18, %v570_v20  ;;  %v582_v50 = vshll.u32 %v10267_v39, %v567_v11 }
  0x46   :  { %vm1582_vm9 = vcmp.eq.s32.totalorder %v6325_v49, 2  ;;  %v575_v52 = vor.u32 %v574_v40, %v573_v32  ;;  %v581_v55 = vor.u32 %v580_v13, %v579_v4  ;;  %v583_v54 = vshrl.u32 %v10265_v46, %v568_v19 }
  0x47   :  { %v845_v51 = vxor.u32 2147483648, %v844_v43  ;;  %vm1579_vm10 = vcmp.eq.s32.totalorder %v6325_v49, 0  ;;  %v6356_v57 = vshrl.u32 %v510_v47, 30  ;;  %v569_v34 = vshrl.u32 %v10271_v31, %v568_v19 }
  0x48   :  { %v578_v58 = vor.u32 %v577_v44, %v576_v25  ;;  %vm585_vm11 = vcmp.lt.s32.totalorder %v6341_v16, 1  ;;  %vm1578_vm12 = vcmp.lt.s32.totalorder %v6325_v49, 2  ;;  %v584_v26 = vor.u32 %v583_v54, %v582_v50 }
  0x49   :  { %v846_v59 = vsel %vm763_vm0, %v845_v51, %v844_v43  ;;  %vm588_vm13 = vcmp.lt.s32.totalorder %v6341_v16, 4  ;;  %v6366_v61 = vshll.u32 %v561_v41, 8  ;;  %v512_v38 = vshll.u32 %v6356_v57, 30 }
  0x4a   :  { %v849_v63 = vsel %vm6289_vm5, %v6117_v1, %v846_v59  ;;  %vm587_vm14 = vcmp.lt.s32.totalorder %v6341_v16, 3  ;;  %v590_v3 = vsel %vm588_vm13, %v578_v58, 2102212464  ;;  %vm752_vm15 = vcmp.lt.s32.totalorder %v6328_v5, 2 }
  0x4b   :  { %5907 = vcosq.f32 %v849_v63  ;;  %vm586_vm0 = vcmp.lt.s32.totalorder %v6341_v16, 2  ;;  %v593_v17 = vsel %vm585_vm11, %v572_v48, %v575_v52  ;;  %v594_v41 = vsel %vm588_vm13, %v581_v55, 920167782 }
  0x4c   :  { %vm749_vm1 = vweird.f32 %v6112_v0  ;;  %5909 = vsinq.f32 %v849_v63  ;;  %v6382_v23 = vand.u32 3, %v850_v12  ;;  %v6384_v8 = vsub.s32 %v509_v27, %v512_v38 }
  0x4d   :  { %v589_v10 = vsel %vm585_vm11, %v569_v34, %v572_v48  ;;  %v591_v11 = vsel %vm587_vm14, %v575_v52, %v590_v3  ;;  %v595_v45 = vsel %vm587_vm14, %v578_v58, %v594_v41  ;;  %v597_v29 = vsel %vm585_vm11, %v575_v52, %v578_v58 }
  0x4e   :  { %v598_v42 = vsel %vm588_vm13, %v584_v26, 1326507024  ;;  %v6396_v53 = vand.u32 3, %v854_v14  ;;  %v515_v12 = vsub.s32 0, %v6384_v8  ;;  %v596_v15 = vsel %vm586_vm0, %v593_v17, %v595_v45 }
  0x4f   :  { %v599_v9 = vsel %vm587_vm14, %v581_v55, %v598_v42  ;;  %vm753_vm2 = vcmp.eq.s32.totalorder %v6328_v5, 0  ;;  %vm865_vm3 = vcmp.lt.s32.totalorder %v6222_v28, 8  ;;  %vm451_vm4 = vcmp.lt.s32.totalorder %v6126_v6, 0 }
  0x50   :  { %v5904_v19 = vpop.eup %5903  ;;  %v600_v20 = vsel %vm586_vm0, %v597_v29, %v599_v9  ;;  %v6409_v24 = vmul.u32.u64.low %v6366_v61, %v596_v15  ;;  %v6410_v30 = vmul.u32.u64.high %v6366_v61, %v596_v15, %v6409_v24  ;;  %vm756_vm5 = vcmp.eq.s32.totalorder %v6328_v5, 2 }
  0x51   :  { %v5906_v32 = vpop.eup %5905  ;;  %v757_v27 = vxor.u32 2147483648, %v5904_v19  ;;  %v5548_v18 = vmin.u32 %v515_v12, %v6384_v8  ;;  %v592_v40 = vsel %vm586_vm0, %v589_v10, %v591_v11  ;;  %vm1682_vm6 = vcmp.eq.s32.totalorder %v6382_v23, 0 }
  0x52   :  { %v754_v25 = vxor.u32 2147483648, %v5906_v32  ;;  %v6419_v43 = vmul.u32.u64.low %v6366_v61, %v600_v20  ;;  %v6420_v44 = vmul.u32.u64.high %v6366_v61, %v600_v20, %v6419_v43  ;;  %v245_v4 = vshrl.u32 %v244_v36, 23 }
  0x53   :  { %vm32_vm7 = vcmp.lt.s32.totalorder %v6222_v28, 4  ;;  %vm856_vm8 = vcmp.lt.s32.totalorder %v6396_v53, 2  ;;  %v1584_v13 = vsel %vm1582_vm9, %v757_v27, %v5906_v32  ;;  %vm1681_vm11 = vcmp.lt.s32.totalorder %v6382_v23, 2  ;;  %v5896_v28 = vld [vmem:[%s10259_s0 + $0x18] sm:$0xff]  }
  0x54   :  { %vm1685_vm13 = vcmp.eq.s32.totalorder %v6382_v23, 2  ;;  %v517_v16 = vclz %v5548_v18  ;;  %v755_v14 = vsel %vm753_vm2, %v5904_v19, %v754_v25  ;;  %v758_v47 = vsel %vm756_vm5, %v757_v27, %v5906_v32 }
  0x55   :  { %vm853_vm14 = vweird.f32 %v6117_v1  ;;  %v1581_v36 = vsel %vm1579_vm10, %v5904_v19, %v754_v25  ;;  %v608_v48 = vmul.u32 %v6366_v61, %v592_v40  ;;  %v535_v52 = vsub.s32 4, %v6356_v57 }
  0x56   :  { %v1585_v50 = vsel %vm1578_vm12, %v1581_v36, %v1584_v13  ;;  %v5549_v51 = vadd.s32 4294967294, %v517_v16  ;;  %v611_v55 = vadd.s32 1, %v6410_v30  ;;  %vm857_vm9 = vcmp.eq.s32.totalorder %v6396_v53, 0 }
  0x57   :  { %vm860_vm0 = vcmp.eq.s32.totalorder %v6396_v53, 2  ;;  %vm610_vm2 = vc.u32 %v6420_v44, %v6409_v24  ;;  %v5539_v54 = vadd.s32 4294967169, %v245_v4  ;;  %v759_v34 = vsel %vm752_vm15, %v755_v14, %v758_v47 }
  0x58   :  { %v505_v49 = vadd.s32 %v6320_v62, %v6317_v60  ;;  %vm5550_vm10 = vcmp.lt.s32.totalorder %v5549_v51, 0  ;;  %v612_v58 = vsel %vm610_vm2, %v611_v55, %v6410_v30  ;;  %v1586_v59 = vsel %vm749_vm1, nan, %v1585_v50  ;;  %v5908_v38 = vpop.eup %5907 }
  0x59   :  { %v520_v26 = vsel %vm5550_vm10, 0, %v5549_v51  ;;  %v613_v61 = vadd.s32 %v612_v58, %v608_v48  ;;  %v248_v63 = vand.u32 8388607, %v241_v2  ;;  %v536_v60 = vsel %vm451_vm4, %v535_v52, %v6356_v57  ;;  %v5910_v62 = vpop.eup %5909 }
  0x5a   :  { %v521_v3 = vsub.s32 32, %v520_v26  ;;  %v522_v17 = vshll.u32 %v6384_v8, %v520_v26  ;;  %v525_v5 = vsub.s32 4294967266, %v520_v26  ;;  %v760_v41 = vsel %vm749_vm1, nan, %v759_v34 }
  0x5b   :  { %v861_v10 = vxor.u32 2147483648, %v5908_v38  ;;  %v614_v11 = vadd.s32 536870912, %v613_v61  ;;  %v251_v45 = vadd.s32 1, %v5539_v54  ;;  %v858_v29 = vxor.u32 2147483648, %v5910_v62 }
  0x5c   :  { %v1696_v42 = vsel %vm865_vm3, %v1586_v59, %v6112_v0  ;;  %v523_v12 = vshrl.u32 %v505_v49, %v521_v3  ;;  %v526_v15 = vadd.s32 127, %v525_v5  ;;  %vm6490_vm15 = vcmp.le.f32.partialorder %v449_v22, 0.7853982 }
  0x5d   :  { %v862_v8 = vsel %vm860_vm0, %v861_v10, %v5910_v62  ;;  %v1687_v57 = vsel %vm1685_vm13, %v861_v10, %v5910_v62  ;;  %v6468_v9 = vshrl.u32 %v614_v11, 30  ;;  %vm252_vm12 = vcmp.gt.s32.totalorder %v251_v45, 0 }
  0x5e   :  { %v859_v19 = vsel %vm857_vm9, %v5908_v38, %v858_v29  ;;  %v1684_v20 = vsel %vm1682_vm6, %v5908_v38, %v858_v29  ;;  %v524_v30 = vor.u32 %v523_v12, %v522_v17  ;;  %v527_v32 = vshll.u32 %v526_v15, 23 }
  0x5f   :  { %v863_v0 = vsel %vm856_vm8, %v859_v19, %v862_v8  ;;  %v1688_v27 = vsel %vm1681_vm11, %v1684_v20, %v1687_v57  ;;  %v1704_v18 = vsel %vm32_vm7, %v760_v41, %v1696_v42  ;;  %v616_v40 = vshll.u32 %v6468_v9, 30 }
  0x60   :  { %v864_v25 = vsel %vm853_vm14, nan, %v863_v0  ;;  %v1689_v43 = vsel %vm853_vm14, nan, %v1688_v27  ;;  %v528_v4 = vor.u32 4788187, %v527_v32  ;;  %v531_v13 = vcvt.s32.f32 %v524_v30 }
  0x61   :  { %v1697_v53 = vsel %vm865_vm3, %v1689_v43, %v6117_v1  ;;  %v6494_v16 = vsub.s32 %v613_v61, %v616_v40  ;;  %v253_v14 = vsel %vm252_vm12, %v251_v45, 0  ;;  %v6501_v48 = vsel %vm6490_vm15, 0, %v536_v60 }
  0x62   :  { %v1705_v47 = vsel %vm32_vm7, %v864_v25, %v1697_v53  ;;  %v529_v36 = vand.u32 2147483647, %v528_v4  ;;  %v249_v50 = vor.u32 8388608, %v248_v63  ;;  %v6504_v22 = vshrl.u32 %v253_v14, 5 }
  0x63   :  { %v1733_v1 = vpack.c.bf16 %v1705_v47, %v1704_v18  ;;  %v619_v51 = vsub.s32 0, %v6494_v16  ;;  %v255_v55 = vand.u32 31, %v253_v14  ;;  %v542_v54 = vadd.s32 3, %v6501_v48 }
  0x64   :  { %v532_v52 = vmul.f32 %v531_v13, %v529_v36  ;;  %v609_v34 = vadd.s32 %v6409_v24, %v6420_v44  ;;  %v6511_v61 = vshll.u32 %v249_v50, 8  ;;  %v639_v38 = vsub.s32 4, %v6468_v9 }
  0x65   :  { %5736 = vmatprep.subr.bf16.mxu0 %v1733_v1  ;;  %5796 = vmatprep.subr.bf16.mxu1 %v1733_v1  ;;  %v5552_v49 = vmin.u32 %v619_v51, %v6494_v16  ;;  %v256_v59 = vsub.s32 32, %v255_v55  ;;  %v258_v26 = vshll.u32 %v10271_v31, %v255_v55  ;;  %vm273_vm1 = vcmp.lt.s32.totalorder %v6504_v22, 1  ;;  %v6552_v51 = vld [vmem:[%s10260_s1 + $0x18] sm:$0xff] }
  0x66   :  { %5737 = vmatpush3.bf16.msra.mxu0 %v1733_v1  ;;  %5800 = vmatpush3.bf16.msra.mxu1 %v1733_v1  ;;  %v533_v58 = vxor.u32 2147483648, %v532_v52  ;;  %vm274_vm5 = vcmp.lt.s32.totalorder %v6504_v22, 2  ;;  %v261_v17 = vshll.u32 %v10275_v33, %v255_v55  ;;  %vm555_vm6 = vcmp.lt.s32.totalorder %v6205_v56, 0 }
  0x67   :  { %v621_v63 = vclz %v5552_v49  ;;  %v257_v44 = vshrl.u32 %v10271_v31, %v256_v59  ;;  %v259_v3 = vshrl.u32 %v10275_v33, %v256_v59  ;;  %v262_v62 = vshrl.u32 %v10273_v35, %v256_v59 }
  0x68   :  { %v534_v24 = vsel %vm451_vm4, %v533_v58, %v532_v52  ;;  %v264_v41 = vshll.u32 %v10273_v35, %v255_v55  ;;  %v265_v11 = vshrl.u32 %v10269_v37, %v256_v59  ;;  %v267_v45 = vshll.u32 %v10269_v37, %v255_v55 }
  0x69   :  { %v537_v5 = vsel %vm6490_vm15, %v6126_v6, %v534_v24  ;;  %v5553_v60 = vadd.s32 4294967294, %v621_v63  ;;  %v260_v10 = vor.u32 %v259_v3, %v258_v26  ;;  %v263_v29 = vor.u32 %v262_v62, %v261_v17 }
  0x6a   :  { %5911 = vcosq.f32 %v537_v5  ;;  %v268_v42 = vshrl.u32 %v10267_v39, %v256_v59  ;;  %v266_v15 = vor.u32 %v265_v11, %v264_v41  ;;  %v270_v8 = vshll.u32 %v10267_v39, %v255_v55 }
  0x6b   :  { %5913 = vsinq.f32 %v537_v5  ;;  %vm5554_vm4 = vcmp.lt.s32.totalorder %v5553_v60, 0  ;;  %v271_v57 = vshrl.u32 %v10265_v46, %v256_v59  ;;  %vm275_vm8 = vcmp.lt.s32.totalorder %v6504_v22, 3 }
  0x6c   :  { %v624_v12 = vsel %vm5554_vm4, 0, %v5553_v60  ;;  %v269_v32 = vor.u32 %v268_v42, %v267_v45  ;;  %vm276_vm11 = vcmp.lt.s32.totalorder %v6504_v22, 4  ;;  %v277_v27 = vsel %vm273_vm1, %v257_v44, %v260_v10 }
  0x6d   :  { %v625_v19 = vsub.s32 32, %v624_v12  ;;  %v626_v20 = vshll.u32 %v6494_v16, %v624_v12  ;;  %v629_v30 = vsub.s32 4294967266, %v624_v12  ;;  %v272_v0 = vor.u32 %v271_v57, %v270_v8 }
  0x6e   :  { %v278_v25 = vsel %vm276_vm11, %v266_v15, 2102212464  ;;  %v281_v43 = vsel %vm273_vm1, %v260_v10, %v263_v29  ;;  %v282_v13 = vsel %vm276_vm11, %v269_v32, 920167782  ;;  %v285_v53 = vsel %vm273_vm1, %v263_v29, %v266_v15 }
  0x6f   :  { %v627_v18 = vshrl.u32 %v609_v34, %v625_v19  ;;  %v630_v40 = vadd.s32 127, %v629_v30  ;;  %v279_v4 = vsel %vm275_vm8, %v263_v29, %v278_v25  ;;  %v286_v23 = vsel %vm276_vm11, %v272_v0, 1326507024 }
  0x70   :  { %v543_v16 = vand.u32 3, %v542_v54  ;;  %v283_v36 = vsel %vm275_vm8, %v266_v15, %v282_v13  ;;  %v640_v50 = vsel %vm555_vm6, %v639_v38, %v6468_v9  ;;  %v1371_v1 = vand.u32 3, %v6501_v48 }
  0x71   :  { %v628_v14 = vor.u32 %v627_v18, %v626_v20  ;;  %v631_v47 = vshll.u32 %v630_v40, 23  ;;  %v284_v52 = vsel %vm274_vm5, %v281_v43, %v283_v36  ;;  %v287_v55 = vsel %vm275_vm8, %v269_v32, %v286_v23  ;;  %v6601_v40 = vld [vmem:[%s10260_s1] sm:$0xff] }
  0x72   :  { %v280_v49 = vsel %vm274_vm5, %v277_v27, %v279_v4  ;;  %v288_v9 = vsel %vm274_vm5, %v285_v53, %v287_v55  ;;  %v6567_v59 = vmul.u32.u64.low %v6511_v61, %v284_v52  ;;  %v6568_v26 = vmul.u32.u64.high %v6511_v61, %v284_v52, %v6567_v59 }
  0x73   :  { %v632_v54 = vor.u32 4788187, %v631_v47  ;;  %v635_v34 = vcvt.s32.f32 %v628_v14  ;;  %v6563_v48 = vmul.u32.u64.low %v6511_v61, %v288_v9  ;;  %v6564_v58 = vmul.u32.u64.high %v6511_v61, %v288_v9, %v6563_v48 }
  0x74   :  { %v348_v38 = vand.u32 2139095040, %v6552_v51  ;;  %vm544_vm13 = vcmp.lt.s32.totalorder %v543_v16, 2  ;;  %vm545_vm14 = vcmp.eq.s32.totalorder %v543_v16, 0  ;;  %vm548_vm9 = vcmp.eq.s32.totalorder %v543_v16, 2 }
  0x75   :  { %v633_v63 = vand.u32 2147483647, %v632_v54  ;;  %vm6573_vm0 = vcmp.le.f32.partialorder %v553_v7, 0.7853982  ;;  %v296_v17 = vmul.u32 %v6511_v61, %v280_v49  ;;  %vm1376_vm2 = vcmp.eq.s32.totalorder %v1371_v1, 2 }
  0x76   :  { %v642_v3 = vsel %vm6573_vm0, 0, %v640_v50  ;;  %v349_v5 = vshrl.u32 %v348_v38, 23  ;;  %vm298_vm10 = vc.u32 %v6564_v58, %v6567_v59  ;;  %v299_v41 = vadd.s32 1, %v6568_v26  ;;  %v6638_v38 = vld [vmem:[%s10260_s1 + $0x20] sm:$0xff] }
  0x77   :  { %v5912_v22 = vpop.eup %5911  ;;  %v636_v44 = vmul.f32 %v635_v34, %v633_v63  ;;  %vm1373_vm12 = vcmp.eq.s32.totalorder %v1371_v1, 0  ;;  %v646_v45 = vadd.s32 3, %v642_v3  ;;  %vm1372_vm15 = vcmp.lt.s32.totalorder %v1371_v1, 2 }
  0x78   :  { %v5914_v60 = vpop.eup %5913  ;;  %v549_v62 = vxor.u32 2147483648, %v5912_v22  ;;  %v5543_v11 = vadd.s32 4294967169, %v349_v5  ;;  %v300_v29 = vsel %vm298_vm10, %v299_v41, %v6568_v26  ;;  %v345_v42 = vand.u32 2147483647, %v6552_v51 }
  0x79   :  { %v546_v10 = vxor.u32 2147483648, %v5914_v60  ;;  %v637_v7 = vxor.u32 2147483648, %v636_v44  ;;  %v301_v8 = vadd.s32 %v300_v29, %v296_v17  ;;  %vm541_vm1 = vweird.f32 %v6126_v6 }
  0x7a   :  { %v550_v61 = vsel %vm548_vm9, %v549_v62, %v5914_v60  ;;  %v1378_v15 = vsel %vm1376_vm2, %v549_v62, %v5914_v60  ;;  %v355_v30 = vadd.s32 1, %v5543_v11  ;;  %v6592_v32 = vand.u32 3, %v642_v3 }
  0x7b   :  { %v638_v12 = vsel %vm555_vm6, %v637_v7, %v636_v44  ;;  %v547_v57 = vsel %vm545_vm14, %v5912_v22, %v546_v10  ;;  %v1375_v20 = vsel %vm1373_vm12, %v5912_v22, %v546_v10  ;;  %v302_v0 = vadd.s32 536870912, %v301_v8 }
  0x7c   :  { %v641_v19 = vsel %vm6573_vm0, %v6205_v56, %v638_v12  ;;  %v6594_v27 = vand.u32 3, %v646_v45  ;;  %v352_v18 = vand.u32 8388607, %v345_v42  ;;  %vm356_vm5 = vcmp.gt.s32.totalorder %v355_v30, 0 }
  0x7d   :  { %5915 = vcosq.f32 %v641_v19  ;;  %v551_v25 = vsel %vm544_vm13, %v547_v57, %v550_v61  ;;  %v1379_v43 = vsel %vm1372_vm15, %v1375_v20, %v1378_v15  ;;  %v6605_v4 = vshrl.u32 %v302_v0, 30 }
  0x7e   :  { %5917 = vsinq.f32 %v641_v19  ;;  %v357_v13 = vsel %vm356_vm5, %v355_v30, 0  ;;  %v6608_v23 = vadd.s32 %v6567_v59, %v6564_v58  ;;  %v36_v47 = vand.u32 2139095040, %v6601_v40 }
  0x7f   :  { %v359_v53 = vand.u32 31, %v357_v13  ;;  %v304_v14 = vshll.u32 %v6605_v4, 30  ;;  %v552_v36 = vsel %vm541_vm1, nan, %v551_v25  ;;  %vm652_vm6 = vcmp.eq.s32.totalorder %v6594_v27, 2 }
  0x80   :  { %v1380_v16 = vsel %vm541_vm1, nan, %v1379_v43  ;;  %vm1479_vm4 = vcmp.eq.s32.totalorder %v6592_v32, 2  ;;  %v353_v50 = vor.u32 8388608, %v352_v18  ;;  %vm649_vm8 = vcmp.eq.s32.totalorder %v6594_v27, 0 }
  0x81   :  { %v360_v1 = vsub.s32 32, %v359_v53  ;;  %vm1476_vm11 = vcmp.eq.s32.totalorder %v6592_v32, 0  ;;  %v6620_v52 = vsub.s32 %v301_v8, %v304_v14  ;;  %v362_v55 = vshll.u32 %v10271_v31, %v359_v53 }
  0x82   :  { %v365_v54 = vshll.u32 %v10275_v33, %v359_v53  ;;  %v371_v34 = vshll.u32 %v10269_v37, %v359_v53  ;;  %vm648_vm13 = vcmp.lt.s32.totalorder %v6594_v27, 2  ;;  %vm1475_vm14 = vcmp.lt.s32.totalorder %v6592_v32, 2 }
  0x83   :  { %v358_v6 = vshrl.u32 %v357_v13, 5  ;;  %v363_v49 = vshrl.u32 %v10275_v33, %v360_v1  ;;  %v366_v9 = vshrl.u32 %v10273_v35, %v360_v1  ;;  %v368_v48 = vshll.u32 %v10273_v35, %v359_v53 }
  0x84   :  { %vm645_vm9 = vweird.f32 %v6205_v56  ;;  %v307_v58 = vsub.s32 0, %v6620_v52  ;;  %v369_v59 = vshrl.u32 %v10269_v37, %v360_v1  ;;  %v372_v26 = vshrl.u32 %v10267_v39, %v360_v1 }
  0x85   :  { %v374_v63 = vshll.u32 %v10267_v39, %v359_v53  ;;  %v1694_v24 = vsel %vm865_vm3, %v1380_v16, %v6638_v38  ;;  %v361_v22 = vshrl.u32 %v10271_v31, %v360_v1  ;;  %v375_v44 = vshrl.u32 %v10265_v46, %v360_v1 }
  0x86   :  { %v37_v3 = vshrl.u32 %v36_v47, 23  ;;  %v5540_v17 = vmin.u32 %v307_v58, %v6620_v52  ;;  %v364_v5 = vor.u32 %v363_v49, %v362_v55  ;;  %v367_v60 = vor.u32 %v366_v9, %v365_v54 }
  0x87   :  { %v373_v62 = vor.u32 %v372_v26, %v371_v34  ;;  %v370_v41 = vor.u32 %v369_v59, %v368_v48  ;;  %vm377_vm0 = vcmp.lt.s32.totalorder %v358_v6, 1  ;;  %vm380_vm2 = vcmp.lt.s32.totalorder %v358_v6, 4 }
  0x88   :  { %v6646_v10 = vshll.u32 %v353_v50, 8  ;;  %v1702_v7 = vsel %vm32_vm7, %v552_v36, %v1694_v24  ;;  %v309_v11 = vclz %v5540_v17  ;;  %v376_v45 = vor.u32 %v375_v44, %v374_v63 }
  0x89   :  { %vm379_vm10 = vcmp.lt.s32.totalorder %v358_v6, 3  ;;  %vm378_vm12 = vcmp.lt.s32.totalorder %v358_v6, 2  ;;  %v382_v61 = vsel %vm380_vm2, %v370_v41, 2102212464  ;;  %v386_v12 = vsel %vm380_vm2, %v373_v62, 920167782 }
  0x8a   :  { %v5916_v29 = vpop.eup %5915  ;;  %v5531_v15 = vadd.s32 4294967169, %v37_v3  ;;  %v5541_v19 = vadd.s32 4294967294, %v309_v11  ;;  %v381_v20 = vsel %vm377_vm0, %v361_v22, %v364_v5  ;;  %v385_v30 = vsel %vm377_vm0, %v364_v5, %v367_v60 }
  0x8b   :  { %v5918_v8 = vpop.eup %5917  ;;  %v653_v57 = vxor.u32 2147483648, %v5916_v29  ;;  %v383_v18 = vsel %vm379_vm10, %v367_v60, %v382_v61  ;;  %v387_v25 = vsel %vm379_vm10, %v370_v41, %v386_v12  ;;  %v389_v43 = vsel %vm377_vm0, %v367_v60, %v370_v41 }
  0x8c   :  { %v650_v0 = vxor.u32 2147483648, %v5918_v8  ;;  %vm5542_vm15 = vcmp.lt.s32.totalorder %v5541_v19, 0  ;;  %v390_v14 = vsel %vm380_vm2, %v376_v45, 1326507024  ;;  %v388_v34 = vsel %vm378_vm12, %v385_v30, %v387_v25  ;;  %v6709_v45 = vld [vmem:[%s10260_s1 + $0x8] sm:$0xff] }
  0x8d   :  { %v654_v13 = vsel %vm652_vm6, %v653_v57, %v5918_v8  ;;  %v1481_v53 = vsel %vm1479_vm4, %v653_v57, %v5918_v8  ;;  %v312_v16 = vsel %vm5542_vm15, 0, %v5541_v19  ;;  %v391_v50 = vsel %vm379_vm10, %v373_v62, %v390_v14 }
  0x8e   :  { %v651_v47 = vsel %vm649_vm8, %v5916_v29, %v650_v0  ;;  %v1478_v36 = vsel %vm1476_vm11, %v5916_v29, %v650_v0  ;;  %v313_v54 = vsub.s32 32, %v312_v16  ;;  %v317_v48 = vsub.s32 4294967266, %v312_v16 }
  0x8f   :  { %v655_v1 = vsel %vm648_vm13, %v651_v47, %v654_v13  ;;  %v1482_v55 = vsel %vm1475_vm14, %v1478_v36, %v1481_v53  ;;  %v392_v58 = vsel %vm378_vm12, %v389_v43, %v391_v50  ;;  %v384_v59 = vsel %vm378_vm12, %v381_v20, %v383_v18 }
  0x90   :  { %v656_v49 = vsel %vm645_vm9, nan, %v655_v1  ;;  %v1483_v9 = vsel %vm645_vm9, nan, %v1482_v55  ;;  %v6682_v32 = vmul.u32.u64.low %v6646_v10, %v392_v58  ;;  %v6683_v26 = vmul.u32.u64.high %v6646_v10, %v392_v58, %v6682_v32 }
  0x91   :  { %v1695_v27 = vsel %vm865_vm3, %v1483_v9, %v6205_v56  ;;  %v318_v24 = vadd.s32 127, %v317_v48  ;;  %v6688_v22 = vmul.u32.u64.low %v6646_v10, %v388_v34  ;;  %v6689_v44 = vmul.u32.u64.high %v6646_v10, %v388_v34, %v6688_v22 }
  0x92   :  { %v1703_v63 = vsel %vm32_vm7, %v656_v49, %v1695_v27  ;;  %v314_v17 = vshll.u32 %v6620_v52, %v312_v16  ;;  %v315_v56 = vshrl.u32 %v6608_v23, %v313_v54  ;;  %v43_v5 = vadd.s32 1, %v5531_v15  ;;  %v5891_v23 = vld [vmem:[%s10259_s0] sm:$0xff]   ;;  %v5892_v52 = vld [vmem:[%s10259_s0 + $0x50] sm:$0xff]  }
  0x93   :  { %v1732_v3 = vpack.c.bf16 %v1703_v63, %v1702_v7  ;;  %v319_v6 = vshll.u32 %v318_v24, 23  ;;  %v400_v60 = vmul.u32 %v6646_v10, %v384_v59  ;;  %vm402_vm1 = vc.u32 %v6683_v26, %v6688_v22 }
  0x94   :  { %v403_v62 = vadd.s32 1, %v6689_v44  ;;  %v33_v41 = vand.u32 2147483647, %v6601_v40  ;;  %vm44_vm5 = vcmp.gt.s32.totalorder %v43_v5, 0  ;;  %v316_v7 = vor.u32 %v315_v56, %v314_v17 }
  0x95   :  { %5738 = vmatprep.subr.bf16.mxu0 %v1732_v3  ;;  %5797 = vmatprep.subr.bf16.mxu1 %v1732_v3  ;;  %v320_v10 = vor.u32 4788187, %v319_v6  ;;  %v45_v29 = vsel %vm44_vm5, %v43_v5, 0  ;;  %vm1794_vm6 = vcmask 523264   ;;  %v140_v19 = vand.u32 2139095040, %v6709_v45 }
  0x96   :  { %5739 = vmatpush3.bf16.msra.mxu0 %v1732_v3  ;;  %5801 = vmatpush3.bf16.msra.mxu1 %v1732_v3  ;;  %v404_v11 = vsel %vm402_vm1, %v403_v62, %v6689_v44  ;;  %v47_v12 = vand.u32 31, %v45_v29  ;;  %v40_v8 = vand.u32 8388607, %v33_v41  ;;  %v323_v30 = vcvt.s32.f32 %v316_v7 }
  0x97   :  { %v405_v61 = vadd.s32 %v404_v11, %v400_v60  ;;  %5744 = vmatprep.mubr.msk.bf16.mxu0 %vm1794_vm6, %v5891_v23  ;;  %5764 = vmatprep.mubr.msk.bf16.mxu1 %vm1794_vm6, %v5892_v52  ;;  %v321_v20 = vand.u32 2147483647, %v320_v10  ;;  %v6723_v14 = vshrl.u32 %v45_v29, 5  ;;  %v141_v1 = vshrl.u32 %v140_v19, 23 }
  0x98   :  { %v48_v57 = vsub.s32 32, %v47_v12  ;;  %v50_v0 = vshll.u32 %v10271_v31, %v47_v12  ;;  %v59_v18 = vshll.u32 %v10269_v37, %v47_v12  ;;  %v53_v13 = vshll.u32 %v10275_v33, %v47_v12 }
  0x99   :  { %v406_v15 = vadd.s32 536870912, %v405_v61  ;;  %v56_v47 = vshll.u32 %v10273_v35, %v47_v12  ;;  %v324_v55 = vmul.f32 %v323_v30, %v321_v20  ;;  %v62_v34 = vshll.u32 %v10267_v39, %v47_v12 }
  0x9a   :  { %v51_v43 = vshrl.u32 %v10275_v33, %v48_v57  ;;  %v54_v53 = vshrl.u32 %v10273_v35, %v48_v57  ;;  %v57_v36 = vshrl.u32 %v10269_v37, %v48_v57  ;;  %v60_v16 = vshrl.u32 %v10267_v39, %v48_v57 }
  0x9b   :  { %v6718_v25 = vshrl.u32 %v406_v15, 30  ;;  %v63_v49 = vshrl.u32 %v10265_v46, %v48_v57  ;;  %v41_v48 = vor.u32 8388608, %v40_v8  ;;  %vm6735_vm4 = vcmp.le.f32.partialorder %v241_v2, 0.7853982 }
  0x9c   :  { %v61_v54 = vor.u32 %v60_v16, %v59_v18  ;;  %v52_v58 = vor.u32 %v51_v43, %v50_v0  ;;  %v55_v27 = vor.u32 %v54_v53, %v53_v13  ;;  %v327_v32 = vsub.s32 4, %v6605_v4  ;;  %v6788_v43 = vld [vmem:[%s10260_s1 + $0x10] sm:$0xff] }
  0x9d   :  { %v408_v50 = vshll.u32 %v6718_v25, 30  ;;  %v58_v63 = vor.u32 %v57_v36, %v56_v47  ;;  %vm65_vm8 = vcmp.lt.s32.totalorder %v6723_v14, 1  ;;  %vm243_vm11 = vcmp.lt.s32.totalorder %v6239_v21, 0 }
  0x9e   :  { %vm67_vm13 = vcmp.lt.s32.totalorder %v6723_v14, 3  ;;  %vm68_vm14 = vcmp.lt.s32.totalorder %v6723_v14, 4  ;;  %v325_v44 = vxor.u32 2147483648, %v324_v55  ;;  %v64_v3 = vor.u32 %v63_v49, %v62_v34 }
  0x9f   :  { %v6731_v9 = vsub.s32 %v405_v61, %v408_v50  ;;  %v74_v2 = vsel %vm68_vm14, %v61_v54, 920167782  ;;  %v5535_v17 = vadd.s32 4294967169, %v141_v1  ;;  %vm66_vm9 = vcmp.lt.s32.totalorder %v6723_v14, 2 }
  0xa0   :  { %v73_v6 = vsel %vm65_vm8, %v52_v58, %v55_v27  ;;  %v81_v5 = vshll.u32 %v41_v48, 8  ;;  %v328_v60 = vsel %vm243_vm11, %v327_v32, %v6605_v4  ;;  %v49_v62 = vshrl.u32 %v10271_v31, %v48_v57 }
  0xa1   :  { %v411_v24 = vsub.s32 0, %v6731_v9  ;;  %v75_v23 = vsel %vm67_vm13, %v58_v63, %v74_v2  ;;  %v137_v52 = vand.u32 2147483647, %v6709_v45  ;;  %v401_v7 = vadd.s32 %v6688_v22, %v6683_v26 }
  0xa2   :  { %v70_v11 = vsel %vm68_vm14, %v58_v63, 2102212464  ;;  %v77_v29 = vsel %vm65_vm8, %v55_v27, %v58_v63  ;;  %v326_v4 = vsel %vm243_vm11, %v325_v44, %v324_v55  ;;  %v76_v61 = vsel %vm66_vm9, %v73_v6, %v75_v23 }
  0xa3   :  { %v5544_v56 = vmin.u32 %v411_v24, %v6731_v9  ;;  %v78_v12 = vsel %vm68_vm14, %v64_v3, 1326507024  ;;  %v147_v15 = vadd.s32 1, %v5535_v17  ;;  %v69_v19 = vsel %vm65_vm8, %v49_v62, %v52_v58 }
  0xa4   :  { %v79_v26 = vsel %vm67_vm13, %v61_v54, %v78_v12  ;;  %v6772_v22 = vmul.u32.u64.low %v81_v5, %v76_v61  ;;  %v6773_v57 = vmul.u32.u64.high %v81_v5, %v76_v61, %v6772_v22  ;;  %v71_v21 = vsel %vm67_vm13, %v55_v27, %v70_v11 }
  0xa5   :  { %v413_v10 = vclz %v5544_v56  ;;  %v80_v20 = vsel %vm66_vm9, %v77_v29, %v79_v26  ;;  %vm148_vm0 = vcmp.gt.s32.totalorder %v147_v15, 0  ;;  %v329_v13 = vsel %vm6735_vm4, %v6788_v43, %v326_v4 }
  0xa6   :  { %v6782_v30 = vmul.u32.u64.low %v81_v5, %v80_v20  ;;  %v6783_v0 = vmul.u32.u64.high %v81_v5, %v80_v20, %v6782_v30  ;;  %v149_v18 = vsel %vm148_vm0, %v147_v15, 0  ;;  %v6795_v53 = vsel %vm6735_vm4, 0, %v328_v60 }
  0xa7   :  { %v5545_v8 = vadd.s32 4294967294, %v413_v10  ;;  %v151_v36 = vand.u32 31, %v149_v18  ;;  %v72_v55 = vsel %vm66_vm9, %v69_v19, %v71_v21  ;;  %v91_v54 = vadd.s32 1, %v6773_v57 }
  0xa8   :  { %5919 = vcosq.f32 %v329_v13  ;;  %v334_v49 = vadd.s32 3, %v6795_v53  ;;  %v88_v27 = vmul.u32 %v81_v5, %v72_v55  ;;  %vm90_vm10 = vc.u32 %v6783_v0, %v6772_v22 }
  0xa9   :  { %vm5546_vm2 = vcmp.lt.s32.totalorder %v5545_v8, 0  ;;  %v152_v34 = vsub.s32 32, %v151_v36  ;;  %5921 = vsinq.f32 %v329_v13  ;;  %vm347_vm12 = vcmp.lt.s32.totalorder %v6552_v51, 0 }
  0xaa   :  { %v416_v47 = vsel %vm5546_vm2, 0, %v5545_v8  ;;  %v144_v14 = vand.u32 8388607, %v137_v52  ;;  %vm6809_vm15 = vcmp.le.f32.partialorder %v345_v42, 0.7853982  ;;  %v92_v63 = vsel %vm90_vm10, %v91_v54, %v6773_v57 }
  0xab   :  { %v417_v16 = vsub.s32 32, %v416_v47  ;;  %v418_v50 = vshll.u32 %v6731_v9, %v416_v47  ;;  %v421_v1 = vsub.s32 4294967266, %v416_v47  ;;  %v154_v24 = vshll.u32 %v10271_v31, %v151_v36 }
  0xac   :  { %v155_v44 = vshrl.u32 %v10275_v33, %v152_v34  ;;  %v6816_v3 = vand.u32 3, %v334_v49  ;;  %v157_v56 = vshll.u32 %v10275_v33, %v151_v36  ;;  %v431_v6 = vsub.s32 4, %v6718_v25 }
  0xad   :  { %v419_v48 = vshrl.u32 %v401_v7, %v417_v16  ;;  %v422_v58 = vadd.s32 127, %v421_v1  ;;  %v93_v5 = vadd.s32 %v92_v63, %v88_v27  ;;  %v150_v60 = vshrl.u32 %v149_v18, 5 }
  0xae   :  { %v158_v42 = vshrl.u32 %v10273_v35, %v152_v34  ;;  %v145_v23 = vor.u32 8388608, %v144_v14  ;;  %v160_v7 = vshll.u32 %v10273_v35, %v151_v36  ;;  %v161_v10 = vshrl.u32 %v10269_v37, %v152_v34 }
  0xaf   :  { %v420_v9 = vor.u32 %v419_v48, %v418_v50  ;;  %v423_v59 = vshll.u32 %v422_v58, 23  ;;  %v94_v11 = vadd.s32 536870912, %v93_v5  ;;  %v156_v29 = vor.u32 %v155_v44, %v154_v24 }
  0xb0   :  { %v163_v4 = vshll.u32 %v10269_v37, %v151_v36  ;;  %v164_v61 = vshrl.u32 %v10267_v39, %v152_v34  ;;  %v159_v15 = vor.u32 %v158_v42, %v157_v56  ;;  %v166_v8 = vshll.u32 %v10267_v39, %v151_v36 }
  0xb1   :  { %v424_v2 = vor.u32 4788187, %v423_v59  ;;  %v427_v17 = vcvt.s32.f32 %v420_v9  ;;  %v167_v26 = vshrl.u32 %v10265_v46, %v152_v34  ;;  %v432_v57 = vsel %vm347_vm12, %v431_v6, %v6718_v25 }
  0xb2   :  { %v6830_v19 = vshrl.u32 %v94_v11, 30  ;;  %v165_v21 = vor.u32 %v164_v61, %v163_v4  ;;  %vm169_vm1 = vcmp.lt.s32.totalorder %v150_v60, 1  ;;  %v153_v30 = vshrl.u32 %v10271_v31, %v152_v34 }
  0xb3   :  { %v425_v62 = vand.u32 2147483647, %v424_v2  ;;  %v162_v18 = vor.u32 %v161_v10, %v160_v7  ;;  %vm172_vm5 = vcmp.lt.s32.totalorder %v150_v60, 4  ;;  %vm170_vm4 = vcmp.lt.s32.totalorder %v150_v60, 2 }
  0xb4   :  { %v96_v13 = vshll.u32 %v6830_v19, 30  ;;  %vm171_vm8 = vcmp.lt.s32.totalorder %v150_v60, 3  ;;  %v6834_v47 = vshll.u32 %v145_v23, 8  ;;  %v168_v16 = vor.u32 %v167_v26, %v166_v8 }
  0xb5   :  { %v428_v12 = vmul.f32 %v427_v17, %v425_v62  ;;  %v177_v25 = vsel %vm169_vm1, %v156_v29, %v159_v15  ;;  %v178_v50 = vsel %vm172_vm5, %v165_v21, 920167782  ;;  %v5920_v1 = vpop.eup %5919  ;;  %v1165_v54 = vand.u32 3, %v6795_v53 }
  0xb6   :  { %v6844_v34 = vsub.s32 %v93_v5, %v96_v13  ;;  %v174_v49 = vsel %vm172_vm5, %v162_v18, 2102212464  ;;  %v5922_v48 = vpop.eup %5921  ;;  %v434_v58 = vsel %vm6809_vm15, 0, %v432_v57  ;;  %v173_v27 = vsel %vm169_vm1, %v153_v30, %v156_v29 }
  0xb7   :  { %v429_v20 = vxor.u32 2147483648, %v428_v12  ;;  %v179_v9 = vsel %vm171_vm8, %v162_v18, %v178_v50  ;;  %v181_v53 = vsel %vm169_vm1, %v159_v15, %v162_v18  ;;  %vm333_vm11 = vweird.f32 %v6788_v43 }
  0xb8   :  { %v99_v59 = vsub.s32 0, %v6844_v34  ;;  %v180_v14 = vsel %vm170_vm4, %v177_v25, %v179_v9  ;;  %v175_v63 = vsel %vm171_vm8, %v159_v15, %v174_v49  ;;  %v182_v24 = vsel %vm172_vm5, %v168_v16, 1326507024 }
  0xb9   :  { %v430_v36 = vsel %vm347_vm12, %v429_v20, %v428_v12  ;;  %v6858_v32 = vmul.u32.u64.low %v6834_v47, %v180_v14  ;;  %v6859_v44 = vmul.u32.u64.high %v6834_v47, %v180_v14, %v6858_v32  ;;  %v338_v2 = vxor.u32 2147483648, %v5922_v48 }
  0xba   :  { %v433_v55 = vsel %vm6809_vm15, %v6552_v51, %v430_v36  ;;  %v341_v17 = vxor.u32 2147483648, %v5920_v1  ;;  %v5532_v56 = vmin.u32 %v99_v59, %v6844_v34  ;;  %v183_v6 = vsel %vm171_vm8, %v165_v21, %v182_v24 }
  0xbb   :  { %5923 = vcosq.f32 %v433_v55  ;;  %v438_v5 = vadd.s32 3, %v434_v58  ;;  %vm1167_vm13 = vcmp.eq.s32.totalorder %v1165_v54, 0  ;;  %vm1170_vm14 = vcmp.eq.s32.totalorder %v1165_v54, 2 }
  0xbc   :  { %5925 = vsinq.f32 %v433_v55  ;;  %v184_v42 = vsel %vm170_vm4, %v181_v53, %v183_v6  ;;  %vm337_vm9 = vcmp.eq.s32.totalorder %v6816_v3, 0  ;;  %vm340_vm0 = vcmp.eq.s32.totalorder %v6816_v3, 2 }
  0xbd   :  { %v101_v62 = vclz %v5532_v56  ;;  %v176_v23 = vsel %vm170_vm4, %v173_v27, %v175_v63  ;;  %vm1166_vm2 = vcmp.lt.s32.totalorder %v1165_v54, 2  ;;  %v1268_v7 = vand.u32 3, %v434_v58 }
  0xbe   :  { %v6869_v10 = vmul.u32.u64.low %v6834_v47, %v184_v42  ;;  %v6870_v11 = vmul.u32.u64.high %v6834_v47, %v184_v42, %v6869_v10  ;;  %v1169_v29 = vsel %vm1167_vm13, %v5920_v1, %v338_v2  ;;  %v1172_v4 = vsel %vm1170_vm14, %v341_v17, %v5922_v48 }
  0xbf   :  { %v5533_v61 = vadd.s32 4294967294, %v101_v62  ;;  %v195_v12 = vadd.s32 1, %v6859_v44  ;;  %vm336_vm10 = vcmp.lt.s32.totalorder %v6816_v3, 2  ;;  %vm437_vm12 = vweird.f32 %v6552_v51 }
  0xc0   :  { %v439_v15 = vand.u32 3, %v438_v5  ;;  %v192_v8 = vmul.u32 %v6834_v47, %v176_v23  ;;  %v339_v60 = vsel %vm337_vm9, %v5920_v1, %v338_v2  ;;  %v342_v26 = vsel %vm340_vm0, %v341_v17, %v5922_v48 }
  0xc1   :  { %v89_v57 = vadd.s32 %v6772_v22, %v6783_v0  ;;  %vm5534_vm15 = vcmp.lt.s32.totalorder %v5533_v61, 0  ;;  %v1173_v21 = vsel %vm1166_vm2, %v1169_v29, %v1172_v4  ;;  %vm1269_vm1 = vcmp.lt.s32.totalorder %v1268_v7, 2 }
  0xc2   :  { %v104_v20 = vsel %vm5534_vm15, 0, %v5533_v61  ;;  %vm194_vm5 = vc.u32 %v6870_v11, %v6858_v32  ;;  %v343_v36 = vsel %vm336_vm10, %v339_v60, %v342_v26  ;;  %vm1270_vm4 = vcmp.eq.s32.totalorder %v1268_v7, 0 }
  0xc3   :  { %v105_v30 = vsub.s32 32, %v104_v20  ;;  %v106_v18 = vshll.u32 %v6844_v34, %v104_v20  ;;  %v109_v13 = vsub.s32 4294967266, %v104_v20  ;;  %v196_v47 = vsel %vm194_vm5, %v195_v12, %v6859_v44 }
  0xc4   :  { %vm1273_vm8 = vcmp.eq.s32.totalorder %v1268_v7, 2  ;;  %v197_v22 = vadd.s32 %v196_v47, %v192_v8  ;;  %vm444_vm13 = vcmp.eq.s32.totalorder %v439_v15, 2  ;;  %v1174_v16 = vsel %vm333_vm11, nan, %v1173_v21 }
  0xc5   :  { %v107_v25 = vshrl.u32 %v89_v57, %v105_v30  ;;  %v110_v50 = vadd.s32 127, %v109_v13  ;;  %vm440_vm14 = vcmp.lt.s32.totalorder %v439_v15, 2  ;;  %vm441_vm9 = vcmp.eq.s32.totalorder %v439_v15, 0 }
  0xc6   :  { %v198_v54 = vadd.s32 536870912, %v197_v22  ;;  %v344_v34 = vsel %vm333_vm11, nan, %v343_v36  ;;  %v1692_v9 = vsel %vm865_vm3, %v1174_v16, %v6788_v43  ;;  %vm35_vm11 = vcmp.lt.s32.totalorder %v6601_v40, 0 }
  0xc7   :  { %v108_v49 = vor.u32 %v107_v25, %v106_v18  ;;  %v111_v48 = vshll.u32 %v110_v50, 23  ;;  %v1700_v5 = vsel %vm32_vm7, %v344_v34, %v1692_v9  ;;  %vm6914_vm0 = vcmp.le.f32.partialorder %v33_v41, 0.7853982 }
  0xc8   :  { %v5924_v0 = vpop.eup %5923  ;;  %v199_v59 = vshrl.u32 %v198_v54, 30  ;;  %v193_v26 = vadd.s32 %v6858_v32, %v6870_v11  ;;  %v119_v47 = vsub.s32 4, %v6830_v19  ;;  %vm139_vm10 = vcmp.lt.s32.totalorder %v6709_v45, 0 }
  0xc9   :  { %v5926_v1 = vpop.eup %5925  ;;  %v445_v55 = vxor.u32 2147483648, %v5924_v0  ;;  %v112_v63 = vor.u32 4788187, %v111_v48  ;;  %v115_v24 = vcvt.s32.f32 %v108_v49 }
  0xca   :  { %v442_v3 = vxor.u32 2147483648, %v5926_v1  ;;  %v200_v17 = vshll.u32 %v199_v59, 30  ;;  %v120_v32 = vsel %vm35_vm11, %v119_v47, %v6830_v19  ;;  %v5897_v47 = vld [vmem:[%s10259_s0 + $0x20] sm:$0xff]  }
  0xcb   :  { %v446_v58 = vsel %vm444_vm13, %v445_v55, %v5926_v1  ;;  %v1275_v27 = vsel %vm1273_vm8, %v445_v55, %v5926_v1  ;;  %v113_v42 = vand.u32 2147483647, %v112_v63  ;;  %v122_v50 = vsel %vm6914_vm0, 0, %v120_v32  ;;  %v5902_v32 = vld [vmem:[%s10259_s0 + $0x48] sm:$0xff]  }
  0xcc   :  { %v443_v14 = vsel %vm441_vm9, %v5924_v0, %v442_v3  ;;  %v1272_v53 = vsel %vm1270_vm4, %v5924_v0, %v442_v3  ;;  %v201_v23 = vsub.s32 %v197_v22, %v200_v17  ;;  %v223_v1 = vsub.s32 4, %v199_v59 }
  0xcd   :  { %v447_v44 = vsel %vm440_vm14, %v443_v14, %v446_v58  ;;  %v1276_v2 = vsel %vm1269_vm1, %v1272_v53, %v1275_v27  ;;  %v116_v10 = vmul.f32 %v115_v24, %v113_v42  ;;  %v126_v54 = vadd.s32 3, %v122_v50 }
  0xce   :  { %v448_v56 = vsel %vm437_vm12, nan, %v447_v44  ;;  %v1277_v6 = vsel %vm437_vm12, nan, %v1276_v2  ;;  %v203_v4 = vsub.s32 0, %v201_v23  ;;  %vm138_vm12 = vcmp.le.f32.partialorder %v137_v52, 0.7853982 }
  0xcf   :  { %v1693_v62 = vsel %vm865_vm3, %v1277_v6, %v6552_v51  ;;  %v117_v61 = vxor.u32 2147483648, %v116_v10  ;;  %v224_v49 = vsel %vm139_vm10, %v223_v1, %v199_v59  ;;  %v959_v19 = vand.u32 3, %v122_v50 }
  0xd0   :  { %v1701_v7 = vsel %vm32_vm7, %v448_v56, %v1693_v62  ;;  %v5536_v12 = vmin.u32 %v203_v4, %v201_v23  ;;  %v127_v27 = vand.u32 3, %v126_v54  ;;  %v226_v9 = vsel %vm138_vm12, 0, %v224_v49 }
  0xd1   :  { %v1731_v29 = vpack.c.bf16 %v1701_v7, %v1700_v5  ;;  %v118_v8 = vsel %vm35_vm11, %v117_v61, %v116_v10  ;;  %vm961_vm15 = vcmp.eq.s32.totalorder %v959_v19, 0  ;;  %vm964_vm1 = vcmp.eq.s32.totalorder %v959_v19, 2 }
  0xd2   :  { %v205_v15 = vclz %v5536_v12  ;;  %v121_v57 = vsel %vm6914_vm0, %v6601_v40, %v118_v8  ;;  %v230_v63 = vadd.s32 3, %v226_v9  ;;  %vm129_vm5 = vcmp.eq.s32.totalorder %v127_v27, 0 }
  0xd3   :  { %5740 = vmatprep.subr.bf16.mxu0 %v1731_v29  ;;  %5798 = vmatprep.subr.bf16.mxu1 %v1731_v29  ;;  %5927 = vcosq.f32 %v121_v57  ;;  %vm132_vm4 = vcmp.eq.s32.totalorder %v127_v27, 2  ;;  %vm960_vm8 = vcmp.lt.s32.totalorder %v959_v19, 2  ;;  %vm125_vm13 = vweird.f32 %v6601_v40 }
  0xd4   :  { %5741 = vmatpush3.bf16.msra.mxu0 %v1731_v29  ;;  %5802 = vmatpush3.bf16.msra.mxu1 %v1731_v29  ;;  %v5537_v60 = vadd.s32 4294967294, %v205_v15  ;;  %5929 = vsinq.f32 %v121_v57  ;;  %v231_v59 = vand.u32 3, %v230_v63  ;;  %v1062_v44 = vand.u32 3, %v226_v9 }
  0xd5   :  { %vm128_vm14 = vcmp.lt.s32.totalorder %v127_v27, 2 }
  0xd6   :  { %vm5538_vm2 = vcmp.lt.s32.totalorder %v5537_v60, 0  ;;  %vm236_vm9 = vcmp.eq.s32.totalorder %v231_v59, 2  ;;  %vm1067_vm11 = vcmp.eq.s32.totalorder %v1062_v44, 2  ;;  %vm233_vm0 = vcmp.eq.s32.totalorder %v231_v59, 0 }
  0xd7   :  { %v208_v21 = vsel %vm5538_vm2, 0, %v5537_v60  ;;  %vm1064_vm2 = vcmp.eq.s32.totalorder %v1062_v44, 0 }
  0xd8   :  { %v209_v20 = vsub.s32 32, %v208_v21  ;;  %v210_v30 = vshll.u32 %v201_v23, %v208_v21  ;;  %v213_v18 = vsub.s32 4294967266, %v208_v21 }
  0xda   :  { %v211_v41 = vshrl.u32 %v193_v26, %v209_v20  ;;  %v214_v13 = vadd.s32 127, %v213_v18  ;;  %v5893_v18 = vld [vmem:[%s10259_s0 + $0x8] sm:$0xff]  }
  0xdc   :  { %v212_v36 = vor.u32 %v211_v41, %v210_v30  ;;  %v215_v22 = vshll.u32 %v214_v13, 23  ;;  %v5894_v41 = vld [vmem:[%s10259_s0 + $0x58] sm:$0xff]   ;;  %v5895_v13 = vld [vmem:[%s10259_s0 + $0x10] sm:$0xff]  }
  0xde   :  { %v216_v0 = vor.u32 4788187, %v215_v22  ;;  %v219_v16 = vcvt.s32.f32 %v212_v36  ;;  %v5898_v36 = vld [vmem:[%s10259_s0 + $0x28] sm:$0xff]   ;;  %v5899_v22 = vld [vmem:[%s10259_s0 + $0x30] sm:$0xff]  }
  0xe0   :  { %v217_v11 = vand.u32 2147483647, %v216_v0  ;;  %v5928_v3 = vpop.eup %5927  ;;  %v5900_v0 = vld [vmem:[%s10259_s0 + $0x38] sm:$0xff]  }
  0xe1   :  { %v5930_v58 = vpop.eup %5929  ;;  %v133_v53 = vxor.u32 2147483648, %v5928_v3 }
  0xe2   :  { %v220_v25 = vmul.f32 %v219_v16, %v217_v11  ;;  %v130_v14 = vxor.u32 2147483648, %v5930_v58  ;;  %v5901_v16 = vld [vmem:[%s10259_s0 + $0x40] sm:$0xff]   ;;  %v6068_v11 = vmov 14  }
  0xe3   :  { %v966_v24 = vsel %vm964_vm1, %v133_v53, %v5930_v58  ;;  %v134_v17 = vsel %vm132_vm4, %v133_v53, %v5930_v58  ;;  %5886 = vset.pattern.permute.xlu1 %v6068_v11  ;;  %5885 = vset.pattern.permute.xlu0 %v6068_v11  ;;  %vm3250_vm1 = vcmp.gt.f32.partialorder %v6788_v43, 0.5  ;;  %vm3252_vm4 = vcmp.gt.f32.partialorder %v6638_v38, 0.5 }
  0xe4   :  { %v221_v55 = vxor.u32 2147483648, %v220_v25  ;;  %v963_v52 = vsel %vm961_vm15, %v5928_v3, %v130_v14  ;;  %v131_v2 = vsel %vm129_vm5, %v5928_v3, %v130_v14  ;;  %vm1063_vm15 = vcmp.lt.s32.totalorder %v1062_v44, 2 }
  0xe5   :  { %v967_v56 = vsel %vm960_vm8, %v963_v52, %v966_v24  ;;  %v135_v5 = vsel %vm128_vm14, %v131_v2, %v134_v17 }
  0xe6   :  { %v222_v34 = vsel %vm139_vm10, %v221_v55, %v220_v25  ;;  %v968_v42 = vsel %vm125_vm13, nan, %v967_v56  ;;  %vm229_vm10 = vweird.f32 %v6709_v45  ;;  %v136_v10 = vsel %vm125_vm13, nan, %v135_v5 }
  0xe7   :  { %v225_v48 = vsel %vm138_vm12, %v6709_v45, %v222_v34  ;;  %vm232_vm12 = vcmp.lt.s32.totalorder %v231_v59, 2  ;;  %v1690_v61 = vsel %vm865_vm3, %v968_v42, %v6601_v40  ;;  %v6070_v5 = vmov 0  }
  0xe8   :  { %5931 = vcosq.f32 %v225_v48  ;;  %v1698_v57 = vsel %vm32_vm7, %v136_v10, %v1690_v61  ;;  %v6020_v61 = vld [vmem:[%s10260_s1 + $0x30] sm:$0xff] }
  0xe9   :  { %5933 = vsinq.f32 %v225_v48  ;;  %vm3254_vm13 = vcmp.gt.f32.partialorder %v6020_v61, 0.5 }
  0xf5   :  { %v5932_v6 = vpop.eup %5931 }
  0xf6   :  { %v5934_v62 = vpop.eup %5933  ;;  %v237_v23 = vxor.u32 2147483648, %v5932_v6 }
  0xf7   :  { %v234_v7 = vxor.u32 2147483648, %v5934_v62 }
  0xf8   :  { %v238_v29 = vsel %vm236_vm9, %v237_v23, %v5934_v62  ;;  %v1069_v4 = vsel %vm1067_vm11, %v237_v23, %v5934_v62  ;;  %v7090_v62 = vld [vmem:[%s10260_s1 + $0x18] sm:$0xff] }
  0xf9   :  { %v235_v12 = vsel %vm233_vm0, %v5932_v6, %v234_v7  ;;  %v1066_v15 = vsel %vm1064_vm2, %v5932_v6, %v234_v7  ;;  %v6018_v7 = vld [vmem:[%s10260_s1 + $0x28] sm:$0xff] }
  0xfa   :  { %v239_v51 = vsel %vm232_vm12, %v235_v12, %v238_v29  ;;  %v1070_v8 = vsel %vm1063_vm15, %v1066_v15, %v1069_v4  ;;  %vm3253_vm5 = vcmp.gt.f32.partialorder %v6018_v7, 0.5  ;;  %v6019_v29 = vld [vmem:[%s10260_s1 + $0x38] sm:$0xff]  ;;  %v3260_v4 = vsel %vm3252_vm4, 1, %v6070_v5 }
  0xfb   :  { %v240_v60 = vsel %vm229_vm10, nan, %v239_v51  ;;  %v1071_v26 = vsel %vm229_vm10, nan, %v1070_v8  ;;  %v3261_v10 = vsel %vm3253_vm5, 1, %v6070_v5  ;;  %vm3255_vm8 = vcmp.gt.f32.partialorder %v6019_v29, 0.5 }
  0xfc   :  { %v1691_v21 = vsel %vm865_vm3, %v1071_v26, %v6709_v45  ;;  %vm3248_vm3 = vcmp.gt.f32.partialorder %v6601_v40, 0.5  ;;  %v3263_v43 = vsel %vm3255_vm8, 1, %v6070_v5  ;;  %v3262_v12 = vsel %vm3254_vm13, 1, %v6070_v5 }
  0xfd   :  { %v1699_v20 = vsel %vm32_vm7, %v240_v60, %v1691_v21  ;;  %v3256_v42 = vsel %vm3248_vm3, 1, %v6070_v5  ;;  %vm3249_vm7 = vcmp.gt.f32.partialorder %v6709_v45, 0.5  ;;  %v3258_v45 = vsel %vm3250_vm1, 1, %v6070_v5 }
  0xfe   :  { %v1730_v30 = vpack.c.bf16 %v1699_v20, %v1698_v57  ;;  %v3257_v40 = vsel %vm3249_vm7, 1, %v6070_v5 }
 0x100   :  { %5742 = vmatprep.subr.bf16.mxu0 %v1730_v30  ;;  %5799 = vmatprep.subr.bf16.mxu1 %v1730_v30 }
 0x101   :  { %5743 = vmatpush3.bf16.msra.mxu0 %v1730_v30  ;;  %5803 = vmatpush3.bf16.msra.mxu1 %v1730_v30 }
 0x104   :  { %5745 = vmatmul.mubr.msk.bf16.vlgmr.msra.gmra.mxu0 %vm1794_vm6, %v5893_v18  ;;  %5765 = vmatmul.mubr.msk.bf16.vlgmr.msra.gmra.mxu1 %vm1794_vm6, %v5894_v41 }
 0x105   :  { %5748 = vmatprep.mubr.msk.bf16.mxu0 %vm1794_vm6, %v5895_v13 }
 0x10c   :  { %5749 = vmatmul.mubr.msk.bf16.gmra.mxu0 %vm1794_vm6, %v5896_v28 }
 0x10d   :  { %5752 = vmatprep.mubr.msk.bf16.mxu0 %vm1794_vm6, %v5897_v47 }
 0x114   :  { %5753 = vmatmul.mubr.msk.bf16.gmra.mxu0 %vm1794_vm6, %v5898_v36 }
 0x115   :  { %5756 = vmatprep.mubr.msk.bf16.mxu0 %vm1794_vm6, %v5899_v22 }
 0x11c   :  { %5757 = vmatmul.mubr.msk.bf16.gmra.mxu0 %vm1794_vm6, %v5900_v0 }
 0x11d   :  { %5760 = vmatprep.mubr.msk.bf16.mxu0 %vm1794_vm6, %v5901_v16 }
 0x124   :  { %5761 = vmatmul.mubr.msk.bf16.gmra.mxu0 %vm1794_vm6, %v5902_v32  ;;  %vm3251_vm6 = vcmp.gt.f32.partialorder %v7090_v62, 0.5 }
 0x125   :  { %v3259_v23 = vsel %vm3251_vm6, 1, %v6070_v5 }
 0x1c4   :  { %v6991_v25 = vpop.f32.mrf.mxu0  ;;  %v6993_v50 = vpop.f32.mrf.mxu1 }
 0x1c5   :  { %10508 = vst [vmem:[#allocation5_spill] sm:$0xff] %v6991_v25  ;;  %10509 = vst [vmem:[#allocation6_spill] sm:$0xff] %v6993_v50  ;;  %2036 = vrot.lane.b32.xlu0 %v6991_v25, %s6069_s12  ;;  %v7109_v38 = vand.u32 2147483647, %v6991_v25 }
 0x1c6   :  { %v6997_v1 = vpop.f32.mrf.mxu0  ;;  %v6999_v55 = vpop.f32.mrf.mxu1 }
 0x1c7   :  { %10510 = vst [vmem:[#allocation7_spill] sm:$0xff] %v6997_v1  ;;  %10511 = vst [vmem:[#allocation8_spill] sm:$0xff] %v6999_v55  ;;  %v7119_v26 = vand.u32 2147483647, %v6997_v1  ;;  %v7137_v13 = vand.u32 2147483647, %v6999_v55 }
 0x1c8   :  { %v7001_v54 = vpop.f32.mrf.mxu0  ;;  %v7005_v34 = vpop.f32.mrf.mxu1 }
 0x1c9   :  { %10512 = vst [vmem:[#allocation9_spill] sm:$0xff] %v7001_v54  ;;  %2032 = vrot.lane.b32.xlu0 %v6997_v1, %s6069_s12  ;;  %10513 = vst [vmem:[#allocation10_spill] sm:$0xff] %v7005_v34  ;;  %v7157_v11 = vand.u32 2147483647, %v7001_v54  ;;  %v7203_v46 = vand.u32 2147483647, %v7005_v34 }
 0x1ca   :  { %v7007_v3 = vpop.f32.mrf.mxu0  ;;  %v7015_v48 = vpop.f32.mrf.mxu1  ;;  %10532 = vst [vmem:[#allocation29_spill] sm:$0xff] %v7137_v13 }
 0x1cb   :  { %10514 = vst [vmem:[#allocation11_spill] sm:$0xff] %v7007_v3  ;;  %2034 = vrot.lane.b32.xlu1 %v7007_v3, %s6069_s12  ;;  %10516 = vst [vmem:[#allocation13_spill] sm:$0xff] %v7015_v48  ;;  %v7129_v30 = vand.u32 2147483647, %v7007_v3  ;;  %v7151_v16 = vand.u32 2147483647, %v7015_v48 }
 0x1cc   :  { %v7011_v49 = vpop.f32.mrf.mxu0  ;;  %10537 = vst [vmem:[#allocation34_spill] sm:$0xff] %v7157_v11  ;;  %10546 = vst [vmem:[#allocation43_spill] sm:$0xff] %v7203_v46 }
 0x1cd   :  { %10515 = vst [vmem:[#allocation12_spill] sm:$0xff] %v7011_v49  ;;  %2856 = vrot.lane.b32.xlu0 %v6999_v55, %s6069_s12  ;;  %10535 = vst [vmem:[#allocation32_spill] sm:$0xff] %v7151_v16  ;;  %v7209_v35 = vand.u32 2147483647, %v7011_v49 }
 0x1ce   :  { %v7017_v58 = vpop.f32.mrf.mxu0 }
 0x1cf   :  { %10517 = vst [vmem:[#allocation14_spill] sm:$0xff] %v7017_v58  ;;  %2858 = vrot.lane.b32.xlu1 %v7015_v48, %s6069_s12  ;;  %v7173_v29 = vand.u32 2147483647, %v7017_v58  ;;  %10547 = vst [vmem:[#allocation44_spill] sm:$0xff] %v7209_v35 }
 0x1d0   :  { %v7021_v19 = vpop.f32.mrf.mxu0 }
 0x1d1   :  { %10518 = vst [vmem:[#allocation15_spill] sm:$0xff] %v7021_v19  ;;  %2038 = vrot.lane.b32.xlu0 %v7001_v54, %s6069_s12  ;;  %10541 = vst [vmem:[#allocation38_spill] sm:$0xff] %v7173_v29 }
 0x1d2   :  { %v7025_v27 = vpop.f32.mrf.mxu0 }
 0x1d3   :  { %10519 = vst [vmem:[#allocation16_spill] sm:$0xff] %v7025_v27  ;;  %v7230_v25 = vand.u32 2147483647, %v7025_v27 }
 0x1d4   :  { %v7027_v9 = vpop.f32.mrf.mxu0 }
 0x1d5   :  { %10520 = vst [vmem:[#allocation17_spill] sm:$0xff] %v7027_v9  ;;  %2040 = vrot.lane.b32.xlu0 %v7017_v58, %s6069_s12  ;;  %2444 = vrot.lane.b32.xlu1 %v7027_v9, %s6069_s12  ;;  %v7181_v61 = vand.u32 2147483647, %v7027_v9  ;;  %10549 = vst [vmem:[#allocation46_spill] sm:$0xff] %v7230_v25 }
 0x1d6   :  { %v7033_v14 = vpop.f32.mrf.mxu0 }
 0x1d7   :  { %10521 = vst [vmem:[#allocation18_spill] sm:$0xff] %v7033_v14  ;;  %10543 = vst [vmem:[#allocation40_spill] sm:$0xff] %v7181_v61 }
 0x1d8   :  { %v7035_v53 = vpop.f32.mrf.mxu0 }
 0x1d9   :  { %10522 = vst [vmem:[#allocation19_spill] sm:$0xff] %v7035_v53  ;;  %2042 = vrot.lane.b32.xlu0 %v7025_v27, %s6069_s12  ;;  %2446 = vrot.lane.b32.xlu1 %v7035_v53, %s6069_s12 }
 0x1da   :  { %v7041_v63 = vpop.f32.mrf.mxu0 }
 0x1db   :  { %10523 = vst [vmem:[#allocation20_spill] sm:$0xff] %v7041_v63 }
 0x1dc   :  { %v7043_v52 = vpop.f32.mrf.mxu0 }
 0x1dd   :  { %10524 = vst [vmem:[#allocation21_spill] sm:$0xff] %v7043_v52  ;;  %2440 = vrot.lane.b32.xlu0 %v7033_v14, %s6069_s12  ;;  %2442 = vrot.lane.b32.xlu1 %v7041_v63, %s6069_s12 }
 0x1de   :  { %v7049_v24 = vpop.f32.mrf.mxu0 }
 0x1df   :  { %10525 = vst [vmem:[#allocation22_spill] sm:$0xff] %v7049_v24 }
 0x1e0   :  { %v7051_v59 = vpop.f32.mrf.mxu0 }
 0x1e1   :  { %10526 = vst [vmem:[#allocation23_spill] sm:$0xff] %v7051_v59  ;;  %2448 = vrot.lane.b32.xlu1 %v7049_v24, %s6069_s12 }
 0x1e2   :  { %v7055_v44 = vpop.f32.mrf.mxu0 }
 0x1e3   :  { %10527 = vst [vmem:[#allocation24_spill] sm:$0xff] %v7055_v44 }
 0x1e4   :  { %v7057_v2 = vpop.f32.mrf.mxu0 }
 0x1e5   :  { %10528 = vst [vmem:[#allocation25_spill] sm:$0xff] %v7057_v2  ;;  %2450 = vrot.lane.b32.xlu1 %v7055_v44, %s6069_s12  ;;  %2852 = vrot.lane.b32.xlu0 %v7057_v2, %s6069_s12 }
 0x1e6   :  { %v7063_v17 = vpop.f32.mrf.mxu0 }
 0x1e7   :  { %10529 = vst [vmem:[#allocation26_spill] sm:$0xff] %v7063_v17 }
 0x1e8   :  { %v7065_v56 = vpop.f32.mrf.mxu0 }
 0x1e9   :  { %10530 = vst [vmem:[#allocation27_spill] sm:$0xff] %v7065_v56  ;;  %2848 = vrot.lane.b32.xlu0 %v7063_v17, %s6069_s12  ;;  %2854 = vrot.lane.b32.xlu1 %v7065_v56, %s6069_s12 }
 0x1ea   :  { %v7071_v6 = vpop.f32.mrf.mxu0 }
 0x1eb   :  { %10531 = vst [vmem:[#allocation28_spill] sm:$0xff] %v7071_v6 }
 0x1ed   :  { %2044 = vrot.lane.b32.xlu0 %v7011_v49, %s6069_s12  ;;  %2850 = vrot.lane.b32.xlu1 %v7071_v6, %s6069_s12 }
 0x1f1   :  { %2046 = vrot.lane.b32.xlu0 %v7021_v19, %s6069_s12  ;;  %2452 = vrot.lane.b32.xlu1 %v7043_v52, %s6069_s12 }
 0x1f5   :  { %2860 = vrot.lane.b32.xlu0 %v6993_v50, %s6069_s12  ;;  %2454 = vrot.lane.b32.xlu1 %v7051_v59, %s6069_s12 }
 0x1f9   :  { %2862 = vrot.lane.b32.xlu1 %v7005_v34, %s6069_s12  ;;  %3265 = vperm.xlu0 %5885, %v3256_v42  }
 0x1fd   :  { %3268 = vperm.xlu1 %5886, %v3257_v40   ;;  %3274 = vperm.xlu0 %5885, %v3259_v23  }
 0x201   :  { %3271 = vperm.xlu1 %5886, %v3258_v45   ;;  %3280 = vperm.xlu0 %5885, %v3261_v10  }
 0x205   :  { %3277 = vperm.xlu1 %5886, %v3260_v4   ;;  %3286 = vperm.xlu0 %5885, %v3263_v43  }
 0x209   :  { %3283 = vperm.xlu1 %5886, %v3262_v12  }
 0x237   :  { %v7106_v15 = vpop.permute.xlu0 %2036 }
 0x238   :  { %v7112_v51 = vand.u32 2147483647, %v7106_v15  ;;  %vm2180_vm14 = vcmp.lt.s32.totalorder %v7106_v15, 0  ;;  %vm2177_vm9 = vcmp.lt.f32.partialorder %v7106_v15, 0.0 }
 0x23a   :  { %v2153_v8 = vmax.f32 %v7112_v51, %v7109_v38  ;;  %v2152_v7 = vmin.f32 %v7112_v51, %v7109_v38  ;;  %vm2174_vm10 = vcmp.gt.f32.partialorder %v7109_v38, %v7112_v51 }
 0x23b   :  { %v7116_v60 = vpop.permute.xlu0 %2032 }
 0x23c   :  { %5935 = vrcp.f32 %v2153_v8  ;;  %v7122_v57 = vand.u32 2147483647, %v7116_v60  ;;  %vm2083_vm11 = vcmp.lt.f32.partialorder %v7116_v60, 0.0  ;;  %vm2086_vm0 = vcmp.lt.s32.totalorder %v7116_v60, 0 }
 0x23d   :  { %v7124_v21 = vpop.permute.xlu1 %2034 }
 0x23e   :  { %v2059_v20 = vmax.f32 %v7122_v57, %v7119_v26  ;;  %v7132_v18 = vand.u32 2147483647, %v7124_v21  ;;  %vm2133_vm2 = vcmp.lt.s32.totalorder %v7124_v21, 0  ;;  %vm2080_vm12 = vcmp.gt.f32.partialorder %v7119_v26, %v7122_v57 }
 0x23f   :  { %v7134_v41 = vpop.permute.xlu0 %2856  ;;  %vm2130_vm15 = vcmp.lt.f32.partialorder %v7124_v21, 0.0 }
 0x240   :  { %5937 = vrcp.f32 %v2059_v20  ;;  %v7140_v28 = vand.u32 2147483647, %v7134_v41  ;;  %v2106_v47 = vmax.f32 %v7132_v18, %v7129_v30  ;;  %v2058_v20 = vmin.f32 %v7122_v57, %v7119_v26 }
 0x241   :  { %v7144_v36 = vpop.permute.xlu1 %2858  ;;  %v2105_v39 = vmin.f32 %v7132_v18, %v7129_v30  ;;  %vm10380_vm3 = vcmp.lt.f32.partialorder %v7134_v41, 0.0  ;;  %vm3090_vm7 = vcmp.lt.s32.totalorder %v7134_v41, 0  ;;  %vm2127_vm1 = vcmp.gt.f32.partialorder %v7129_v30, %v7132_v18 }
 0x242   :  { %10533 = vst [vmem:[#allocation30_spill] sm:$0xff] %v7140_v28  ;;  %v3063_v22 = vmax.f32 %v7140_v28, %v7137_v13  ;;  %5939 = vrcp.f32 %v2106_v47  ;;  %v7154_v32 = vand.u32 2147483647, %v7144_v36  ;;  %vm10375_vm6 = vcmp.lt.f32.partialorder %v7144_v36, 0.0 }
 0x243   :  { %v7148_v0 = vpop.permute.xlu0 %2038  ;;  %vm3137_vm5 = vcmp.lt.s32.totalorder %v7144_v36, 0 }
 0x244   :  { %10534 = vst [vmem:[#allocation31_spill] sm:$0xff] %v7148_v0  ;;  %5941 = vrcp.f32 %v3063_v22  ;;  %10536 = vst [vmem:[#allocation33_spill] sm:$0xff] %v7154_v32  ;;  %v7160_v5 = vand.u32 2147483647, %v7148_v0  ;;  %v3110_v42 = vmax.f32 %v7154_v32, %v7151_v16 }
 0x246   :  { %10538 = vst [vmem:[#allocation35_spill] sm:$0xff] %v7160_v5  ;;  %v2200_v40 = vmax.f32 %v7160_v5, %v7157_v11  ;;  %5943 = vrcp.f32 %v3110_v42  ;;  %v2199_v54 = vmin.f32 %v7160_v5, %v7157_v11 }
 0x247   :  { %v7166_v23 = vpop.permute.xlu0 %2040  ;;  %v7170_v45 = vpop.permute.xlu1 %2444 }
 0x248   :  { %10539 = vst [vmem:[#allocation36_spill] sm:$0xff] %v7166_v23  ;;  %10540 = vst [vmem:[#allocation37_spill] sm:$0xff] %v7170_v45  ;;  %5945 = vrcp.f32 %v2200_v40  ;;  %v7178_v43 = vand.u32 2147483647, %v7166_v23  ;;  %v7184_v12 = vand.u32 2147483647, %v7170_v45 }
 0x249   :  { %v5936_v10 = vpop.eup %5935  ;;  %v7197_v40 = vand.u32 2147483647, %v6993_v50  ;;  %v7249_v23 = vand.u32 2147483647, %v7041_v63  ;;  %v7354_v63 = vand.u32 2147483647, %v7071_v6 }
 0x24a   :  { %v7175_v4 = vmul.f32 %v5936_v10, %v2152_v7  ;;  %10542 = vst [vmem:[#allocation39_spill] sm:$0xff] %v7178_v43  ;;  %10544 = vst [vmem:[#allocation41_spill] sm:$0xff] %v7184_v12  ;;  %v2247_v47 = vmax.f32 %v7178_v43, %v7173_v29  ;;  %v2561_v42 = vmax.f32 %v7184_v12, %v7181_v61  ;;  %v10350_v6 = vmov 0.7853982  }
 0x24b   :  { %10545 = vst [vmem:[#allocation42_spill] sm:$0xff] %v7197_v40  ;;  %10552 = vst [vmem:[#allocation49_spill] sm:$0xff] %v7249_v23 }
 0x24c   :  { %v7188_v8 = vmul.f32 %v7175_v4, %v7175_v4  ;;  %5947 = vrcp.f32 %v2247_v47  ;;  %10566 = vst [vmem:[#allocation63_spill] sm:$0xff] %v7354_v63 }
 0x24d   :  { %v5938_v22 = vpop.eup %5937  ;;  %5949 = vrcp.f32 %v2561_v42  ;;  %v10581_v27 = vld [vmem:[#allocation35_spill] sm:$0xff] }
 0x24e   :  { %v2157_v7 = vmul.f32 0.002785687, %v7188_v8  ;;  %v7200_v10 = vmul.f32 %v5938_v22, %v2058_v20  ;;  %v3062_v20 = vmin.f32 %v7140_v28, %v7137_v13  ;;  %v7218_v22 = vand.u32 2147483647, %v7021_v19 }
 0x24f   :  { %v5940_v31 = vpop.eup %5939  ;;  %v7233_v19 = vand.u32 2147483647, %v7033_v14 }
 0x250   :  { %v2158_v33 = vadd.f32 -0.015866, %v2157_v7  ;;  %v7213_v40 = vmul.f32 %v7200_v10, %v7200_v10  ;;  %10548 = vst [vmem:[#allocation45_spill] sm:$0xff] %v7218_v22  ;;  %v7220_v46 = vmul.f32 %v5940_v31, %v2105_v39  ;;  %v7236_v31 = vand.u32 2147483647, %v7035_v53 }
 0x251   :  { %v5942_v47 = vpop.eup %5941  ;;  %10550 = vst [vmem:[#allocation47_spill] sm:$0xff] %v7233_v19 }
 0x252   :  { %v2159_v35 = vmul.f32 %v2158_v33, %v7188_v8  ;;  %v2063_v7 = vmul.f32 0.002785687, %v7213_v40  ;;  %v7226_v45 = vmul.f32 %v5942_v47, %v3062_v20  ;;  %10551 = vst [vmem:[#allocation48_spill] sm:$0xff] %v7236_v31  ;;  %v7240_v39 = vmul.f32 %v7220_v46, %v7220_v46 }
 0x253   :  { %v3109_v47 = vmin.f32 %v7154_v32, %v7151_v16  ;;  %v5944_v42 = vpop.eup %5943  ;;  %v7261_v16 = vand.u32 2147483647, %v7043_v52 }
 0x254   :  { %v2160_v33 = vadd.f32 0.04247222, %v2159_v35  ;;  %v2064_v37 = vadd.f32 -0.015866, %v2063_v7  ;;  %v7244_v20 = vmul.f32 %v7226_v45, %v7226_v45  ;;  %v2110_v22 = vmul.f32 0.002785687, %v7240_v39 }
 0x255   :  { %v5946_v35 = vpop.eup %5945  ;;  %v7258_v13 = vmul.f32 %v5944_v42, %v3109_v47  ;;  %10554 = vst [vmem:[#allocation51_spill] sm:$0xff] %v7261_v16 }
 0x256   :  { %v2161_v7 = vmul.f32 %v2160_v33, %v7188_v8  ;;  %v2065_v19 = vmul.f32 %v2064_v37, %v7213_v40  ;;  %v3067_v1 = vmul.f32 0.002785687, %v7244_v20  ;;  %v2111_v23 = vadd.f32 -0.015866, %v2110_v22 }
 0x257   :  { %10553 = vst [vmem:[#allocation50_spill] sm:$0xff] %v7258_v13  ;;  %v7263_v32 = vmul.f32 %v5946_v35, %v2199_v54  ;;  %v7268_v33 = vmul.f32 %v7258_v13, %v7258_v13  ;;  %v7271_v37 = vand.u32 2147483647, %v7049_v24  ;;  %v2246_v54 = vmin.f32 %v7178_v43, %v7173_v29 }
 0x258   :  { %v2162_v11 = vadd.f32 -0.074975304, %v2161_v7  ;;  %v2066_v5 = vadd.f32 0.04247222, %v2065_v19  ;;  %v3068_v3 = vadd.f32 -0.015866, %v3067_v1  ;;  %v2112_v42 = vmul.f32 %v2111_v23, %v7240_v39 }
 0x259   :  { %10555 = vst [vmem:[#allocation52_spill] sm:$0xff] %v7271_v37  ;;  %v7276_v47 = vmul.f32 %v7263_v32, %v7263_v32  ;;  %v3114_v35 = vmul.f32 0.002785687, %v7268_v33  ;;  %v5948_v7 = vpop.eup %5947  ;;  %v2560_v23 = vmin.f32 %v7184_v12, %v7181_v61 }
 0x25a   :  { %v2163_v22 = vmul.f32 %v2162_v11, %v7188_v8  ;;  %v2067_v1 = vmul.f32 %v2066_v5, %v7213_v40  ;;  %v3069_v19 = vmul.f32 %v3068_v3, %v7244_v20  ;;  %v2113_v28 = vadd.f32 0.04247222, %v2112_v42  ;;  %v5950_v14 = vpop.eup %5949 }
 0x25b   :  { %v2204_v52 = vmul.f32 0.002785687, %v7276_v47  ;;  %v7288_v11 = vmul.f32 %v5948_v7, %v2246_v54  ;;  %v3115_v3 = vadd.f32 -0.015866, %v3114_v35  ;;  %v7291_v13 = vmul.f32 %v5950_v14, %v2560_v23  ;;  %v7311_v7 = vpop.permute.xlu0 %2042 }
 0x25c   :  { %v2164_v9 = vadd.f32 0.1064488, %v2163_v22  ;;  %v2068_v37 = vadd.f32 -0.074975304, %v2067_v1  ;;  %v3070_v29 = vadd.f32 0.04247222, %v3069_v19  ;;  %v2114_v5 = vmul.f32 %v2113_v28, %v7240_v39 }
 0x25d   :  { %v2205_v43 = vadd.f32 -0.015866, %v2204_v52  ;;  %10556 = vst [vmem:[#allocation53_spill] sm:$0xff] %v7291_v13  ;;  %v7298_v16 = vmul.f32 %v7288_v11, %v7288_v11  ;;  %v3116_v54 = vmul.f32 %v3115_v3, %v7268_v33  ;;  %v7304_v52 = vmul.f32 %v7291_v13, %v7291_v13  ;;  %10558 = vst [vmem:[#allocation55_spill] sm:$0xff] %v7311_v7 }
 0x25e   :  { %v2165_v42 = vmul.f32 %v2164_v9, %v7188_v8  ;;  %v2069_v0 = vmul.f32 %v2068_v37, %v7213_v40  ;;  %v3071_v61 = vmul.f32 %v3070_v29, %v7244_v20  ;;  %v2115_v22 = vadd.f32 -0.074975304, %v2114_v5 }
 0x25f   :  { %v2206_v1 = vmul.f32 %v2205_v43, %v7276_v47  ;;  %v7307_v14 = vand.u32 2147483647, %v7051_v59  ;;  %v3117_v37 = vadd.f32 0.04247222, %v3116_v54  ;;  %v2251_v35 = vmul.f32 0.002785687, %v7298_v16 }
 0x260   :  { %v2070_v9 = vadd.f32 0.1064488, %v2069_v0  ;;  %v3072_v28 = vadd.f32 -0.074975304, %v3071_v61  ;;  %v2116_v29 = vmul.f32 %v2115_v22, %v7240_v39  ;;  %v2166_v23 = vadd.f32 -0.14207031, %v2165_v42 }
 0x261   :  { %10557 = vst [vmem:[#allocation54_spill] sm:$0xff] %v7307_v14  ;;  %v2207_v19 = vadd.f32 0.04247222, %v2206_v1  ;;  %v2565_v3 = vmul.f32 0.002785687, %v7304_v52  ;;  %v3118_v59 = vmul.f32 %v3117_v37, %v7268_v33 }
 0x262   :  { %v2071_v43 = vmul.f32 %v2070_v9, %v7213_v40  ;;  %v3073_v5 = vmul.f32 %v3072_v28, %v7244_v20  ;;  %v2117_v53 = vadd.f32 0.1064488, %v2116_v29  ;;  %v2252_v61 = vadd.f32 -0.015866, %v2251_v35 }
 0x263   :  { %v2208_v0 = vmul.f32 %v2207_v19, %v7276_v47  ;;  %v7319_v1 = vand.u32 2147483647, %v7311_v7  ;;  %v3119_v42 = vadd.f32 -0.074975304, %v3118_v59  ;;  %v2167_v28 = vmul.f32 %v2166_v23, %v7188_v8  ;;  %v7326_v19 = vpop.permute.xlu1 %2446 }
 0x264   :  { %v2072_v22 = vadd.f32 -0.14207031, %v2071_v43  ;;  %v3074_v54 = vadd.f32 0.1064488, %v3073_v5  ;;  %v2118_v14 = vmul.f32 %v2117_v53, %v7240_v39  ;;  %v2253_v9 = vmul.f32 %v2252_v61, %v7298_v16  ;;  %10560 = vst [vmem:[#allocation57_spill] sm:$0xff] %v7326_v19 }
 0x265   :  { %10559 = vst [vmem:[#allocation56_spill] sm:$0xff] %v7319_v1  ;;  %v2209_v12 = vadd.f32 -0.074975304, %v2208_v0  ;;  %v2566_v13 = vadd.f32 -0.015866, %v2565_v3  ;;  %v3120_v43 = vmul.f32 %v3119_v42, %v7268_v33 }
 0x266   :  { %v2073_v29 = vmul.f32 %v2072_v22, %v7213_v40  ;;  %v3075_v37 = vmul.f32 %v3074_v54, %v7244_v20  ;;  %v2119_v35 = vadd.f32 -0.14207031, %v2118_v14  ;;  %v2254_v7 = vadd.f32 0.04247222, %v2253_v9 }
 0x267   :  { %v2210_v5 = vmul.f32 %v2209_v12, %v7276_v47  ;;  %v7331_v53 = vand.u32 2147483647, %v7055_v44  ;;  %v7334_v59 = vand.u32 2147483647, %v7057_v2  ;;  %v2294_v14 = vmax.f32 %v7319_v1, %v7230_v25 }
 0x268   :  { %v2255_v3 = vmul.f32 %v2254_v7, %v7298_v16  ;;  %v7342_v22 = vand.u32 2147483647, %v7326_v19  ;;  %v2168_v12 = vadd.f32 0.19993454, %v2167_v28  ;;  %v2074_v54 = vadd.f32 0.19993454, %v2073_v29 }
 0x269   :  { %10561 = vst [vmem:[#allocation58_spill] sm:$0xff] %v7331_v53  ;;  %10562 = vst [vmem:[#allocation59_spill] sm:$0xff] %v7334_v59  ;;  %v2211_v61 = vadd.f32 0.1064488, %v2210_v5  ;;  %v3076_v42 = vadd.f32 -0.14207031, %v3075_v37  ;;  %v2567_v9 = vmul.f32 %v2566_v13, %v7304_v52  ;;  %v2120_v59 = vmul.f32 %v2119_v35, %v7240_v39 }
 0x26a   :  { %10563 = vst [vmem:[#allocation60_spill] sm:$0xff] %v7342_v22  ;;  %v3121_v53 = vadd.f32 0.1064488, %v3120_v43  ;;  %v2256_v0 = vadd.f32 -0.074975304, %v2255_v3  ;;  %5951 = vrcp.f32 %v2294_v14  ;;  %v2169_v37 = vmul.f32 %v2168_v12, %v7188_v8  ;;  %v6022_v12 = vld [vmem:[%s10260_s1 + $0x10] sm:$0xff] }
 0x26b   :  { %v2212_v23 = vmul.f32 %v2211_v61, %v7276_v47  ;;  %v7348_v5 = vand.u32 2147483647, %v7063_v17  ;;  %v7351_v7 = vand.u32 2147483647, %v7065_v56  ;;  %v2075_v35 = vmul.f32 %v2074_v54, %v7213_v40  ;;  %v10579_v17 = vld [vmem:[#allocation30_spill] sm:$0xff] }
 0x26c   :  { %v2257_v13 = vmul.f32 %v2256_v0, %v7298_v16  ;;  %v3077_v43 = vmul.f32 %v3076_v42, %v7244_v20  ;;  %v2608_v61 = vmax.f32 %v7342_v22, %v7236_v31  ;;  %v2121_v3 = vadd.f32 0.19993454, %v2120_v59 }
 0x26d   :  { %10564 = vst [vmem:[#allocation61_spill] sm:$0xff] %v7348_v5  ;;  %10565 = vst [vmem:[#allocation62_spill] sm:$0xff] %v7351_v7  ;;  %v2213_v29 = vadd.f32 -0.14207031, %v2212_v23  ;;  %v3122_v7 = vmul.f32 %v3121_v53, %v7268_v33  ;;  %v2568_v63 = vadd.f32 0.04247222, %v2567_v9 }
 0x26e   :  { %v2258_v5 = vadd.f32 0.1064488, %v2257_v13  ;;  %v6021_v23 = vld [vmem:[%s10260_s1] sm:$0xff]  ;;  %v7373_v54 = vmul.f32 0.7, %v6022_v12  ;;  %v6023_v9 = vld [vmem:[%s10260_s1 + $0x8] sm:$0xff]  ;;  %5953 = vrcp.f32 %v2608_v61  ;;  %v2122_v59 = vmul.f32 %v2121_v3, %v7240_v39 }
 0x26f   :  { %v7367_v0 = vmul.f32 0.7, %v6021_v23  ;;  %v2214_v53 = vmul.f32 %v2213_v29, %v7276_v47  ;;  %v7381_v13 = vmul.f32 0.7, %v6023_v9  ;;  %v7384_v23 = vmul.f32 0.7, %v7090_v62 }
 0x270   :  { %10568 = vst [vmem:[#allocation65_spill] sm:$0xff] %v7373_v54  ;;  %v2259_v42 = vmul.f32 %v2258_v5, %v7298_v16  ;;  %v2170_v28 = vadd.f32 -0.33333147, %v2169_v37  ;;  %v2076_v14 = vadd.f32 -0.33333147, %v2075_v35  ;;  %v2569_v5 = vmul.f32 %v2568_v63, %v7304_v52 }
 0x271   :  { %10567 = vst [vmem:[#allocation64_spill] sm:$0xff] %v7367_v0  ;;  %10569 = vst [vmem:[#allocation66_spill] sm:$0xff] %v7381_v13  ;;  %v3078_v54 = vadd.f32 0.19993454, %v3077_v43  ;;  %v3123_v29 = vadd.f32 -0.14207031, %v3122_v7 }
 0x272   :  { %10570 = vst [vmem:[#allocation67_spill] sm:$0xff] %v7384_v23  ;;  %v2260_v0 = vadd.f32 -0.14207031, %v2259_v42  ;;  %v2215_v62 = vadd.f32 0.19993454, %v2214_v53  ;;  %v2171_v61 = vmul.f32 %v2170_v28, %v7188_v8  ;;  %v2077_v63 = vmul.f32 %v2076_v14, %v7213_v40 }
 0x273   :  { %v2123_v43 = vadd.f32 -0.33333147, %v2122_v59  ;;  %v3079_v3 = vmul.f32 %v3078_v54, %v7244_v20  ;;  %v3124_v42 = vmul.f32 %v3123_v29, %v7268_v33  ;;  %v2570_v13 = vadd.f32 -0.074975304, %v2569_v5 }
 0x274   :  { %v10357_v9 = vmov 0.0   ;;  %v2261_v35 = vmul.f32 %v2260_v0, %v7298_v16  ;;  %v7410_v40 = vsel %vm2177_vm9, 2.3561945, %v10350_v6  ;;  %v2216_v14 = vmul.f32 %v2215_v62, %v7276_v47 }
 0x275   :  { %v7402_v53 = vsel %vm2180_vm14, 3.1415927, %v10357_v9  ;;  %v2172_v59 = vmul.f32 %v2171_v61, %v7175_v4  ;;  %v2078_v0 = vmul.f32 %v2077_v63, %v7200_v10  ;;  %v2293_v29 = vmin.f32 %v7319_v1, %v7230_v25 }
 0x276   :  { %v2124_v5 = vmul.f32 %v2123_v43, %v7240_v39  ;;  %v3080_v28 = vadd.f32 -0.33333147, %v3079_v3  ;;  %v3125_v8 = vadd.f32 0.19993454, %v3124_v42  ;;  %v2571_v12 = vmul.f32 %v2570_v13, %v7304_v52 }
 0x277   :  { %v5952_v54 = vpop.eup %5951  ;;  %v7423_v7 = vsel %vm2086_vm0, 3.1415927, %v10357_v9  ;;  %v7428_v62 = vsel %vm2083_vm11, 2.3561945, %v10350_v6  ;;  %v2262_v61 = vadd.f32 0.19993454, %v2261_v35  ;;  %v2173_v13 = vadd.f32 %v2172_v59, %v7175_v4 }
 0x278   :  { %v2217_v39 = vadd.f32 -0.33333147, %v2216_v14  ;;  %v7435_v63 = vmul.f32 %v5952_v54, %v2293_v29  ;;  %v2079_v43 = vadd.f32 %v2078_v0, %v7200_v10  ;;  %v7442_v3 = vsel %vm2133_vm2, 3.1415927, %v10357_v9 }
 0x279   :  { %v2125_v42 = vmul.f32 %v2124_v5, %v7220_v46  ;;  %v3081_v37 = vmul.f32 %v3080_v28, %v7244_v20  ;;  %v3126_v14 = vmul.f32 %v3125_v8, %v7268_v33  ;;  %v2572_v54 = vadd.f32 0.1064488, %v2571_v12 }
 0x27a   :  { %10571 = vst [vmem:[#allocation68_spill] sm:$0xff] %v7435_v63  ;;  %v7451_v4 = vsel %vm2130_vm15, 2.3561945, %v10350_v6  ;;  %v2263_v10 = vmul.f32 %v2262_v61, %v7298_v16  ;;  %v2607_v59 = vmin.f32 %v7342_v22, %v7236_v31  ;;  %v7460_v0 = vsel %vm10380_vm3, 2.3561945, %v10350_v6  ;;  %v10582_v31 = vld [vmem:[#allocation34_spill] sm:$0xff] }
 0x27b   :  { %v5954_v35 = vpop.eup %5953  ;;  %10572 = vst [vmem:[#allocation69_spill] sm:$0xff] %v7460_v0  ;;  %v2218_v20 = vmul.f32 %v2217_v39, %v7276_v47  ;;  %v7466_v12 = vmul.f32 %v7435_v63, %v7435_v63  ;;  %v2175_v8 = vsub.f32 1.5707964, %v2173_v13  ;;  %v2081_v28 = vsub.f32 1.5707964, %v2079_v43 }
 0x27c   :  { %v7471_v29 = vmul.f32 %v5954_v35, %v2607_v59  ;;  %v2126_v5 = vadd.f32 %v2125_v42, %v7220_v46  ;;  %v3082_v61 = vmul.f32 %v3081_v37, %v7226_v45  ;;  %v3127_v6 = vadd.f32 -0.33333147, %v3126_v14  ;;  %v10577_v14 = vld [vmem:[#allocation31_spill] sm:$0xff] }
 0x27d   :  { %v2573_v47 = vmul.f32 %v2572_v54, %v7304_v52  ;;  %v7479_v39 = vsel %vm3090_vm7, 3.1415927, %v10357_v9  ;;  %v2264_v23 = vadd.f32 -0.33333147, %v2263_v10  ;;  %v2298_v34 = vmul.f32 0.002785687, %v7466_v12  ;;  %v7496_v54 = vpop.permute.xlu0 %2440 }
 0x27e   :  { %10573 = vst [vmem:[#allocation70_spill] sm:$0xff] %v7471_v29  ;;  %v7484_v50 = vmul.f32 %v7471_v29, %v7471_v29  ;;  %v7487_v35 = vsel %vm3137_vm5, 3.1415927, %v10357_v9  ;;  %v10575_v46 = vmov 0.7853982   ;;  %v2219_v42 = vmul.f32 %v2218_v20, %v7263_v32  ;;  %10578 = vst [vmem:[#allocation31_spill] sm:$0xff] %v7496_v54 }
 0x27f   :  { %10574 = vst [vmem:[#allocation71_spill] sm:$0xff] %v7487_v35  ;;  %v7492_v37 = vsel %vm10375_vm6, 2.3561945, %v10575_v46  ;;  %vm10391_vm4 = vcmp.lt.f32.partialorder %v10577_v14, 0.0  ;;  %v2176_v10 = vsel %vm2174_vm10, %v2175_v8, %v2173_v13  ;;  %v2082_v59 = vsel %vm2080_vm12, %v2081_v28, %v2079_v43  ;;  %v10580_v20 = vld [vmem:[#allocation29_spill] sm:$0xff]  ;;  %v10588_v29 = vld [vmem:[#allocation47_spill] sm:$0xff] }
 0x280   :  { %10576 = vst [vmem:[#allocation72_spill] sm:$0xff] %v7492_v37  ;;  %v2299_v9 = vadd.f32 -0.015866, %v2298_v34  ;;  %v2612_v49 = vmul.f32 0.002785687, %v7484_v50  ;;  %v3083_v2 = vadd.f32 %v3082_v61, %v7226_v45  ;;  %vm3084_vm8 = vcmp.gt.f32.partialorder %v10580_v20, %v10579_v17  ;;  %v10583_v28 = vld [vmem:[#allocation5_spill] sm:$0xff]  ;;  %v7527_v61 = vpop.permute.xlu1 %2442 }
 0x281   :  { %v2128_v56 = vsub.f32 1.5707964, %v2126_v5  ;;  %v3128_v44 = vmul.f32 %v3127_v6, %v7268_v33  ;;  %v2574_v24 = vadd.f32 -0.14207031, %v2573_v47  ;;  %vm2221_vm13 = vcmp.gt.f32.partialorder %v10582_v31, %v10581_v27  ;;  %v10584_v45 = vld [vmem:[#allocation7_spill] sm:$0xff]  ;;  %v10585_v33 = vld [vmem:[#allocation36_spill] sm:$0xff] }
 0x282   :  { %v2265_v13 = vmul.f32 %v2264_v23, %v7298_v16  ;;  %v2300_v8 = vmul.f32 %v2299_v9, %v7466_v12  ;;  %v2613_v43 = vadd.f32 -0.015866, %v2612_v49  ;;  %v7514_v34 = vand.u32 2147483647, %v7496_v54  ;;  %10586 = vst [vmem:[#allocation30_spill] sm:$0xff] %v7527_v61  ;;  %v10587_v47 = vld [vmem:[#allocation50_spill] sm:$0xff] }
 0x283   :  { %vm2182_vm14 = vcmp.eq.f32.partialorder %v10583_v28, 0.0  ;;  %vm2088_vm2 = vcmp.eq.f32.partialorder %v10584_v45, 0.0  ;;  %v2220_v6 = vadd.f32 %v2219_v42, %v7263_v32  ;;  %vm2227_vm10 = vcmp.lt.s32.totalorder %v10577_v14, 0 }
 0x284   :  { %vm10392_vm12 = vcmp.lt.f32.partialorder %v10585_v33, 0.0  ;;  %vm2274_vm7 = vcmp.lt.s32.totalorder %v10585_v33, 0  ;;  %v2178_v16 = vsub.f32 3.1415927, %v2176_v10  ;;  %v2084_v49 = vsub.f32 3.1415927, %v2082_v59 }
 0x285   :  { %v2301_v23 = vadd.f32 0.04247222, %v2300_v8  ;;  %v2614_v9 = vmul.f32 %v2613_v43, %v7484_v50  ;;  %vm2185_vm6 = vcmp.ne.f32.partialorder %v10583_v28, %v10583_v28  ;;  %v2129_v32 = vsel %vm2127_vm1, %v2128_v56, %v2126_v5  ;;  %v10589_v8 = vld [vmem:[#allocation11_spill] sm:$0xff] }
 0x286   :  { %v3129_v42 = vmul.f32 %v3128_v44, %v10587_v47  ;;  %v2575_v22 = vmul.f32 %v2574_v24, %v7304_v52  ;;  %v2467_v37 = vmax.f32 %v7514_v34, %v10588_v29  ;;  %vm2091_vm3 = vcmp.ne.f32.partialorder %v10584_v45, %v10584_v45 }
 0x287   :  { %vm2135_vm5 = vcmp.eq.f32.partialorder %v10589_v8, 0.0  ;;  %v3085_v43 = vsub.f32 1.5707964, %v3083_v2  ;;  %v10590_v25 = vmov 0.0   ;;  %v2266_v44 = vmul.f32 %v2265_v13, %v7288_v11  ;;  %v10593_v13 = vld [vmem:[#allocation33_spill] sm:$0xff] }
 0x288   :  { %v7546_v56 = vsel %vm2227_vm10, 3.1415927, %v10590_v25  ;;  %v2302_v24 = vmul.f32 %v2301_v23, %v7466_v12  ;;  %v2222_v5 = vsub.f32 1.5707964, %v2220_v6  ;;  %v7554_v1 = vsel %vm10391_vm4, 2.3561945, %v10575_v46 }
 0x289   :  { %10591 = vst [vmem:[#allocation29_spill] sm:$0xff] %v7546_v56  ;;  %10592 = vst [vmem:[#allocation35_spill] sm:$0xff] %v7554_v1  ;;  %v2615_v63 = vadd.f32 0.04247222, %v2614_v9  ;;  %5955 = vrcp.f32 %v2467_v37  ;;  %v2179_v54 = vsel %vm2177_vm9, %v2178_v16, %v2176_v10  ;;  %v2131_v19 = vsub.f32 3.1415927, %v2129_v32 }
 0x28a   :  { %vm2138_vm0 = vcmp.ne.f32.partialorder %v10589_v8, %v10589_v8  ;;  %v10594_v23 = vld [vmem:[#allocation32_spill] sm:$0xff]  ;;  %v7566_v35 = vsel %vm2274_vm7, 3.1415927, %v10590_v25  ;;  %v7571_v37 = vsel %vm10392_vm12, 2.3561945, %v10575_v46  ;;  %vm2191_vm9 = vcmp.eq.s32.totalorder %v7109_v38, inf }
 0x28b   :  { %vm3131_vm1 = vcmp.gt.f32.partialorder %v10594_v23, %v10593_v13  ;;  %10595 = vst [vmem:[#allocation34_spill] sm:$0xff] %v7566_v35  ;;  %10596 = vst [vmem:[#allocation50_spill] sm:$0xff] %v7571_v37  ;;  %v2085_v10 = vsel %vm2083_vm11, %v2084_v49, %v2082_v59  ;;  %v3130_v16 = vadd.f32 %v3129_v42, %v10587_v47  ;;  %v10597_v9 = vld [vmem:[#allocation39_spill] sm:$0xff]  ;;  %v10598_v1 = vld [vmem:[#allocation38_spill] sm:$0xff]  ;;  %v2576_v0 = vadd.f32 0.19993454, %v2575_v22  ;;  %v7589_v47 = vpop.permute.xlu1 %2448 }
 0x28c   :  { %vm2268_vm10 = vcmp.gt.f32.partialorder %v10598_v1, %v10597_v9  ;;  %v7580_v56 = vand.u32 2147483647, %v7527_v61  ;;  %v3086_v37 = vsel %vm3084_vm8, %v3085_v43, %v3083_v2  ;;  %v2267_v35 = vadd.f32 %v2266_v44, %v7288_v11  ;;  %v10599_v59 = vld [vmem:[#allocation37_spill] sm:$0xff] }
 0x28d   :  { %vm10398_vm11 = vcmp.lt.f32.partialorder %v10599_v59, 0.0  ;;  %v2303_v49 = vadd.f32 -0.074975304, %v2302_v24  ;;  %v2223_v22 = vsel %vm2221_vm13, %v2222_v5, %v2220_v6  ;;  %vm2588_vm12 = vcmp.lt.s32.totalorder %v10599_v59, 0  ;;  %v10600_v61 = vld [vmem:[#allocation49_spill] sm:$0xff] }
 0x28e   :  { %v2616_v42 = vmul.f32 %v2615_v63, %v7484_v50  ;;  %v2514_v33 = vmax.f32 %v7580_v56, %v10600_v61  ;;  %v2183_v2 = vsel %vm2182_vm14, %v7402_v53, %v2179_v54  ;;  %v2089_v11 = vsel %vm2088_vm2, %v7423_v7, %v2085_v10  ;;  %v10601_v63 = vld [vmem:[#allocation55_spill] sm:$0xff]  ;;  %v10602_v24 = vld [vmem:[#allocation9_spill] sm:$0xff] }
 0x28f   :  { %v2132_v43 = vsel %vm2130_vm15, %v2131_v19, %v2129_v32  ;;  %vm2144_vm8 = vcmp.eq.s32.totalorder %v7129_v30, inf  ;;  %vm3092_vm13 = vcmp.eq.f32.partialorder %v6999_v55, 0.0  ;;  %vm2321_vm7 = vcmp.lt.s32.totalorder %v10601_v63, 0 }
 0x290   :  { %v3088_v6 = vsub.f32 3.1415927, %v3086_v37  ;;  %v3132_v44 = vsub.f32 1.5707964, %v3130_v16  ;;  %v2577_v53 = vmul.f32 %v2576_v0, %v7304_v52  ;;  %5957 = vrcp.f32 %v2514_v33  ;;  %v10624_v30 = vld [vmem:[#allocation29_spill] sm:$0xff] }
 0x291   :  { %vm10603_vm15 = vcmp.ne.f32.partialorder %v7106_v15, %v7106_v15  ;;  %vm3095_vm4 = vcmp.ne.f32.partialorder %v6999_v55, %v6999_v55  ;;  %v2225_v7 = vsub.f32 3.1415927, %v2223_v22  ;;  %vm2231_vm14 = vcmp.ne.f32.partialorder %v10577_v14, %v10577_v14  ;;  %v10613_v15 = vld [vmem:[#allocation52_spill] sm:$0xff] }
 0x292   :  { %vm7619_vm2 = vmor %vm10603_vm15, %vm2185_vm6  ;;  %v2269_v54 = vsub.f32 1.5707964, %v2267_v35  ;;  %v7630_v0 = vsel %vm2588_vm12, 3.1415927, %v10590_v25  ;;  %v2304_v33 = vmul.f32 %v2303_v49, %v7466_v12  ;;  %vm10606_vm6 = vcmp.ne.f32.partialorder %v7116_v60, %v7116_v60 }
 0x293   :  { %vm7639_vm15 = vmor %vm10606_vm6, %vm2091_vm3  ;;  %v2136_v32 = vsel %vm2135_vm5, %v7442_v3, %v2132_v43  ;;  %v7649_v5 = vsel %vm10398_vm11, 2.3561945, %v10575_v46  ;;  %v2617_v10 = vadd.f32 -0.074975304, %v2616_v42  ;;  %v7652_v49 = vand.u32 2147483647, %v7589_v47  ;;  %v7667_v42 = vpop.permute.xlu1 %2450 }
 0x294   :  { %v2187_v60 = vsel %vm7619_vm2, nan, %v2183_v2  ;;  %v2093_v28 = vsel %vm7639_vm15, nan, %v2089_v11  ;;  %vm2232_vm12 = vcmp.ne.f32.partialorder %v10602_v24, %v10602_v24  ;;  %vm2318_vm5 = vcmp.lt.f32.partialorder %v10601_v63, 0.0 }
 0x295   :  { %v7665_v3 = vsel %vm2321_vm7, 3.1415927, %v10590_v25  ;;  %vm10609_vm2 = vcmp.ne.f32.partialorder %v7124_v21, %v7124_v21  ;;  %vm10612_vm15 = vcmp.lt.f32.partialorder %v7134_v41, 0.0  ;;  %v3133_v43 = vsel %vm3131_vm1, %v3132_v44, %v3130_v16 }
 0x296   :  { %vm7675_vm6 = vmor %vm10609_vm2, %vm2138_vm0  ;;  %v3089_v11 = vsel %vm10612_vm15, %v3088_v6, %v3086_v37  ;;  %v2578_v19 = vadd.f32 -0.33333147, %v2577_v53  ;;  %v2655_v45 = vmax.f32 %v7652_v49, %v10613_v15  ;;  %vm10614_vm0 = vcmp.eq.s32.totalorder %v7112_v51, inf  ;;  %v5956_v44 = vpop.eup %5955 }
 0x297   :  { %vm2192_vm2 = vmand %vm10614_vm0, %vm2191_vm9  ;;  %v2140_v21 = vsel %vm7675_vm6, nan, %v2136_v32  ;;  %vm3101_vm15 = vcmp.eq.s32.totalorder %v10580_v20, inf  ;;  %vm10615_vm11 = vcmp.lt.f32.partialorder %v10577_v14, 0.0  ;;  %v2270_v16 = vsel %vm2268_vm10, %v2269_v54, %v2267_v35  ;;  %v7711_v35 = vpop.permute.xlu0 %2852  ;;  %v10626_v32 = vld [vmem:[#allocation36_spill] sm:$0xff]  ;;  %v10639_v14 = vld [vmem:[#allocation69_spill] sm:$0xff] }
 0x298   :  { %v2226_v37 = vsel %vm10615_vm11, %v2225_v7, %v2223_v22  ;;  %v2305_v6 = vadd.f32 0.1064488, %v2304_v33  ;;  %vm10616_vm1 = vcmp.eq.s32.totalorder %v7119_v26, inf  ;;  %vm10617_vm7 = vcmp.eq.s32.totalorder %v7122_v57, inf  ;;  %v10622_v7 = vld [vmem:[#allocation58_spill] sm:$0xff] }
 0x299   :  { %vm2098_vm3 = vmand %vm10617_vm7, %vm10616_vm1  ;;  %vm3139_vm9 = vcmp.eq.f32.partialorder %v7015_v48, 0.0  ;;  %vm2238_vm0 = vcmp.eq.s32.totalorder %v10582_v31, inf  ;;  %v2618_v38 = vmul.f32 %v2617_v10, %v7484_v50  ;;  %v2466_v51 = vmin.f32 %v7514_v34, %v10588_v29 }
 0x29a   :  { %5959 = vrcp.f32 %v2655_v45  ;;  %v7709_v22 = vand.u32 2147483647, %v7667_v42  ;;  %v7714_v26 = vsel %vm2192_vm2, %v7410_v40, %v2187_v60  ;;  %v7717_v57 = vsel %vm2098_vm3, %v7428_v62, %v2093_v28 }
 0x29b   :  { %10618 = vst [vmem:[#allocation47_spill] sm:$0xff] %v7714_v26  ;;  %10619 = vst [vmem:[#allocation33_spill] sm:$0xff] %v7717_v57  ;;  %v3135_v53 = vsub.f32 3.1415927, %v3133_v43  ;;  %vm3141_vm10 = vcmp.ne.f32.partialorder %v7144_v36, %v7144_v36  ;;  %v7724_v45 = vsel %vm2318_vm5, 2.3561945, %v10575_v46  ;;  %v3093_v40 = vsel %vm3092_vm13, %v7479_v39, %v3089_v11 }
 0x29c   :  { %10620 = vst [vmem:[#allocation32_spill] sm:$0xff] %v7724_v45  ;;  %vm10621_vm11 = vcmp.eq.s32.totalorder %v7132_v18, inf  ;;  %vm2276_vm3 = vcmp.eq.f32.partialorder %v7017_v58, 0.0  ;;  %v2579_v62 = vmul.f32 %v2578_v19, %v7304_v52  ;;  %v7735_v28 = vmul.f32 %v5956_v44, %v2466_v51  ;;  %v10635_v44 = vld [vmem:[#allocation59_spill] sm:$0xff] }
 0x29d   :  { %vm2145_vm6 = vmand %vm10621_vm11, %vm2144_vm8  ;;  %v2702_v54 = vmax.f32 %v7709_v22, %v10622_v7  ;;  %vm3142_vm7 = vcmp.ne.f32.partialorder %v7015_v48, %v7015_v48  ;;  %vm10625_vm8 = vcmp.eq.f32.partialorder %v10602_v24, 0.0  ;;  %v2272_v39 = vsub.f32 3.1415927, %v2270_v16  ;;  %v10657_v24 = vld [vmem:[#allocation31_spill] sm:$0xff] }
 0x29e   :  { %v7740_v33 = vsel %vm2145_vm6, %v7451_v4, %v2140_v21  ;;  %v2230_v18 = vsel %vm10625_vm8, %v10624_v30, %v2226_v37  ;;  %vm2278_vm13 = vcmp.ne.f32.partialorder %v10626_v32, %v10626_v32  ;;  %v2306_v52 = vmul.f32 %v2305_v6, %v7466_v12  ;;  %vm7781_vm6 = vmor %vm2231_vm14, %vm2232_vm12  ;;  %v10634_v6 = vld [vmem:[#allocation53_spill] sm:$0xff] }
 0x29f   :  { %10623 = vst [vmem:[#allocation39_spill] sm:$0xff] %v7740_v33  ;;  %vm10627_vm2 = vcmp.ne.f32.partialorder %v7134_v41, %v7134_v41  ;;  %v2619_v10 = vadd.f32 0.1064488, %v2618_v38  ;;  %v7762_v60 = vmul.f32 %v7735_v28, %v7735_v28  ;;  %5961 = vrcp.f32 %v2702_v54  ;;  %v5958_v54 = vpop.eup %5957 }
 0x2a0   :  { %vm7756_vm1 = vmor %vm10627_vm2, %vm3095_vm4  ;;  %v7765_v2 = vand.u32 2147483647, %v7711_v35  ;;  %vm10631_vm4 = vcmp.lt.f32.partialorder %v7144_v36, 0.0  ;;  %vm2279_vm11 = vcmp.ne.f32.partialorder %v7017_v58, %v7017_v58  ;;  %vm2284_vm8 = vcmp.eq.s32.totalorder %v10597_v9, inf }
 0x2a1   :  { %v3097_v41 = vsel %vm7756_vm1, nan, %v3093_v40  ;;  %v3136_v21 = vsel %vm10631_vm4, %v3135_v53, %v3133_v43  ;;  %v2580_v38 = vmul.f32 %v2579_v62, %v10634_v6  ;;  %v2471_v51 = vmul.f32 0.002785687, %v7762_v60  ;;  %v7792_v40 = vpop.permute.xlu0 %2848 }
 0x2a2   :  { %10630 = vst [vmem:[#allocation38_spill] sm:$0xff] %v7765_v2  ;;  %v2513_v43 = vmin.f32 %v7580_v56, %v10600_v61  ;;  %v2969_v53 = vmax.f32 %v7765_v2, %v10635_v44  ;;  %10636 = vst [vmem:[#allocation37_spill] sm:$0xff] %v7792_v40  ;;  %v2234_v30 = vsel %vm7781_vm6, nan, %v2230_v18  ;;  %vm10637_vm14 = vcmp.lt.f32.partialorder %v10626_v32, 0.0  ;;  %v10641_v18 = vld [vmem:[#allocation71_spill] sm:$0xff] }
 0x2a3   :  { %v2273_v4 = vsel %vm10637_vm14, %v2272_v39, %v2270_v16  ;;  %v2307_v62 = vadd.f32 -0.14207031, %v2306_v52  ;;  %vm10638_vm12 = vcmp.eq.s32.totalorder %v10579_v17, inf  ;;  %vm2285_vm1 = vcmp.eq.s32.totalorder %v10598_v1, inf  ;;  %v10643_v17 = vld [vmem:[#allocation57_spill] sm:$0xff]  ;;  %v10645_v39 = vld [vmem:[#allocation35_spill] sm:$0xff] }
 0x2a4   :  { %vm3102_vm2 = vmand %vm10638_vm12, %vm3101_vm15  ;;  %v2620_v11 = vmul.f32 %v2619_v10, %v7484_v50  ;;  %v2472_v19 = vadd.f32 -0.015866, %v2471_v51  ;;  %v7805_v55 = vmul.f32 %v5958_v54, %v2513_v43  ;;  %5963 = vrcp.f32 %v2969_v53  ;;  %v10648_v51 = vld [vmem:[#allocation40_spill] sm:$0xff]  ;;  %v10650_v54 = vld [vmem:[#allocation61_spill] sm:$0xff] }
 0x2a5   :  { %v7808_v37 = vsel %vm3102_vm2, %v10639_v14, %v3097_v41  ;;  %v7813_v16 = vsel %vm3139_vm9, %v10641_v18, %v3136_v21  ;;  %vm10642_vm15 = vcmp.eq.s32.totalorder %v10581_v27, inf  ;;  %vm2635_vm6 = vcmp.lt.s32.totalorder %v10643_v17, 0  ;;  %v10647_v41 = vld [vmem:[#allocation41_spill] sm:$0xff]  ;;  %v10649_v27 = vld [vmem:[#allocation34_spill] sm:$0xff] }
 0x2a6   :  { %10640 = vst [vmem:[#allocation49_spill] sm:$0xff] %v7808_v37  ;;  %vm2239_vm4 = vmand %vm10642_vm15, %vm2238_vm0  ;;  %v7821_v20 = vand.u32 2147483647, %v7792_v40  ;;  %v2581_v10 = vadd.f32 %v2580_v38, %v10634_v6  ;;  %vm2582_vm14 = vcmp.gt.f32.partialorder %v10648_v51, %v10647_v41  ;;  %v2473_v21 = vmul.f32 %v2472_v19, %v7762_v60 }
 0x2a7   :  { %v7824_v52 = vsel %vm2239_vm4, %v10645_v39, %v2234_v30  ;;  %v7832_v31 = vmul.f32 %v7805_v55, %v7805_v55  ;;  %v2277_v43 = vsel %vm2276_vm3, %v10649_v27, %v2273_v4  ;;  %v2308_v53 = vmul.f32 %v2307_v62, %v7466_v12  ;;  %vm7847_vm0 = vmor %vm3141_vm10, %vm3142_vm7  ;;  %v7854_v62 = vpop.permute.xlu1 %2854  ;;  %v5960_v18 = vpop.eup %5959 }
 0x2a8   :  { %10644 = vst [vmem:[#allocation55_spill] sm:$0xff] %v7821_v20  ;;  %10646 = vst [vmem:[#allocation52_spill] sm:$0xff] %v7824_v52  ;;  %vm2632_vm9 = vcmp.lt.f32.partialorder %v10643_v17, 0.0  ;;  %v2875_v6 = vmax.f32 %v7821_v20, %v10650_v54  ;;  %v2621_v38 = vadd.f32 -0.14207031, %v2620_v11  ;;  %v2654_v4 = vmin.f32 %v7652_v49, %v10613_v15 }
 0x2a9   :  { %v2474_v14 = vadd.f32 0.04247222, %v2473_v21  ;;  %v2518_v30 = vmul.f32 0.002785687, %v7832_v31  ;;  %10653 = vst [vmem:[#allocation58_spill] sm:$0xff] %v7854_v62  ;;  %vm7871_vm10 = vmor %vm2278_vm13, %vm2279_vm11  ;;  %vm2494_vm3 = vcmp.lt.s32.totalorder %v10657_v24, 0  ;;  %vm2592_vm12 = vcmp.ne.f32.partialorder %v10599_v59, %v10599_v59 }
 0x2aa   :  { %v7863_v27 = vsel %vm2635_vm6, 3.1415927, %v10590_v25  ;;  %5965 = vrcp.f32 %v2875_v6  ;;  %v2583_v21 = vsub.f32 1.5707964, %v2581_v10  ;;  %v7876_v48 = vmul.f32 %v5960_v18, %v2654_v4  ;;  %vm2286_vm7 = vmand %vm2284_vm8, %vm2285_vm1  ;;  %v10661_v18 = vld [vmem:[#allocation50_spill] sm:$0xff] }
 0x2ab   :  { %10654 = vst [vmem:[#allocation29_spill] sm:$0xff] %v7863_v27  ;;  %v2475_v39 = vmul.f32 %v2474_v14, %v7762_v60  ;;  %v2519_v36 = vadd.f32 -0.015866, %v2518_v30  ;;  %v2281_v37 = vsel %vm7871_vm10, nan, %v2277_v43  ;;  %v2309_v6 = vadd.f32 0.19993454, %v2308_v53 }
 0x2ac   :  { %v7882_v58 = vand.u32 2147483647, %v7854_v62  ;;  %v2622_v32 = vmul.f32 %v2621_v38, %v7484_v50  ;;  %v7888_v14 = vmul.f32 %v7876_v48, %v7876_v48  ;;  %v5962_v30 = vpop.eup %5961  ;;  %v7897_v43 = vsel %vm2632_vm9, 2.3561945, %v10575_v46  ;;  %v10660_v38 = vld [vmem:[#allocation62_spill] sm:$0xff] }
 0x2ad   :  { %v2476_v52 = vadd.f32 -0.074975304, %v2475_v39  ;;  %v2520_v26 = vmul.f32 %v2519_v36, %v7832_v31  ;;  %10659 = vst [vmem:[#allocation53_spill] sm:$0xff] %v7897_v43  ;;  %vm10434_vm13 = vcmp.lt.f32.partialorder %v10657_v24, 0.0  ;;  %v2701_v53 = vmin.f32 %v7709_v22, %v10622_v7 }
 0x2ae   :  { %10658 = vst [vmem:[#allocation36_spill] sm:$0xff] %v7882_v58  ;;  %v3016_v4 = vmax.f32 %v7882_v58, %v10660_v38  ;;  %v7905_v39 = vsel %vm2286_vm7, %v10661_v18, %v2281_v37  ;;  %v7909_v9 = vsel %vm2494_vm3, 3.1415927, %v10590_v25  ;;  %v2584_v11 = vsel %vm2582_vm14, %v2583_v21, %v2581_v10 }
 0x2af   :  { %10662 = vst [vmem:[#allocation69_spill] sm:$0xff] %v7905_v39  ;;  %v2477_v1 = vmul.f32 %v2476_v52, %v7762_v60  ;;  %10663 = vst [vmem:[#allocation71_spill] sm:$0xff] %v7909_v9  ;;  %v2521_v36 = vadd.f32 0.04247222, %v2520_v26  ;;  %v2659_v57 = vmul.f32 0.002785687, %v7888_v14  ;;  %v7915_v8 = vmul.f32 %v5962_v30, %v2701_v53 }
 0x2b0   :  { %5967 = vrcp.f32 %v3016_v4  ;;  %v2310_v33 = vmul.f32 %v2309_v6, %v7466_v12  ;;  %v2623_v62 = vadd.f32 0.19993454, %v2622_v32  ;;  %v7922_v26 = vsel %vm10434_vm13, 2.3561945, %v10575_v46  ;;  %v10665_v4 = vld [vmem:[#allocation17_spill] sm:$0xff] }
 0x2b1   :  { %v2478_v37 = vadd.f32 0.1064488, %v2477_v1  ;;  %v2522_v18 = vmul.f32 %v2521_v36, %v7832_v31  ;;  %v5964_v52 = vpop.eup %5963  ;;  %10664 = vst [vmem:[#allocation57_spill] sm:$0xff] %v7922_v26  ;;  %v2660_v9 = vadd.f32 -0.015866, %v2659_v57  ;;  %v7926_v10 = vmul.f32 %v7915_v8, %v7915_v8  ;;  %v10666_v1 = vld [vmem:[#allocation30_spill] sm:$0xff] }
 0x2b2   :  { %v2968_v21 = vmin.f32 %v7765_v2, %v10635_v44  ;;  %v2586_v32 = vsub.f32 3.1415927, %v2584_v11  ;;  %vm2590_vm11 = vcmp.eq.f32.partialorder %v10665_v4, 0.0  ;;  %vm2541_vm8 = vcmp.lt.s32.totalorder %v10666_v1, 0 }
 0x2b3   :  { %v2479_v30 = vmul.f32 %v2478_v37, %v7762_v60  ;;  %v2523_v53 = vadd.f32 -0.074975304, %v2522_v18  ;;  %v2661_v36 = vmul.f32 %v2660_v9, %v7888_v14  ;;  %v2706_v57 = vmul.f32 0.002785687, %v7926_v10 }
 0x2b4   :  { %v7936_v26 = vmul.f32 %v5964_v52, %v2968_v21  ;;  %v2311_v43 = vadd.f32 -0.33333147, %v2310_v33  ;;  %v2624_v6 = vmul.f32 %v2623_v62, %v7484_v50  ;;  %vm3147_vm2 = vcmp.eq.s32.totalorder %v10593_v13, inf  ;;  %v7949_v21 = vpop.permute.xlu0 %2044 }
 0x2b5   :  { %v2480_v39 = vadd.f32 -0.14207031, %v2479_v30  ;;  %v2524_v37 = vmul.f32 %v2523_v53, %v7832_v31  ;;  %v2662_v18 = vadd.f32 0.04247222, %v2661_v36  ;;  %v2707_v45 = vadd.f32 -0.015866, %v2706_v57 }
 0x2b6   :  { %10667 = vst [vmem:[#allocation35_spill] sm:$0xff] %v7936_v26  ;;  %v7945_v9 = vmul.f32 %v7936_v26, %v7936_v26  ;;  %v2874_v52 = vmin.f32 %v7821_v20, %v10650_v54  ;;  %10668 = vst [vmem:[#allocation41_spill] sm:$0xff] %v7949_v21  ;;  %vm10669_vm1 = vcmp.lt.f32.partialorder %v10599_v59, 0.0  ;;  %vm2593_vm15 = vcmp.ne.f32.partialorder %v10665_v4, %v10665_v4 }
 0x2b7   :  { %v5966_v44 = vpop.eup %5965  ;;  %v2587_v33 = vsel %vm10669_vm1, %v2586_v32, %v2584_v11  ;;  %v2481_v62 = vmul.f32 %v2480_v39, %v7762_v60  ;;  %v2525_v30 = vadd.f32 0.1064488, %v2524_v37  ;;  %v7959_v53 = vsel %vm2541_vm8, 3.1415927, %v10590_v25  ;;  %vm8002_vm3 = vmor %vm2592_vm12, %vm2593_vm15 }
 0x2b8   :  { %10670 = vst [vmem:[#allocation40_spill] sm:$0xff] %v7959_v53  ;;  %vm3148_vm4 = vcmp.eq.s32.totalorder %v10594_v23, inf  ;;  %v2663_v36 = vmul.f32 %v2662_v18, %v7888_v14  ;;  %v2708_v57 = vmul.f32 %v2707_v45, %v7926_v10  ;;  %v2973_v54 = vmul.f32 0.002785687, %v7945_v9  ;;  %v10680_v23 = vld [vmem:[#allocation72_spill] sm:$0xff] }
 0x2b9   :  { %v7965_v11 = vmul.f32 %v5966_v44, %v2874_v52  ;;  %v2312_v32 = vmul.f32 %v2311_v43, %v7466_v12  ;;  %v2625_v20 = vadd.f32 -0.33333147, %v2624_v6  ;;  %v2526_v39 = vmul.f32 %v2525_v30, %v7832_v31  ;;  %v10673_v43 = vld [vmem:[#allocation44_spill] sm:$0xff]  ;;  %vm3149_vm7 = vmand %vm3147_vm2, %vm3148_vm4 }
 0x2ba   :  { %v7970_v37 = vand.u32 2147483647, %v7949_v21  ;;  %vm2598_vm6 = vcmp.eq.s32.totalorder %v10647_v41, inf  ;;  %vm10433_vm14 = vcmp.lt.f32.partialorder %v10666_v1, 0.0  ;;  %v2664_v53 = vadd.f32 -0.074975304, %v2663_v36 }
 0x2bb   :  { %10671 = vst [vmem:[#allocation34_spill] sm:$0xff] %v7965_v11  ;;  %v2709_v18 = vadd.f32 0.04247222, %v2708_v57  ;;  %v2974_v2 = vadd.f32 -0.015866, %v2973_v54  ;;  %v7976_v45 = vmul.f32 %v7965_v11, %v7965_v11  ;;  %v3015_v12 = vmin.f32 %v7882_v58, %v10660_v38  ;;  %v10685_v41 = vld [vmem:[#allocation48_spill] sm:$0xff] }
 0x2bc   :  { %10672 = vst [vmem:[#allocation50_spill] sm:$0xff] %v7970_v37  ;;  %v2482_v44 = vadd.f32 0.19993454, %v2481_v62  ;;  %v2527_v52 = vadd.f32 -0.14207031, %v2526_v39  ;;  %v2341_v6 = vmax.f32 %v7970_v37, %v10673_v43  ;;  %vm2599_vm10 = vcmp.eq.s32.totalorder %v10648_v51, inf }
 0x2bd   :  { %v2665_v30 = vmul.f32 %v2664_v53, %v7888_v14  ;;  %v2710_v36 = vmul.f32 %v2709_v18, %v7926_v10  ;;  %v2975_v54 = vmul.f32 %v2974_v2, %v7945_v9  ;;  %v2879_v57 = vmul.f32 0.002785687, %v7976_v45  ;;  %v5968_v21 = vpop.eup %5967  ;;  %v10674_v39 = vld [vmem:[#allocation68_spill] sm:$0xff] }
 0x2be   :  { %v2591_v62 = vsel %vm2590_vm11, %v7630_v0, %v2587_v33  ;;  %v2313_v38 = vmul.f32 %v2312_v32, %v10674_v39  ;;  %v2626_v58 = vmul.f32 %v2625_v20, %v7484_v50  ;;  %v2528_v27 = vmul.f32 %v2527_v52, %v7832_v31  ;;  %v10677_v32 = vld [vmem:[#allocation56_spill] sm:$0xff] }
 0x2bf   :  { %v2666_v26 = vadd.f32 0.1064488, %v2665_v30  ;;  %v2711_v40 = vadd.f32 -0.074975304, %v2710_v36  ;;  %v2976_v53 = vadd.f32 0.04247222, %v2975_v54  ;;  %v7993_v11 = vmul.f32 %v5968_v21, %v3015_v12 }
 0x2c0   :  { %v2483_v2 = vmul.f32 %v2482_v44, %v7762_v60  ;;  %v2529_v18 = vadd.f32 0.19993454, %v2528_v27  ;;  %v2880_v24 = vadd.f32 -0.015866, %v2879_v57  ;;  %5969 = vrcp.f32 %v2341_v6  ;;  %v10682_v36 = vld [vmem:[#allocation70_spill] sm:$0xff] }
 0x2c1   :  { %v2667_v0 = vmul.f32 %v2666_v26, %v7888_v14  ;;  %v2712_v20 = vmul.f32 %v2711_v40, %v7926_v10  ;;  %v2977_v21 = vmul.f32 %v2976_v53, %v7945_v9  ;;  %v8011_v27 = vmul.f32 %v7993_v11, %v7993_v11  ;;  %v10678_v26 = vld [vmem:[#allocation46_spill] sm:$0xff] }
 0x2c2   :  { %v2595_v59 = vsel %vm8002_vm3, nan, %v2591_v62  ;;  %v2314_v33 = vadd.f32 %v2313_v38, %v10674_v39  ;;  %vm2315_vm11 = vcmp.gt.f32.partialorder %v10678_v26, %v10677_v32  ;;  %v2530_v40 = vmul.f32 %v2529_v18, %v7832_v31 }
 0x2c3   :  { %v2881_v44 = vmul.f32 %v2880_v24, %v7976_v45  ;;  %v10679_v52 = vsel %vm7847_vm0, nan, %v7813_v16  ;;  %v2668_v13 = vadd.f32 -0.14207031, %v2667_v0  ;;  %v2713_v6 = vadd.f32 0.1064488, %v2712_v20  ;;  %vm2600_vm0 = vmand %vm2598_vm6, %vm2599_vm10 }
 0x2c4   :  { %v8029_v12 = vsel %vm3149_vm7, %v10680_v23, %v10679_v52  ;;  %v2978_v30 = vadd.f32 -0.074975304, %v2977_v21  ;;  %v2627_v54 = vmul.f32 %v2626_v58, %v10682_v36  ;;  %v2484_v38 = vadd.f32 -0.33333147, %v2483_v2 }
 0x2c5   :  { %10681 = vst [vmem:[#allocation30_spill] sm:$0xff] %v8029_v12  ;;  %v2882_v57 = vadd.f32 0.04247222, %v2881_v44  ;;  %v3020_v62 = vmul.f32 0.002785687, %v8011_v27  ;;  %v2669_v53 = vmul.f32 %v2668_v13, %v7888_v14  ;;  %v2714_v24 = vmul.f32 %v2713_v6, %v7926_v10 }
 0x2c6   :  { %v2531_v39 = vadd.f32 -0.33333147, %v2530_v40  ;;  %v2979_v19 = vmul.f32 %v2978_v30, %v7945_v9  ;;  %v2316_v16 = vsub.f32 1.5707964, %v2314_v33  ;;  %v8043_v58 = vsel %vm10433_vm14, 2.3561945, %v10575_v46 }
 0x2c7   :  { %v2883_v2 = vmul.f32 %v2882_v57, %v7976_v45  ;;  %v3021_v18 = vadd.f32 -0.015866, %v3020_v62  ;;  %v8047_v50 = vsel %vm2600_vm0, %v7649_v5, %v2595_v59  ;;  %v2670_v0 = vadd.f32 0.19993454, %v2669_v53  ;;  %v10684_v40 = vld [vmem:[#allocation60_spill] sm:$0xff] }
 0x2c8   :  { %10683 = vst [vmem:[#allocation68_spill] sm:$0xff] %v8047_v50  ;;  %v2715_v20 = vadd.f32 -0.14207031, %v2714_v24  ;;  %v2980_v21 = vadd.f32 0.1064488, %v2979_v19  ;;  %v2628_v51 = vadd.f32 %v2627_v54, %v10682_v36  ;;  %vm2629_vm8 = vcmp.gt.f32.partialorder %v10685_v41, %v10684_v40 }
 0x2c9   :  { %v2485_v44 = vmul.f32 %v2484_v38, %v7762_v60  ;;  %vm10432_vm12 = vcmp.lt.f32.partialorder %v7589_v47, 0.0  ;;  %v2884_v52 = vadd.f32 -0.074975304, %v2883_v2  ;;  %v3022_v23 = vmul.f32 %v3021_v18, %v8011_v27 }
 0x2ca   :  { %v2532_v13 = vmul.f32 %v2531_v39, %v7832_v31  ;;  %v2671_v5 = vmul.f32 %v2670_v0, %v7888_v14  ;;  %v2716_v59 = vmul.f32 %v2715_v20, %v7926_v10  ;;  %v2981_v6 = vmul.f32 %v2980_v21, %v7945_v9 }
 0x2cb   :  { %vm2682_vm2 = vcmp.lt.s32.totalorder %v7589_v47, 0  ;;  %v2885_v36 = vmul.f32 %v2884_v52, %v7976_v45  ;;  %v3023_v60 = vadd.f32 0.04247222, %v3022_v23  ;;  %v2317_v54 = vsel %vm2315_vm11, %v2316_v16, %v2314_v33 }
 0x2cc   :  { %v2672_v38 = vadd.f32 -0.33333147, %v2671_v5  ;;  %v2717_v57 = vadd.f32 0.19993454, %v2716_v59  ;;  %v2982_v31 = vadd.f32 -0.14207031, %v2981_v6  ;;  %v2486_v39 = vmul.f32 %v2485_v44, %v7735_v28 }
 0x2cd   :  { %v2630_v62 = vsub.f32 1.5707964, %v2628_v51  ;;  %v2886_v53 = vadd.f32 0.1064488, %v2885_v36  ;;  %v3024_v24 = vmul.f32 %v3023_v60, %v8011_v27  ;;  %v5970_v19 = vpop.eup %5969  ;;  %v2533_v2 = vmul.f32 %v2532_v13, %v7805_v55 }
 0x2ce   :  { %v2673_v18 = vmul.f32 %v2672_v38, %v7888_v14  ;;  %v2718_v0 = vmul.f32 %v2717_v57, %v7926_v10  ;;  %v2983_v20 = vmul.f32 %v2982_v31, %v7945_v9  ;;  %v8074_v33 = vsel %vm2682_vm2, 3.1415927, %v10590_v25  ;;  %v10686_v14 = vld [vmem:[#allocation16_spill] sm:$0xff] }
 0x2cf   :  { %v2887_v16 = vmul.f32 %v2886_v53, %v7976_v45  ;;  %v3025_v21 = vadd.f32 -0.074975304, %v3024_v24  ;;  %v2340_v44 = vmin.f32 %v7970_v37, %v10673_v43  ;;  %v2319_v52 = vsub.f32 3.1415927, %v2317_v54  ;;  %v8263_v43 = vpop.permute.xlu0 %2046 }
 0x2d0   :  { %v2674_v23 = vmul.f32 %v2673_v18, %v7876_v48  ;;  %v2719_v13 = vadd.f32 -0.33333147, %v2718_v0  ;;  %vm2729_vm1 = vcmp.lt.s32.totalorder %v7667_v42, 0  ;;  %vm2323_vm15 = vcmp.eq.f32.partialorder %v10686_v14, 0.0  ;;  %v8122_v18 = vpop.permute.xlu1 %2850 }
 0x2d1   :  { %vm2325_vm4 = vcmp.ne.f32.partialorder %v10601_v63, %v10601_v63  ;;  %v2984_v5 = vadd.f32 0.19993454, %v2983_v20  ;;  %v2888_v59 = vadd.f32 -0.14207031, %v2887_v16  ;;  %v3026_v6 = vmul.f32 %v3025_v21, %v8011_v27  ;;  %v10687_v20 = vld [vmem:[#allocation19_spill] sm:$0xff] }
 0x2d2   :  { %v8085_v36 = vmul.f32 %v5970_v19, %v2340_v44  ;;  %v2631_v60 = vsel %vm2629_vm8, %v2630_v62, %v2628_v51  ;;  %v2487_v38 = vadd.f32 %v2486_v39, %v7735_v28  ;;  %vm2488_vm6 = vcmp.gt.f32.partialorder %v10588_v29, %v7514_v34 }
 0x2d3   :  { %v2534_v57 = vadd.f32 %v2533_v2, %v7805_v55  ;;  %vm2535_vm10 = vcmp.gt.f32.partialorder %v10600_v61, %v7580_v56  ;;  %vm2676_vm3 = vcmp.gt.f32.partialorder %v10613_v15, %v7652_v49  ;;  %v2720_v31 = vmul.f32 %v2719_v13, %v7926_v10 }
 0x2d4   :  { %vm2326_vm7 = vcmp.ne.f32.partialorder %v10686_v14, %v10686_v14  ;;  %v2675_v51 = vadd.f32 %v2674_v23, %v7876_v48  ;;  %v2985_v28 = vmul.f32 %v2984_v5, %v7945_v9  ;;  %v2889_v62 = vmul.f32 %v2888_v59, %v7976_v45 }
 0x2d5   :  { %v3027_v39 = vadd.f32 0.1064488, %v3026_v6  ;;  %v8107_v55 = vsel %vm10432_vm12, 2.3561945, %v10575_v46  ;;  %v2721_v53 = vmul.f32 %v2720_v31, %v7915_v8  ;;  %vm10435_vm11 = vcmp.lt.f32.partialorder %v7667_v42, 0.0 }
 0x2d6   :  { %v8113_v10 = vmul.f32 %v8085_v36, %v8085_v36  ;;  %vm2331_vm0 = vcmp.eq.s32.totalorder %v10677_v32, inf  ;;  %v2633_v48 = vsub.f32 3.1415927, %v2631_v60  ;;  %v8119_v24 = vsel %vm2729_vm1, 3.1415927, %v10590_v25 }
 0x2d7   :  { %v2890_v19 = vadd.f32 0.19993454, %v2889_v62  ;;  %v3028_v2 = vmul.f32 %v3027_v39, %v8011_v27  ;;  %v2320_v0 = vsel %vm2318_vm5, %v2319_v52, %v2317_v54  ;;  %vm2637_vm8 = vcmp.eq.f32.partialorder %v10687_v20, 0.0 }
 0x2d8   :  { %v2489_v16 = vsub.f32 1.5707964, %v2487_v38  ;;  %v2986_v21 = vadd.f32 -0.33333147, %v2985_v28  ;;  %v2345_v44 = vmul.f32 0.002785687, %v8113_v10  ;;  %vm2723_vm12 = vcmp.gt.f32.partialorder %v10622_v7, %v7709_v22 }
 0x2d9   :  { %vm2332_vm1 = vcmp.eq.s32.totalorder %v10678_v26, inf  ;;  %v2536_v23 = vsub.f32 1.5707964, %v2534_v57  ;;  %v2677_v13 = vsub.f32 1.5707964, %v2675_v51  ;;  %v2891_v5 = vmul.f32 %v2890_v19, %v7976_v45  ;;  %v10704_v26 = vld [vmem:[#allocation24_spill] sm:$0xff] }
 0x2da   :  { %v3029_v59 = vadd.f32 -0.14207031, %v3028_v2  ;;  %vm2640_vm5 = vcmp.ne.f32.partialorder %v10687_v20, %v10687_v20  ;;  %v2722_v54 = vadd.f32 %v2721_v53, %v7915_v8  ;;  %v8140_v52 = vsel %vm10435_vm11, 2.3561945, %v10575_v46 }
 0x2db   :  { %v2346_v6 = vadd.f32 -0.015866, %v2345_v44  ;;  %v8143_v31 = vand.u32 2147483647, %v8122_v18  ;;  %vm2645_vm14 = vcmp.eq.s32.totalorder %v10684_v40, inf  ;;  %vm10438_vm13 = vcmp.lt.f32.partialorder %v7711_v35, 0.0 }
 0x2dc   :  { %vm2996_vm2 = vcmp.lt.s32.totalorder %v7711_v35, 0  ;;  %v2892_v28 = vadd.f32 -0.33333147, %v2891_v5  ;;  %v3030_v62 = vmul.f32 %v3029_v59, %v8011_v27  ;;  %v2324_v8 = vsel %vm2323_vm15, %v7665_v3, %v2320_v0  ;;  %v10695_v59 = vld [vmem:[#allocation37_spill] sm:$0xff]  ;;  %vm8212_vm15 = vmand %vm2331_vm0, %vm2332_vm1  ;;  %v10716_v40 = vld [vmem:[#allocation58_spill] sm:$0xff] }
 0x2dd   :  { %v2634_v39 = vsel %vm2632_vm9, %v2633_v48, %v2631_v60  ;;  %v2987_v53 = vmul.f32 %v2986_v21, %v7945_v9  ;;  %v2347_v19 = vmul.f32 %v2346_v6, %v8113_v10  ;;  %vm2646_vm11 = vcmp.eq.s32.totalorder %v10685_v41, inf  ;;  %vm8173_vm9 = vmor %vm2325_vm4, %vm2326_vm7  ;;  %v10692_v21 = vld [vmem:[#allocation18_spill] sm:$0xff]  ;;  %v10698_v9 = vld [vmem:[#allocation29_spill] sm:$0xff] }
 0x2de   :  { %v2490_v2 = vsel %vm2488_vm6, %v2489_v16, %v2487_v38  ;;  %v2537_v44 = vsel %vm2535_vm10, %v2536_v23, %v2534_v57  ;;  %v2678_v3 = vsel %vm2676_vm3, %v2677_v13, %v2675_v51  ;;  %v2893_v60 = vmul.f32 %v2892_v28, %v7976_v45  ;;  %v10690_v38 = vld [vmem:[#allocation31_spill] sm:$0xff]  ;;  %v10693_v23 = vld [vmem:[#allocation20_spill] sm:$0xff]  ;;  %v10694_v13 = vld [vmem:[#allocation34_spill] sm:$0xff] }
 0x2df   :  { %v2724_v57 = vsub.f32 1.5707964, %v2722_v54  ;;  %v3031_v48 = vadd.f32 0.19993454, %v3030_v62  ;;  %v2348_v0 = vadd.f32 0.04247222, %v2347_v19  ;;  %vm2499_vm7 = vcmp.ne.f32.partialorder %v10692_v21, %v10692_v21 }
 0x2e0   :  { %v10691_v16 = vld [vmem:[#allocation63_spill] sm:$0xff]  ;;  %v2328_v45 = vsel %vm8173_vm9, nan, %v2324_v8  ;;  %vm2496_vm6 = vcmp.eq.f32.partialorder %v10692_v21, 0.0  ;;  %vm2543_vm10 = vcmp.eq.f32.partialorder %v10693_v23, 0.0  ;;  %v8190_v63 = vsel %vm2996_vm2, 3.1415927, %v10590_v25 }
 0x2e1   :  { %v2922_v51 = vmax.f32 %v8143_v31, %v10691_v16  ;;  %v2894_v5 = vmul.f32 %v2893_v60, %v10694_v13  ;;  %vm2902_vm3 = vcmp.lt.s32.totalorder %v10695_v59, 0  ;;  %v10696_v6 = vld [vmem:[#allocation22_spill] sm:$0xff]  ;;  %v10697_v28 = vld [vmem:[#allocation35_spill] sm:$0xff]  ;;  %v3032_v8 = vmul.f32 %v3031_v48, %v8011_v27  ;;  %v10714_v41 = vld [vmem:[#allocation53_spill] sm:$0xff] }
 0x2e2   :  { %v2988_v62 = vmul.f32 %v2987_v53, %v10697_v28  ;;  %v2349_v19 = vmul.f32 %v2348_v0, %v8113_v10  ;;  %v2638_v60 = vsel %vm2637_vm8, %v10698_v9, %v2634_v39  ;;  %v2492_v30 = vsub.f32 3.1415927, %v2490_v2 }
 0x2e3   :  { %5971 = vrcp.f32 %v2922_v51  ;;  %v2539_v12 = vsub.f32 3.1415927, %v2537_v44  ;;  %vm2546_vm4 = vcmp.ne.f32.partialorder %v10693_v23, %v10693_v23  ;;  %v2680_v14 = vsub.f32 3.1415927, %v2678_v3 }
 0x2e4   :  { %v2725_v39 = vsel %vm2723_vm12, %v2724_v57, %v2722_v54  ;;  %v2895_v48 = vadd.f32 %v2894_v5, %v10694_v13  ;;  %v3033_v0 = vadd.f32 -0.33333147, %v3032_v8  ;;  %v2350_v51 = vadd.f32 -0.074975304, %v2349_v19  ;;  %v10705_v54 = vld [vmem:[#allocation38_spill] sm:$0xff]  ;;  %v10706_v57 = vld [vmem:[#allocation59_spill] sm:$0xff] }
 0x2e5   :  { %vm10701_vm0 = vcmp.ne.f32.partialorder %v10643_v17, %v10643_v17  ;;  %vm2505_vm9 = vcmp.eq.s32.totalorder %v10588_v29, inf  ;;  %vm2731_vm2 = vcmp.eq.f32.partialorder %v10704_v26, 0.0  ;;  %v8242_v13 = vsel %vm10438_vm13, 2.3561945, %v10575_v46  ;;  %v10707_v17 = vld [vmem:[#allocation55_spill] sm:$0xff]  ;;  %v10708_v5 = vld [vmem:[#allocation61_spill] sm:$0xff] }
 0x2e6   :  { %vm8229_vm1 = vmor %vm10701_vm0, %vm2640_vm5  ;;  %vm2896_vm5 = vcmp.gt.f32.partialorder %v10708_v5, %v10707_v17  ;;  %vm2899_vm0 = vcmp.lt.f32.partialorder %v10695_v59, 0.0  ;;  %v8250_v8 = vsel %vm2902_vm3, 3.1415927, %v10590_v25  ;;  %v10709_v19 = vld [vmem:[#allocation32_spill] sm:$0xff]  ;;  %v2989_v4 = vadd.f32 %v2988_v62, %v10697_v28 }
 0x2e7   :  { %v8255_v9 = vsel %vm8212_vm15, %v10709_v19, %v2328_v45  ;;  %v2642_v20 = vsel %vm8229_vm1, nan, %v2638_v60  ;;  %v2351_v50 = vmul.f32 %v2350_v51, %v8113_v10  ;;  %vm10711_vm3 = vcmp.lt.f32.partialorder %v10690_v38, 0.0  ;;  %vm2647_vm1 = vmand %vm2645_vm14, %vm2646_vm11  ;;  %v10738_v19 = vld [vmem:[#allocation62_spill] sm:$0xff] }
 0x2e8   :  { %10710 = vst [vmem:[#allocation56_spill] sm:$0xff] %v8255_v9  ;;  %v2493_v37 = vsel %vm10711_vm3, %v2492_v30, %v2490_v2  ;;  %vm10712_vm8 = vcmp.lt.f32.partialorder %v10666_v1, 0.0  ;;  %v2727_v53 = vsub.f32 3.1415927, %v2725_v39  ;;  %vm2734_vm15 = vcmp.ne.f32.partialorder %v10704_v26, %v10704_v26 }
 0x2e9   :  { %v2540_v45 = vsel %vm10712_vm8, %v2539_v12, %v2537_v44  ;;  %v3034_v60 = vmul.f32 %v3033_v0, %v8011_v27  ;;  %vm10713_vm12 = vcmp.lt.f32.partialorder %v7589_v47, 0.0  ;;  %vm2693_vm13 = vcmp.eq.s32.totalorder %v10613_v15, inf  ;;  %v10718_v0 = vld [vmem:[#allocation40_spill] sm:$0xff] }
 0x2ea   :  { %v2681_v28 = vsel %vm10713_vm12, %v2680_v14, %v2678_v3  ;;  %vm2739_vm3 = vcmp.eq.s32.totalorder %v7709_v22, inf  ;;  %v2897_v30 = vsub.f32 1.5707964, %v2895_v48  ;;  %v8283_v12 = vsel %vm2899_vm0, 2.3561945, %v10575_v46  ;;  %v10717_v3 = vld [vmem:[#allocation71_spill] sm:$0xff] }
 0x2eb   :  { %v2352_v2 = vadd.f32 0.1064488, %v2351_v50  ;;  %v8287_v44 = vsel %vm2647_vm1, %v10714_v41, %v2642_v20  ;;  %vm3040_vm14 = vcmp.lt.f32.partialorder %v10716_v40, 0.0  ;;  %v8291_v14 = vand.u32 2147483647, %v8263_v43  ;;  %v8301_v20 = vpop.permute.xlu1 %2452  ;;  %v10724_v41 = vld [vmem:[#allocation45_spill] sm:$0xff] }
 0x2ec   :  { %10715 = vst [vmem:[#allocation46_spill] sm:$0xff] %v8287_v44  ;;  %v2497_v62 = vsel %vm2496_vm6, %v10717_v3, %v2493_v37  ;;  %v2544_v51 = vsel %vm2543_vm10, %v10718_v0, %v2540_v45  ;;  %vm2740_vm11 = vcmp.eq.s32.totalorder %v10622_v7, inf  ;;  %v2991_v50 = vsub.f32 1.5707964, %v2989_v4 }
 0x2ed   :  { %v2353_v32 = vmul.f32 %v2352_v2, %v8113_v10  ;;  %vm10719_vm8 = vcmp.ne.f32.partialorder %v10690_v38, %v10690_v38  ;;  %vm10722_vm6 = vcmp.eq.f32.partialorder %v10696_v6, 0.0  ;;  %vm10723_vm10 = vcmp.lt.f32.partialorder %v7667_v42, 0.0 }
 0x2ee   :  { %vm8309_vm12 = vmor %vm10719_vm8, %vm2499_vm7  ;;  %v2685_v37 = vsel %vm10722_vm6, %v8074_v33, %v2681_v28  ;;  %v2728_v45 = vsel %vm10723_vm10, %v2727_v53, %v2725_v39  ;;  %v3035_v2 = vmul.f32 %v3034_v60, %v7993_v11  ;;  %v2388_v3 = vmax.f32 %v8291_v14, %v10724_v41 }
 0x2ef   :  { %vm10725_vm7 = vcmp.ne.f32.partialorder %v10666_v1, %v10666_v1  ;;  %v2898_v33 = vsel %vm2896_vm5, %v2897_v30, %v2895_v48  ;;  %vm3043_vm8 = vcmp.lt.s32.totalorder %v10716_v40, 0  ;;  %v2354_v39 = vadd.f32 -0.14207031, %v2353_v32  ;;  %v10732_v48 = vld [vmem:[#allocation26_spill] sm:$0xff]  ;;  %v10737_v32 = vld [vmem:[#allocation36_spill] sm:$0xff] }
 0x2f0   :  { %vm8328_vm1 = vmor %vm10725_vm7, %vm2546_vm4  ;;  %v2501_v53 = vsel %vm8309_vm12, nan, %v2497_v62  ;;  %vm10728_vm6 = vcmp.ne.f32.partialorder %v10696_v6, %v10696_v6  ;;  %vm10729_vm4 = vcmp.ne.f32.partialorder %v7589_v47, %v7589_v47  ;;  %vm2904_vm5 = vcmp.eq.f32.partialorder %v10732_v48, 0.0 }
 0x2f1   :  { %v2548_v60 = vsel %vm8328_vm1, nan, %v2544_v51  ;;  %vm8346_vm10 = vmor %vm10729_vm4, %vm10728_vm6  ;;  %5973 = vrcp.f32 %v2388_v3  ;;  %v8354_v28 = vand.u32 2147483647, %v8301_v20  ;;  %vm10733_vm12 = vcmp.eq.s32.totalorder %v7514_v34, inf  ;;  %v5972_v34 = vpop.eup %5971  ;;  %v8386_v3 = vpop.permute.xlu0 %2860 }
 0x2f2   :  { %vm8360_vm1 = vmand %vm10733_vm12, %vm2505_vm9  ;;  %v2689_v47 = vsel %vm8346_vm10, nan, %v2685_v37  ;;  %v2732_v62 = vsel %vm2731_vm2, %v8119_v24, %v2728_v45  ;;  %vm10736_vm6 = vcmp.gt.f32.partialorder %v10706_v57, %v10705_v54  ;;  %v2921_v29 = vmin.f32 %v8143_v31, %v10691_v16  ;;  %10742 = vst [vmem:[#allocation72_spill] sm:$0xff] %v8386_v3 }
 0x2f3   :  { %v2992_v51 = vsel %vm10736_vm6, %v2991_v50, %v2989_v4  ;;  %vm10739_vm9 = vcmp.eq.s32.totalorder %v10600_v61, inf  ;;  %vm10740_vm12 = vcmp.eq.s32.totalorder %v7580_v56, inf  ;;  %v2900_v37 = vsub.f32 3.1415927, %v2898_v33  ;;  %v10741_v50 = vld [vmem:[#allocation51_spill] sm:$0xff]  ;;  %v10746_v56 = vld [vmem:[#allocation25_spill] sm:$0xff] }
 0x2f4   :  { %vm2553_vm10 = vmand %vm10740_vm12, %vm10739_vm9  ;;  %v3036_v24 = vadd.f32 %v3035_v2, %v7993_v11  ;;  %v2355_v4 = vmul.f32 %v2354_v39, %v8113_v10  ;;  %v2749_v45 = vmax.f32 %v8354_v28, %v10741_v50  ;;  %vm10743_vm6 = vcmp.ne.f32.partialorder %v7667_v42, %v7667_v42  ;;  %v10747_v2 = vld [vmem:[#allocation41_spill] sm:$0xff] }
 0x2f5   :  { %vm8394_vm9 = vmor %vm10743_vm6, %vm2734_vm15  ;;  %vm2998_vm12 = vcmp.eq.f32.partialorder %v10746_v56, 0.0  ;;  %vm3000_vm7 = vcmp.ne.f32.partialorder %v7711_v35, %v7711_v35  ;;  %v8404_v11 = vsel %vm3043_vm8, 3.1415927, %v10590_v25  ;;  %vm2365_vm2 = vcmp.lt.f32.partialorder %v10747_v2, 0.0  ;;  %v10748_v42 = vld [vmem:[#allocation57_spill] sm:$0xff] }
 0x2f6   :  { %vm2368_vm4 = vcmp.lt.s32.totalorder %v10747_v2, 0  ;;  %v8408_v38 = vmul.f32 %v5972_v34, %v2921_v29  ;;  %v8413_v39 = vsel %vm8360_vm1, %v10748_v42, %v2501_v53  ;;  %v8416_v1 = vsel %vm2553_vm10, %v8043_v58, %v2548_v60  ;;  %v8425_v29 = vpop.permute.xlu1 %2454 }
 0x2f7   :  { %vm10749_vm15 = vcmp.eq.s32.totalorder %v7652_v49, inf  ;;  %v2736_v27 = vsel %vm8394_vm9, nan, %v2732_v62  ;;  %vm2912_vm6 = vcmp.eq.s32.totalorder %v10707_v17, inf  ;;  %5975 = vrcp.f32 %v2749_v45 }
 0x2f8   :  { %vm2694_vm8 = vmand %vm10749_vm15, %vm2693_vm13  ;;  %v2994_v53 = vsub.f32 3.1415927, %v2992_v51  ;;  %vm3001_vm1 = vcmp.ne.f32.partialorder %v10746_v56, %v10746_v56  ;;  %v8434_v15 = vmul.f32 %v8408_v38, %v8408_v38  ;;  %v8437_v49 = vand.u32 2147483647, %v8386_v3 }
 0x2f9   :  { %v8428_v30 = vsel %vm2694_vm8, %v8107_v55, %v2689_v47  ;;  %vm2741_vm13 = vmand %vm2739_vm3, %vm2740_vm11  ;;  %v2901_v58 = vsel %vm2899_vm0, %v2900_v37, %v2898_v33  ;;  %vm2913_vm10 = vcmp.eq.s32.totalorder %v10708_v5, inf  ;;  %v3038_v55 = vsub.f32 1.5707964, %v3036_v24 }
 0x2fa   :  { %10750 = vst [vmem:[#allocation70_spill] sm:$0xff] %v8428_v30  ;;  %v8449_v60 = vsel %vm3040_vm14, 2.3561945, %v10575_v46  ;;  %v2356_v47 = vadd.f32 0.19993454, %v2355_v4  ;;  %v8452_v62 = vsel %vm2741_vm13, %v8140_v52, %v2736_v27  ;;  %v10754_v52 = vld [vmem:[#allocation42_spill] sm:$0xff]  ;;  %v2905_v61 = vsel %vm2904_vm5, %v8250_v8, %v2901_v58  ;;  %v8483_v26 = vpop.permute.xlu1 %2862 }
 0x2fb   :  { %10751 = vst [vmem:[#allocation60_spill] sm:$0xff] %v8452_v62  ;;  %v8457_v22 = vsel %vm2368_vm4, 3.1415927, %v10590_v25  ;;  %v8462_v7 = vsel %vm2365_vm2, 2.3561945, %v10575_v46  ;;  %v3157_v27 = vmax.f32 %v8437_v49, %v10754_v52  ;;  %vm10755_vm0 = vcmp.lt.f32.partialorder %v7711_v35, 0.0 }
 0x2fc   :  { %10752 = vst [vmem:[#allocation48_spill] sm:$0xff] %v8457_v22  ;;  %10753 = vst [vmem:[#allocation31_spill] sm:$0xff] %v8462_v7  ;;  %v2926_v33 = vmul.f32 0.002785687, %v8434_v15  ;;  %v2555_v37 = vand.u32 2147483647, %v8416_v1  ;;  %v2995_v45 = vsel %vm10755_vm0, %v2994_v53, %v2992_v51  ;;  %vm10756_vm3 = vcmp.gt.f32.partialorder %v10738_v19, %v10737_v32 }
 0x2fd   :  { %v8476_v0 = vand.u32 2147483647, %v8425_v29  ;;  %v3039_v1 = vsel %vm10756_vm3, %v3038_v55, %v3036_v24  ;;  %v2357_v4 = vmul.f32 %v2356_v47, %v8113_v10  ;;  %5977 = vrcp.f32 %v3157_v27  ;;  %10757 = vst [vmem:[#allocation63_spill] sm:$0xff] %v8483_v26  ;;  %v10762_v51 = vld [vmem:[#allocation27_spill] sm:$0xff]  ;;  %v10763_v24 = vld [vmem:[#allocation54_spill] sm:$0xff] }
 0x2fe   :  { %v2927_v42 = vadd.f32 -0.015866, %v2926_v33  ;;  %vm10758_vm11 = vcmp.ne.f32.partialorder %v10732_v48, %v10732_v48  ;;  %vm10759_vm5 = vcmp.ne.f32.partialorder %v10695_v59, %v10695_v59  ;;  %vm3045_vm9 = vcmp.eq.f32.partialorder %v10762_v51, 0.0  ;;  %v5974_v33 = vpop.eup %5973  ;;  %v10770_v30 = vld [vmem:[#allocation39_spill] sm:$0xff] }
 0x2ff   :  { %vm8491_vm4 = vmor %vm10759_vm5, %vm10758_vm11  ;;  %vm2946_vm15 = vcmp.lt.f32.partialorder %v8122_v18, 0.0  ;;  %vm2949_vm8 = vcmp.lt.s32.totalorder %v8122_v18, 0  ;;  %v2796_v58 = vmax.f32 %v8476_v0, %v10763_v24  ;;  %v8504_v55 = vsel %vm2998_vm12, %v8190_v63, %v2995_v45 }
 0x300   :  { %v2928_v53 = vmul.f32 %v2927_v42, %v8434_v15  ;;  %v2909_v59 = vsel %vm8491_vm4, nan, %v2905_v61  ;;  %v2387_v47 = vmin.f32 %v8291_v14, %v10724_v41  ;;  %vm2415_vm13 = vcmp.lt.s32.totalorder %v8263_v43, 0  ;;  %vm8520_vm12 = vmor %vm3000_vm7, %vm3001_vm1 }
 0x301   :  { %v3041_v27 = vsub.f32 3.1415927, %v3039_v1  ;;  %5979 = vrcp.f32 %v2796_v58  ;;  %v8512_v34 = vand.u32 2147483647, %v8483_v26  ;;  %vm3047_vm0 = vcmp.ne.f32.partialorder %v10716_v40, %v10716_v40  ;;  %vm2914_vm7 = vmand %vm2912_vm6, %vm2913_vm10  ;;  %v10767_v58 = vld [vmem:[#allocation43_spill] sm:$0xff] }
 0x302   :  { %v2929_v42 = vadd.f32 0.04247222, %v2928_v53  ;;  %v2358_v45 = vadd.f32 -0.33333147, %v2357_v4  ;;  %v8527_v61 = vsel %vm2949_vm8, 3.1415927, %v10590_v25  ;;  %v8529_v8 = vmul.f32 %v5974_v33, %v2387_v47 }
 0x303   :  { %10764 = vst [vmem:[#allocation34_spill] sm:$0xff] %v8512_v34  ;;  %vm2412_vm3 = vcmp.lt.f32.partialorder %v8263_v43, 0.0  ;;  %v3003_v53 = vsel %vm8520_vm12, nan, %v8504_v55  ;;  %v8543_v4 = vsel %vm2946_vm15, 2.3561945, %v10575_v46  ;;  %v3204_v47 = vmax.f32 %v8512_v34, %v10767_v58  ;;  %v10777_v26 = vld [vmem:[#allocation7_spill] sm:$0xff] }
 0x304   :  { %v2930_v35 = vmul.f32 %v2929_v42, %v8434_v15  ;;  %vm3006_vm1 = vcmp.eq.s32.totalorder %v10705_v54, inf  ;;  %v8549_v33 = vsel %vm2914_vm7, %v8283_v12, %v2909_v59  ;;  %vm3048_vm11 = vcmp.ne.f32.partialorder %v10762_v51, %v10762_v51  ;;  %v5976_v42 = vpop.eup %5975  ;;  %v3266_v51 = vpop.permute.xlu0 %3265 }
 0x305   :  { %v8555_v17 = vmul.f32 %v8529_v8, %v8529_v8  ;;  %v8560_v5 = vsel %vm2415_vm13, 3.1415927, %v10590_v25  ;;  %v2748_v55 = vmin.f32 %v8354_v28, %v10741_v50  ;;  %v3042_v12 = vsel %vm3040_vm14, %v3041_v27, %v3039_v1  ;;  %vm8623_vm5 = vmor %vm3047_vm0, %vm3048_vm11 }
 0x306   :  { %10768 = vst [vmem:[#allocation37_spill] sm:$0xff] %v8560_v5  ;;  %v2931_v59 = vadd.f32 -0.074975304, %v2930_v35  ;;  %v8569_v63 = vsel %vm2412_vm3, 2.3561945, %v10575_v46  ;;  %5981 = vrcp.f32 %v3204_v47  ;;  %vm3007_vm6 = vcmp.eq.s32.totalorder %v10706_v57, inf }
 0x307   :  { %10769 = vst [vmem:[#allocation35_spill] sm:$0xff] %v8569_v63  ;;  %v2359_v62 = vmul.f32 %v2358_v45, %v8113_v10  ;;  %v2392_v9 = vmul.f32 0.002785687, %v8555_v17  ;;  %v8574_v6 = vmul.f32 %v5976_v42, %v2748_v55  ;;  %v10771_v7 = vand.u32 2147483647, %v10770_v30  ;;  %v10772_v5 = vld [vmem:[#allocation11_spill] sm:$0xff]  ;;  %vm3008_vm4 = vmand %vm3006_vm1, %vm3007_vm6 }
 0x308   :  { %v10773_v22 = vand.u32 2147483648, %v10772_v5  ;;  %v2932_v27 = vmul.f32 %v2931_v59, %v8434_v15  ;;  %vm10466_vm14 = vcmp.lt.f32.partialorder %v8301_v20, 0.0  ;;  %v10774_v35 = vand.u32 2147483648, %v10693_v23  ;;  %v10775_v63 = vld [vmem:[#allocation33_spill] sm:$0xff] }
 0x309   :  { %v10776_v44 = vand.u32 2147483647, %v10775_v63  ;;  %v10778_v10 = vand.u32 2147483648, %v10777_v26  ;;  %v8591_v55 = vsel %vm3045_vm9, %v8404_v11, %v3042_v12  ;;  %v2393_v30 = vadd.f32 -0.015866, %v2392_v9 }
 0x30a   :  { %v2149_v1 = vor.u32 %v10773_v22, %v10771_v7  ;;  %v2557_v47 = vor.u32 %v10774_v35, %v2555_v37  ;;  %v8595_v22 = vmul.f32 %v8574_v6, %v8574_v6  ;;  %vm2776_vm10 = vcmp.lt.s32.totalorder %v8301_v20, 0 }
 0x30b   :  { %v2102_v45 = vor.u32 %v10778_v10, %v10776_v44  ;;  %v2933_v7 = vadd.f32 0.1064488, %v2932_v27  ;;  %v10779_v59 = vand.u32 2147483647, %v8413_v39  ;;  %v10780_v63 = vand.u32 2147483648, %v10692_v21  ;;  %v5978_v10 = vpop.eup %5977 }
 0x30c   :  { %v3305_v42 = vmul.f32 0.5, %v2149_v1  ;;  %v3313_v37 = vmul.f32 0.3, %v2557_v47  ;;  %v2360_v35 = vmul.f32 %v2359_v62, %v8085_v36  ;;  %v2394_v11 = vmul.f32 %v2393_v30, %v8555_v17 }
 0x30d   :  { %v2510_v44 = vor.u32 %v10780_v63, %v10779_v59  ;;  %v2753_v9 = vmul.f32 0.002785687, %v8595_v22  ;;  %v3156_v12 = vmin.f32 %v8437_v49, %v10754_v52  ;;  %v2934_v5 = vmul.f32 %v2933_v7, %v8434_v15  ;;  %v6026_v7 = vld [vmem:[%s10260_s1 + $0x8] sm:$0xff] }
 0x30e   :  { %v8608_v27 = vadd.f32 %v3313_v37, %v3305_v42  ;;  %v3304_v1 = vmul.f32 0.5, %v2102_v45  ;;  %v2395_v39 = vadd.f32 0.04247222, %v2394_v11  ;;  %v8613_v62 = vsel %vm2776_vm10, 3.1415927, %v10590_v25  ;;  %v5980_v63 = vpop.eup %5979 }
 0x30f   :  { %v3312_v47 = vmul.f32 0.3, %v2510_v44  ;;  %v2754_v23 = vadd.f32 -0.015866, %v2753_v9  ;;  %10782 = vst [vmem:[#allocation38_spill] sm:$0xff] %v8613_v62  ;;  %v8615_v30 = vmul.f32 %v5978_v10, %v3156_v12  ;;  %v2795_v37 = vmin.f32 %v8476_v0, %v10763_v24 }
 0x310   :  { %10781 = vst [vmem:[#allocation29_spill] sm:$0xff] %v8608_v27  ;;  %v2935_v45 = vadd.f32 -0.14207031, %v2934_v5  ;;  %v8630_v42 = vsel %vm10466_vm14, 2.3561945, %v10575_v46  ;;  %v2396_v44 = vmul.f32 %v2395_v39, %v8555_v17  ;;  %v2361_v9 = vadd.f32 %v2360_v35, %v8085_v36  ;;  %v10788_v39 = vld [vmem:[#allocation44_spill] sm:$0xff] }
 0x311   :  { %10785 = vst [vmem:[#allocation59_spill] sm:$0xff] %v8630_v42  ;;  %v8634_v59 = vadd.f32 %v3312_v47, %v3304_v1  ;;  %v2755_v11 = vmul.f32 %v2754_v23, %v8595_v22  ;;  %v8643_v5 = vmul.f32 %v8615_v30, %v8615_v30  ;;  %v8651_v10 = vmul.f32 %v5980_v63, %v2795_v37  ;;  %v10787_v23 = vld [vmem:[#allocation50_spill] sm:$0xff] }
 0x312   :  { %v2936_v12 = vmul.f32 %v2935_v45, %v8434_v15  ;;  %v2916_v1 = vand.u32 2147483647, %v8549_v33  ;;  %v8655_v47 = vsel %vm3008_vm4, %v8242_v13, %v3003_v53  ;;  %vm2362_vm9 = vcmp.gt.f32.partialorder %v10788_v39, %v10787_v23 }
 0x313   :  { %10786 = vst [vmem:[#allocation55_spill] sm:$0xff] %v8651_v10  ;;  %v2397_v40 = vadd.f32 -0.074975304, %v2396_v44  ;;  %v2756_v26 = vadd.f32 0.04247222, %v2755_v11  ;;  %vm10465_vm8 = vcmp.lt.f32.partialorder %v8386_v3, 0.0  ;;  %v8663_v36 = vmul.f32 %v8651_v10, %v8651_v10  ;;  %v5982_v35 = vpop.eup %5981 }
 0x314   :  { %v3161_v57 = vmul.f32 0.002785687, %v8643_v5  ;;  %v2937_v54 = vadd.f32 0.19993454, %v2936_v12  ;;  %v3203_v33 = vmin.f32 %v8512_v34, %v10767_v58  ;;  %vm3184_vm13 = vcmp.lt.s32.totalorder %v8386_v3, 0  ;;  %v10798_v34 = vld [vmem:[#allocation68_spill] sm:$0xff] }
 0x315   :  { %v2398_v13 = vmul.f32 %v2397_v40, %v8555_v17  ;;  %v2757_v53 = vmul.f32 %v2756_v26, %v8595_v22  ;;  %v2363_v37 = vsub.f32 1.5707964, %v2361_v9  ;;  %v2800_v44 = vmul.f32 0.002785687, %v8663_v36 }
 0x316   :  { %v3162_v45 = vadd.f32 -0.015866, %v3161_v57  ;;  %v2938_v63 = vmul.f32 %v2937_v54, %v8434_v15  ;;  %v8672_v11 = vmul.f32 %v5982_v35, %v3203_v33  ;;  %v10790_v62 = vand.u32 2147483648, %v10732_v48 }
 0x317   :  { %v2399_v12 = vadd.f32 0.1064488, %v2398_v13  ;;  %v2758_v21 = vadd.f32 -0.074975304, %v2757_v53  ;;  %v2801_v26 = vadd.f32 -0.015866, %v2800_v44  ;;  %vm2943_vm0 = vcmp.gt.f32.partialorder %v10691_v16, %v8143_v31 }
 0x318   :  { %10789 = vst [vmem:[#allocation61_spill] sm:$0xff] %v8672_v11  ;;  %v3163_v42 = vmul.f32 %v3162_v45, %v8643_v5  ;;  %v2918_v40 = vor.u32 %v10790_v62, %v2916_v1  ;;  %v2939_v27 = vadd.f32 -0.33333147, %v2938_v63  ;;  %v8679_v57 = vmul.f32 %v8672_v11, %v8672_v11 }
 0x319   :  { %vm3288_vm12 = vcmp.eq.s32.totalorder %v3266_v51, 1  ;;  %v2400_v54 = vmul.f32 %v2399_v12, %v8555_v17  ;;  %v2759_v33 = vmul.f32 %v2758_v21, %v8595_v22  ;;  %v8688_v13 = vsel %vm3184_vm13, 3.1415927, %v10590_v25 }
 0x31a   :  { %v3164_v35 = vadd.f32 0.04247222, %v3163_v42  ;;  %10791 = vst [vmem:[#allocation32_spill] sm:$0xff] %v8688_v13  ;;  %v2940_v62 = vmul.f32 %v2939_v27, %v8434_v15  ;;  %v8694_v1 = vsel %vm10465_vm8, 2.3561945, %v10575_v46  ;;  %v2802_v51 = vmul.f32 %v2801_v26, %v8663_v36  ;;  %v6024_v15 = vld [vmem:[%s10260_s1] sm:$0xff] }
 0x31b   :  { %10792 = vst [vmem:[#allocation53_spill] sm:$0xff] %v8694_v1  ;;  %v3208_v53 = vmul.f32 0.002785687, %v8679_v57  ;;  %vm2953_vm7 = vcmp.ne.f32.partialorder %v8122_v18, %v8122_v18  ;;  %v2401_v21 = vadd.f32 -0.14207031, %v2400_v54  ;;  %v3296_v27 = vsel %vm3288_vm12, %v6024_v15, %v2918_v40  ;;  %v10793_v54 = vld [vmem:[#allocation28_spill] sm:$0xff]  ;;  %v8716_v15 = vpop.permute.xlu1 %3268 }
 0x31c   :  { %v2760_v42 = vadd.f32 0.1064488, %v2759_v33  ;;  %v3165_v45 = vmul.f32 %v3164_v35, %v8643_v5  ;;  %v8707_v63 = vsel %vm2362_vm9, %v2363_v37, %v2361_v9  ;;  %v2941_v44 = vmul.f32 %v2940_v62, %v8408_v38  ;;  %v10794_v13 = vld [vmem:[#allocation47_spill] sm:$0xff] }
 0x31d   :  { %vm2959_vm1 = vcmp.eq.s32.totalorder %v8143_v31, inf  ;;  %v2803_v12 = vadd.f32 0.04247222, %v2802_v51  ;;  %v3209_v26 = vadd.f32 -0.015866, %v3208_v53  ;;  %vm2951_vm11 = vcmp.eq.f32.partialorder %v10793_v54, 0.0 }
 0x31e   :  { %vm2954_vm6 = vcmp.ne.f32.partialorder %v10793_v54, %v10793_v54  ;;  %v2402_v33 = vmul.f32 %v2401_v21, %v8555_v17  ;;  %v2761_v40 = vmul.f32 %v2760_v42, %v8595_v22  ;;  %v3166_v35 = vadd.f32 -0.074975304, %v3165_v45  ;;  %v10796_v45 = vld [vmem:[#allocation5_spill] sm:$0xff]  ;;  %v6025_v31 = vld [vmem:[%s10260_s1 + $0x10] sm:$0xff] }
 0x31f   :  { %v3010_v9 = vand.u32 2147483647, %v8655_v47  ;;  %v2942_v37 = vadd.f32 %v2941_v44, %v8408_v38  ;;  %vm2960_vm10 = vcmp.eq.s32.totalorder %v10691_v16, inf  ;;  %v2804_v62 = vmul.f32 %v2803_v12, %v8663_v36  ;;  %v10800_v12 = vld [vmem:[#allocation17_spill] sm:$0xff]  ;;  %vm2955_vm14 = vmor %vm2953_vm7, %vm2954_vm6 }
 0x320   :  { %v3210_v51 = vmul.f32 %v3209_v26, %v8679_v57  ;;  %v3328_v53 = vmul.f32 0.2, %v3296_v27  ;;  %v2403_v48 = vadd.f32 0.19993454, %v2402_v33  ;;  %v2762_v1 = vadd.f32 -0.14207031, %v2761_v40 }
 0x321   :  { %v3167_v21 = vmul.f32 %v3166_v35, %v8643_v5  ;;  %v10795_v42 = vand.u32 2147483647, %v10794_v13  ;;  %v10797_v11 = vand.u32 2147483648, %v10796_v45  ;;  %vm3053_vm4 = vcmp.eq.s32.totalorder %v10737_v32, inf  ;;  %v10806_v32 = vld [vmem:[#allocation12_spill] sm:$0xff] }
 0x322   :  { %v2944_v47 = vsub.f32 1.5707964, %v2942_v37  ;;  %v2805_v38 = vadd.f32 -0.074975304, %v2804_v62  ;;  %v3211_v44 = vadd.f32 0.04247222, %v3210_v51  ;;  %v2404_v27 = vmul.f32 %v2403_v48, %v8555_v17 }
 0x323   :  { %v2196_v58 = vor.u32 %v10797_v11, %v10795_v42  ;;  %v10799_v3 = vand.u32 2147483647, %v10798_v34  ;;  %v10801_v10 = vand.u32 2147483648, %v10800_v12  ;;  %v2763_v33 = vmul.f32 %v2762_v1, %v8595_v22 }
 0x324   :  { %v3168_v40 = vadd.f32 0.1064488, %v3167_v21  ;;  %v10802_v13 = vand.u32 2147483648, %v10746_v56  ;;  %vm3054_vm9 = vcmp.eq.s32.totalorder %v10738_v19, inf  ;;  %v2945_v11 = vsel %vm2943_vm0, %v2944_v47, %v2942_v37 }
 0x325   :  { %v2604_v26 = vor.u32 %v10801_v10, %v10799_v3  ;;  %v2806_v62 = vmul.f32 %v2805_v38, %v8663_v36  ;;  %vm2823_vm13 = vcmp.lt.s32.totalorder %v8425_v29, 0  ;;  %v3212_v3 = vmul.f32 %v3211_v44, %v8679_v57 }
 0x326   :  { %v3012_v35 = vor.u32 %v10802_v13, %v3010_v9  ;;  %v3336_v48 = vadd.f32 %v3328_v53, %v8634_v59  ;;  %v2947_v34 = vsub.f32 3.1415927, %v2945_v11  ;;  %v2405_v10 = vadd.f32 -0.33333147, %v2404_v27  ;;  %v3272_v9 = vpop.permute.xlu1 %3271 }
 0x327   :  { %v2764_v1 = vadd.f32 0.19993454, %v2763_v33  ;;  %v3169_v51 = vmul.f32 %v3168_v40, %v8643_v5  ;;  %vm3289_vm12 = vcmp.eq.s32.totalorder %v8716_v15, 1  ;;  %v2807_v21 = vadd.f32 0.1064488, %v2806_v62 }
 0x328   :  { %vm10467_vm8 = vcmp.lt.f32.partialorder %v8425_v29, 0.0  ;;  %v3213_v37 = vadd.f32 -0.074975304, %v3212_v3  ;;  %v3306_v42 = vmul.f32 0.5, %v2196_v58  ;;  %vm3290_vm0 = vcmp.eq.s32.totalorder %v3272_v9, 1 }
 0x329   :  { %v2948_v47 = vsel %vm2946_vm15, %v2947_v34, %v2945_v11  ;;  %v2406_v38 = vmul.f32 %v2405_v10, %v8555_v17  ;;  %v2765_v59 = vmul.f32 %v2764_v1, %v8595_v22  ;;  %v3170_v53 = vadd.f32 -0.14207031, %v3169_v51  ;;  %vm2961_vm15 = vmand %vm2959_vm1, %vm2960_vm10  ;;  %v10803_v51 = vld [vmem:[#allocation64_spill] sm:$0xff] }
 0x32a   :  { %v2952_v44 = vsel %vm2951_vm11, %v8527_v61, %v2948_v47  ;;  %v2808_v58 = vmul.f32 %v2807_v21, %v8663_v36  ;;  %v3214_v27 = vmul.f32 %v3213_v37, %v8679_v57  ;;  %v3344_v33 = vmul.f32 0.3, %v3336_v48 }
 0x32b   :  { %v2956_v17 = vsel %vm2955_vm14, nan, %v2952_v44  ;;  %v2407_v61 = vmul.f32 %v2406_v38, %v8529_v8  ;;  %vm2409_vm11 = vcmp.gt.f32.partialorder %v10724_v41, %v8291_v14  ;;  %v2766_v40 = vadd.f32 -0.33333147, %v2765_v59  ;;  %vm3055_vm14 = vmand %vm3053_vm4, %vm3054_vm9 }
 0x32c   :  { %v3171_v18 = vmul.f32 %v3170_v53, %v8643_v5  ;;  %v2962_v13 = vsel %vm2961_vm15, %v8543_v4, %v2956_v17  ;;  %vm2770_vm7 = vcmp.gt.f32.partialorder %v10741_v50, %v8354_v28  ;;  %v2809_v11 = vadd.f32 -0.14207031, %v2808_v58 }
 0x32d   :  { %v3215_v62 = vadd.f32 0.1064488, %v3214_v27  ;;  %v3298_v16 = vsel %vm3290_vm0, %v6025_v31, %v3012_v35  ;;  %v2408_v3 = vadd.f32 %v2407_v61, %v8529_v8  ;;  %v2767_v48 = vmul.f32 %v2766_v40, %v8595_v22 }
 0x32e   :  { %v3172_v34 = vadd.f32 0.19993454, %v3171_v18  ;;  %v2963_v10 = vand.u32 2147483647, %v2962_v13  ;;  %v2810_v1 = vmul.f32 %v2809_v11, %v8663_v36  ;;  %v8783_v21 = vadd.f32 %v3344_v33, %v10803_v51 }
 0x32f   :  { %v3216_v4 = vmul.f32 %v3215_v62, %v8679_v57  ;;  %v3314_v37 = vmul.f32 0.3, %v2604_v26  ;;  %v2768_v35 = vmul.f32 %v2767_v48, %v8574_v6  ;;  %v10804_v22 = vand.u32 2147483648, %v10793_v54 }
 0x330   :  { %v3173_v8 = vmul.f32 %v3172_v34, %v8643_v5  ;;  %v3330_v47 = vmul.f32 0.2, %v3298_v16  ;;  %v10805_v38 = vsel %vm8623_vm5, nan, %v8591_v55  ;;  %v2410_v26 = vsub.f32 1.5707964, %v2408_v3  ;;  %v10807_v16 = vld [vmem:[#allocation63_spill] sm:$0xff] }
 0x331   :  { %v2965_v9 = vor.u32 %v10804_v22, %v2963_v10  ;;  %v8798_v59 = vsel %vm3055_vm14, %v8449_v60, %v10805_v38  ;;  %v2811_v19 = vadd.f32 0.19993454, %v2810_v1  ;;  %v3217_v53 = vadd.f32 -0.14207031, %v3216_v4  ;;  %v10808_v34 = vld [vmem:[#allocation21_spill] sm:$0xff]  ;;  %v10809_v4 = vld [vmem:[#allocation46_spill] sm:$0xff] }
 0x332   :  { %vm2370_vm1 = vcmp.eq.f32.partialorder %v10806_v32, 0.0  ;;  %v2366_v44 = vsub.f32 3.1415927, %v8707_v63  ;;  %v2769_v58 = vadd.f32 %v2768_v35, %v8574_v6  ;;  %v3174_v27 = vadd.f32 -0.33333147, %v3173_v8  ;;  %v10811_v35 = vld [vmem:[#allocation19_spill] sm:$0xff] }
 0x333   :  { %v8806_v33 = vsel %vm2823_vm13, 3.1415927, %v10590_v25  ;;  %vm3178_vm5 = vcmp.gt.f32.partialorder %v10754_v52, %v8437_v49  ;;  %v2812_v60 = vmul.f32 %v2811_v19, %v8663_v36  ;;  %v3218_v55 = vmul.f32 %v3217_v53, %v8679_v57  ;;  %v10816_v19 = vld [vmem:[#allocation9_spill] sm:$0xff] }
 0x334   :  { %v3297_v6 = vsel %vm3289_vm12, %v6026_v7, %v2965_v9  ;;  %v3322_v17 = vadd.f32 %v3314_v37, %v3306_v42  ;;  %vm2372_vm6 = vcmp.ne.f32.partialorder %v10747_v2, %v10747_v2  ;;  %v2771_v61 = vsub.f32 1.5707964, %v2769_v58  ;;  %v10813_v9 = vld [vmem:[#allocation15_spill] sm:$0xff] }
 0x335   :  { %v3175_v40 = vmul.f32 %v3174_v27, %v8643_v5  ;;  %v8823_v18 = vsel %vm10467_vm8, 2.3561945, %v10575_v46  ;;  %v3363_v13 = vand.u32 2139095040, %v8783_v21  ;;  %vm2378_vm10 = vcmp.eq.s32.totalorder %v10787_v23, inf  ;;  %v10818_v27 = vld [vmem:[#allocation55_spill] sm:$0xff] }
 0x336   :  { %v2411_v15 = vsel %vm2409_vm11, %v2410_v26, %v2408_v3  ;;  %v2813_v42 = vadd.f32 -0.33333147, %v2812_v60  ;;  %v3219_v11 = vadd.f32 0.19993454, %v3218_v55  ;;  %v3338_v62 = vadd.f32 %v3330_v47, %v3322_v17  ;;  %v10814_v26 = vld [vmem:[#allocation52_spill] sm:$0xff]  ;;  %v10820_v17 = vld [vmem:[#allocation23_spill] sm:$0xff] }
 0x337   :  { %vm2373_vm4 = vcmp.ne.f32.partialorder %v10806_v32, %v10806_v32  ;;  %v2772_v5 = vsel %vm2770_vm7, %v2771_v61, %v2769_v58  ;;  %v3176_v31 = vmul.f32 %v3175_v40, %v8615_v30  ;;  %vm2817_vm13 = vcmp.gt.f32.partialorder %v10763_v24, %v8476_v0  ;;  %v10821_v61 = vld [vmem:[#allocation34_spill] sm:$0xff]  ;;  %v10822_v40 = vld [vmem:[#allocation43_spill] sm:$0xff] }
 0x338   :  { %vm3228_vm12 = vcmp.lt.f32.partialorder %v10807_v16, 0.0  ;;  %v3329_v3 = vmul.f32 0.2, %v3297_v6  ;;  %vm2379_vm0 = vcmp.eq.s32.totalorder %v10788_v39, inf  ;;  %v2367_v48 = vsel %vm2365_vm2, %v2366_v44, %v8707_v63  ;;  %v10819_v6 = vld [vmem:[#allocation72_spill] sm:$0xff]  ;;  %v10868_v23 = vld [vmem:[#allocation59_spill] sm:$0xff] }
 0x339   :  { %vm2778_vm15 = vcmp.eq.f32.partialorder %v10808_v34, 0.0  ;;  %v2814_v10 = vmul.f32 %v2813_v42, %v8663_v36  ;;  %v3220_v1 = vmul.f32 %v3219_v11, %v8679_v57  ;;  %v10810_v37 = vand.u32 2147483647, %v10809_v4  ;;  %v10824_v11 = vld [vmem:[#allocation48_spill] sm:$0xff] }
 0x33a   :  { %v10812_v8 = vand.u32 2147483648, %v10811_v35  ;;  %v2413_v63 = vsub.f32 3.1415927, %v2411_v15  ;;  %v3177_v47 = vadd.f32 %v3176_v31, %v8615_v30  ;;  %v3364_v38 = vshrl.u32 %v3363_v13, 23  ;;  %v10823_v13 = vld [vmem:[#allocation29_spill] sm:$0xff] }
 0x33b   :  { %v10815_v36 = vand.u32 2147483647, %v10814_v26  ;;  %v10817_v53 = vand.u32 2147483648, %v10816_v19  ;;  %v2774_v58 = vsub.f32 3.1415927, %v2772_v5  ;;  %v2815_v60 = vmul.f32 %v2814_v10, %v10818_v27  ;;  %v10828_v26 = vld [vmem:[#allocation65_spill] sm:$0xff] }
 0x33c   :  { %v2651_v22 = vor.u32 %v10812_v8, %v10810_v37  ;;  %v3221_v55 = vadd.f32 -0.33333147, %v3220_v1  ;;  %v3346_v7 = vmul.f32 0.3, %v3338_v62  ;;  %vm2787_vm2 = vcmp.eq.s32.totalorder %v10741_v50, inf  ;;  %v10825_v37 = vld [vmem:[#allocation6_spill] sm:$0xff] }
 0x33d   :  { %v2243_v44 = vor.u32 %v10817_v53, %v10815_v36  ;;  %v3179_v30 = vsub.f32 1.5707964, %v3177_v47  ;;  %vm3231_vm8 = vcmp.lt.s32.totalorder %v10807_v16, 0  ;;  %v3337_v42 = vadd.f32 %v3329_v3, %v10823_v13  ;;  %v10834_v13 = vld [vmem:[#allocation38_spill] sm:$0xff]  ;;  %v6027_v50 = vld [vmem:[%s10260_s1 + $0x18] sm:$0xff] }
 0x33e   :  { %v2371_v31 = vsel %vm2370_vm1, %v10824_v11, %v2367_v48  ;;  %v2816_v62 = vadd.f32 %v2815_v60, %v10818_v27  ;;  %v3222_v10 = vmul.f32 %v3221_v55, %v8679_v57  ;;  %v3315_v1 = vmul.f32 0.3, %v2651_v22  ;;  %v10827_v22 = vld [vmem:[#allocation61_spill] sm:$0xff]  ;;  %v10829_v27 = vld [vmem:[#allocation10_spill] sm:$0xff] }
 0x33f   :  { %v2414_v4 = vsel %vm2412_vm3, %v2413_v63, %v2411_v15  ;;  %vm3186_vm7 = vcmp.eq.f32.partialorder %v10825_v37, 0.0  ;;  %vm3189_vm14 = vcmp.ne.f32.partialorder %v10825_v37, %v10825_v37  ;;  %v3180_v3 = vsel %vm3178_vm5, %v3179_v30, %v3177_v47  ;;  %v10864_v30 = vld [vmem:[#allocation69_spill] sm:$0xff] }
 0x340   :  { %v5619_v48 = vadd.s32 4294967169, %v3364_v38  ;;  %v3307_v8 = vmul.f32 0.5, %v2243_v44  ;;  %vm10826_vm9 = vcmp.lt.f32.partialorder %v8301_v20, 0.0  ;;  %vm2834_vm11 = vcmp.eq.s32.totalorder %v10763_v24, inf }
 0x341   :  { %v2775_v57 = vsel %vm10826_vm9, %v2774_v58, %v2772_v5  ;;  %v2818_v15 = vsub.f32 1.5707964, %v2816_v62  ;;  %v3223_v63 = vmul.f32 %v3222_v10, %v10827_v22  ;;  %v8899_v36 = vadd.f32 %v3346_v7, %v10828_v26  ;;  %vm8911_vm9 = vmor %vm2372_vm6, %vm2373_vm4  ;;  %v3275_v7 = vpop.permute.xlu0 %3274 }
 0x342   :  { %v3182_v53 = vsub.f32 3.1415927, %v3180_v3  ;;  %vm3233_vm3 = vcmp.eq.f32.partialorder %v10829_v27, 0.0  ;;  %vm3236_vm5 = vcmp.ne.f32.partialorder %v10829_v27, %v10829_v27  ;;  %v3345_v47 = vmul.f32 0.3, %v3337_v42  ;;  %vm8931_vm6 = vmand %vm2378_vm10, %vm2379_vm0 }
 0x343   :  { %v3323_v38 = vadd.f32 %v3315_v1, %v3307_v8  ;;  %v3057_v44 = vand.u32 2147483647, %v8798_v59  ;;  %v2819_v58 = vsel %vm2817_vm13, %v2818_v15, %v2816_v62  ;;  %v3224_v60 = vadd.f32 %v3223_v63, %v10827_v22  ;;  %v10841_v62 = vld [vmem:[#allocation27_spill] sm:$0xff]  ;;  %v10849_v8 = vld [vmem:[#allocation66_spill] sm:$0xff] }
 0x344   :  { %v3232_v59 = vsel %vm3231_vm8, 3.1415927, %v10590_v25  ;;  %v3240_v55 = vsel %vm3228_vm12, 2.3561945, %v10575_v46  ;;  %v2375_v2 = vsel %vm8911_vm9, nan, %v2371_v31  ;;  %v2779_v25 = vsel %vm2778_vm15, %v10834_v13, %v2775_v57  ;;  %v10835_v46 = vld [vmem:[#allocation37_spill] sm:$0xff] }
 0x345   :  { %v2821_v42 = vsub.f32 3.1415927, %v2819_v58  ;;  %vm3291_vm13 = vcmp.eq.s32.totalorder %v3275_v7, 1  ;;  %vm10836_vm9 = vcmp.eq.f32.partialorder %v10813_v9, 0.0  ;;  %vm10837_vm10 = vcmp.ne.f32.partialorder %v10813_v9, %v10813_v9 }
 0x346   :  { %v8943_v39 = vsel %vm10836_vm9, %v10835_v46, %v2414_v4  ;;  %vm10838_vm0 = vcmp.ne.f32.partialorder %v8263_v43, %v8263_v43  ;;  %v3226_v11 = vsub.f32 1.5707964, %v3224_v60  ;;  %v8956_v31 = vadd.s32 1, %v5619_v48 }
 0x347   :  { %vm8951_vm4 = vmor %vm10838_vm0, %vm10837_vm10  ;;  %v10842_v10 = vand.u32 2147483648, %v10841_v62  ;;  %vm10843_vm8 = vcmp.ne.f32.partialorder %v10808_v34, %v10808_v34  ;;  %vm10844_vm1 = vcmp.ne.f32.partialorder %v8301_v20, %v8301_v20  ;;  %vm10847_vm0 = vcmp.lt.f32.partialorder %v10819_v6, 0.0 }
 0x348   :  { %vm8967_vm10 = vmor %vm10844_vm1, %vm10843_vm8  ;;  %v3183_v4 = vsel %vm10847_vm0, %v3182_v53, %v3180_v3  ;;  %vm10848_vm15 = vcmp.lt.f32.partialorder %v8425_v29, 0.0  ;;  %v8976_v57 = vadd.f32 %v3345_v47, %v10849_v8  ;;  %v3569_v15 = vand.u32 2139095040, %v8899_v36  ;;  %v10855_v53 = vld [vmem:[#allocation31_spill] sm:$0xff] }
 0x349   :  { %v3059_v1 = vor.u32 %v10842_v10, %v3057_v44  ;;  %v2822_v48 = vsel %vm10848_vm15, %v2821_v42, %v2819_v58  ;;  %v2783_v22 = vsel %vm8967_vm10, nan, %v2779_v25  ;;  %vm10850_vm1 = vcmp.eq.s32.totalorder %v8354_v28, inf  ;;  %v10866_v25 = vld [vmem:[#allocation14_spill] sm:$0xff] }
 0x34a   :  { %vm8985_vm8 = vmand %vm10850_vm1, %vm2787_vm2  ;;  %vm3195_vm0 = vcmp.eq.s32.totalorder %v10754_v52, inf  ;;  %vm10853_vm15 = vcmp.eq.f32.partialorder %v10820_v17, 0.0  ;;  %vm10854_vm9 = vcmp.gt.f32.partialorder %v10822_v40, %v10821_v61  ;;  %v9003_v47 = vsel %vm8931_vm6, %v10855_v53, %v2375_v2  ;;  %v10879_v53 = vld [vmem:[#allocation8_spill] sm:$0xff] }
 0x34b   :  { %v2826_v3 = vsel %vm10853_vm15, %v8806_v33, %v2822_v48  ;;  %v3227_v63 = vsel %vm10854_vm9, %v3226_v11, %v3224_v60  ;;  %v3299_v28 = vsel %vm3291_vm13, %v6027_v50, %v3059_v1  ;;  %vm10856_vm2 = vcmp.ne.f32.partialorder %v10820_v17, %v10820_v17  ;;  %v10860_v60 = vld [vmem:[#allocation32_spill] sm:$0xff] }
 0x34c   :  { %vm10857_vm10 = vcmp.ne.f32.partialorder %v8425_v29, %v8425_v29  ;;  %v3229_v44 = vsub.f32 3.1415927, %v3227_v63  ;;  %vm3241_vm9 = vcmp.eq.s32.totalorder %v10821_v61, inf  ;;  %v3331_v5 = vmul.f32 0.2, %v3299_v28  ;;  %v3281_v28 = vpop.permute.xlu0 %3280 }
 0x34d   :  { %vm9011_vm1 = vmor %vm10857_vm10, %vm10856_vm2  ;;  %v2422_v58 = vsel %vm8951_vm4, nan, %v8943_v39  ;;  %v3187_v7 = vsel %vm3186_vm7, %v10860_v60, %v3183_v4  ;;  %vm10861_vm6 = vcmp.ne.f32.partialorder %v10819_v6, %v10819_v6  ;;  %v10865_v13 = vand.u32 2147483647, %v10864_v30  ;;  %v3278_v39 = vpop.permute.xlu1 %3277  ;;  %v10873_v4 = vld [vmem:[#allocation70_spill] sm:$0xff] }
 0x34e   :  { %vm9028_vm13 = vmor %vm10861_vm6, %vm3189_vm14  ;;  %v2830_v2 = vsel %vm9011_vm1, nan, %v2826_v3  ;;  %v10867_v42 = vand.u32 2147483648, %v10866_v25  ;;  %v9041_v11 = vsel %vm8985_vm8, %v10868_v23, %v2783_v22  ;;  %vm10869_vm7 = vcmp.eq.s32.totalorder %v8476_v0, inf  ;;  %v10875_v22 = vld [vmem:[#allocation22_spill] sm:$0xff]  ;;  %v10877_v3 = vld [vmem:[#allocation49_spill] sm:$0xff] }
 0x34f   :  { %vm2835_vm14 = vmand %vm10869_vm7, %vm2834_vm11  ;;  %v3230_v6 = vsel %vm3228_vm12, %v3229_v44, %v3227_v63  ;;  %v3466_v10 = vand.u32 2139095040, %v8976_v57  ;;  %v3570_v1 = vshrl.u32 %v3569_v15, 23  ;;  %vm10870_vm4 = vcmp.ne.f32.partialorder %v10807_v16, %v10807_v16  ;;  %v10887_v23 = vld [vmem:[#allocation24_spill] sm:$0xff] }
 0x350   :  { %v2290_v46 = vor.u32 %v10867_v42, %v10865_v13  ;;  %v3234_v43 = vsel %vm3233_vm3, %v3232_v59, %v3230_v6  ;;  %vm9058_vm8 = vmor %vm10870_vm4, %vm3236_vm5  ;;  %vm3371_vm11 = vcmp.gt.s32.totalorder %v8956_v31, 0  ;;  %v3339_v0 = vadd.f32 %v3331_v5, %v3323_v38  ;;  %v10885_v42 = vld [vmem:[#allocation60_spill] sm:$0xff] }
 0x351   :  { %v10874_v48 = vand.u32 2147483647, %v10873_v4  ;;  %v10876_v15 = vand.u32 2147483648, %v10875_v22  ;;  %v3104_v59 = vand.u32 2147483647, %v10877_v3  ;;  %v3191_v63 = vsel %vm9028_vm13, nan, %v3187_v7 }
 0x352   :  { %v2836_v50 = vsel %vm2835_vm14, %v8823_v18, %v2830_v2  ;;  %v3238_v16 = vsel %vm9058_vm8, nan, %v3234_v43  ;;  %vm3292_vm12 = vcmp.eq.s32.totalorder %v3278_v39, 1  ;;  %vm10878_vm3 = vcmp.eq.s32.totalorder %v10822_v40, inf  ;;  %v10881_v7 = vld [vmem:[#allocation56_spill] sm:$0xff]  ;;  %v10889_v43 = vld [vmem:[#allocation30_spill] sm:$0xff] }
 0x353   :  { %v2698_v20 = vor.u32 %v10876_v15, %v10874_v48  ;;  %vm3243_vm5 = vmand %vm3241_vm9, %vm10878_vm3  ;;  %v3347_v38 = vmul.f32 0.3, %v3339_v0  ;;  %v10880_v33 = vand.u32 2147483648, %v10879_v53  ;;  %v3308_v5 = vmul.f32 0.5, %v2290_v46  ;;  %v10883_v18 = vld [vmem:[#allocation16_spill] sm:$0xff]  ;;  %v10892_v46 = vld [vmem:[#allocation67_spill] sm:$0xff] }
 0x354   :  { %v3244_v29 = vsel %vm3243_vm5, %v3240_v55, %v3238_v16  ;;  %v10882_v30 = vand.u32 2147483647, %v10881_v7  ;;  %v10884_v2 = vand.u32 2147483648, %v10883_v18  ;;  %v10886_v39 = vand.u32 2147483647, %v10885_v42  ;;  %v6028_v0 = vld [vmem:[%s10260_s1 + $0x20] sm:$0xff] }
 0x355   :  { %v3106_v44 = vor.u32 %v10880_v33, %v3104_v59  ;;  %v3316_v60 = vmul.f32 0.3, %v2698_v20  ;;  %v10888_v6 = vand.u32 2147483648, %v10887_v23  ;;  %v3151_v61 = vand.u32 2147483647, %v10889_v43  ;;  %v10896_v59 = vld [vmem:[#allocation35_spill] sm:$0xff] }
 0x356   :  { %v2337_v13 = vor.u32 %v10884_v2, %v10882_v30  ;;  %vm10890_vm15 = vcmp.eq.s32.totalorder %v10724_v41, inf  ;;  %vm10891_vm2 = vcmp.eq.s32.totalorder %v8291_v14, inf  ;;  %v9093_v24 = vadd.f32 %v3347_v38, %v10892_v46  ;;  %v10894_v41 = vld [vmem:[#allocation13_spill] sm:$0xff] }
 0x357   :  { %v2745_v40 = vor.u32 %v10888_v6, %v10886_v39  ;;  %vm2427_vm10 = vmand %vm10891_vm2, %vm10890_vm15  ;;  %v3324_v55 = vadd.f32 %v3316_v60, %v3308_v5  ;;  %v3300_v4 = vsel %vm3292_vm12, %v6028_v0, %v3106_v44  ;;  %vm3293_vm1 = vcmp.eq.s32.totalorder %v3281_v28, 1  ;;  %v10897_v38 = vld [vmem:[#allocation53_spill] sm:$0xff] }
 0x358   :  { %vm10893_vm9 = vcmp.eq.s32.totalorder %v8437_v49, inf  ;;  %v3332_v48 = vmul.f32 0.2, %v3300_v4  ;;  %v10895_v15 = vand.u32 2147483648, %v10894_v41  ;;  %v3309_v20 = vmul.f32 0.5, %v2337_v13  ;;  %v6029_v49 = vld [vmem:[%s10260_s1 + $0x28] sm:$0xff] }
 0x359   :  { %vm3196_vm6 = vmand %vm10893_vm9, %vm3195_vm0  ;;  %v3317_v3 = vmul.f32 0.3, %v2745_v40  ;;  %v2428_v16 = vsel %vm2427_vm10, %v10896_v59, %v2422_v58  ;;  %v2837_v5 = vand.u32 2147483647, %v2836_v50  ;;  %v3245_v60 = vand.u32 2147483647, %v3244_v29  ;;  %v3287_v40 = vpop.permute.xlu0 %3286 }
 0x35a   :  { %v3153_v14 = vor.u32 %v10895_v15, %v3151_v61  ;;  %v3197_v33 = vsel %vm3196_vm6, %v10897_v38, %v3191_v63  ;;  %v3672_v44 = vand.u32 2139095040, %v9093_v24  ;;  %v3340_v28 = vadd.f32 %v3332_v48, %v3324_v55  ;;  %v3284_v15 = vpop.permute.xlu1 %3283 }
 0x35b   :  { %v3325_v7 = vadd.f32 %v3317_v3, %v3309_v20  ;;  %v2790_v30 = vand.u32 2147483647, %v9041_v11  ;;  %v3467_v2 = vshrl.u32 %v3466_v10, 23  ;;  %v5627_v13 = vadd.s32 4294967169, %v3570_v1 }
 0x35c   :  { %v3301_v52 = vsel %vm3293_vm1, %v6029_v49, %v3153_v14  ;;  %v2429_v39 = vand.u32 2147483647, %v2428_v16  ;;  %v2430_v58 = vand.u32 2147483648, %v10813_v9  ;;  %v2838_v63 = vand.u32 2147483648, %v10820_v17 }
 0x35d   :  { %v3333_v42 = vmul.f32 0.2, %v3301_v52  ;;  %v3198_v50 = vand.u32 2147483647, %v3197_v33  ;;  %v2382_v29 = vand.u32 2147483647, %v9003_v47 }
 0x35e   :  { %v10898_v43 = vand.u32 2147483648, %v10829_v27  ;;  %v2791_v55 = vand.u32 2147483648, %v10808_v34  ;;  %v3372_v11 = vsel %vm3371_vm11, %v8956_v31, 0  ;;  %v3673_v10 = vshrl.u32 %v3672_v44, 23  ;;  %v6030_v33 = vld [vmem:[%s10260_s1 + $0x38] sm:$0xff] }
 0x35f   :  { %v3341_v6 = vadd.f32 %v3333_v42, %v3325_v7  ;;  %v2839_v1 = vor.u32 %v2838_v63, %v2837_v5  ;;  %v10899_v4 = vand.u32 2147483648, %v10825_v37  ;;  %v5623_v14 = vadd.s32 4294967169, %v3467_v2 }
 0x360   :  { %v3247_v61 = vor.u32 %v10898_v43, %v3245_v60  ;;  %v3576_v20 = vadd.s32 1, %v5627_v13  ;;  %v3348_v47 = vmul.f32 0.3, %v3340_v28  ;;  %v2792_v3 = vor.u32 %v2791_v55, %v2790_v30  ;;  %v6031_v28 = vld [vmem:[%s10260_s1 + $0x30] sm:$0xff] }
 0x361   :  { %v3200_v48 = vor.u32 %v10899_v4, %v3198_v50  ;;  %v9122_v59 = vmul.f32 0.7, %v6028_v0  ;;  %v2431_v16 = vor.u32 %v2430_v58, %v2429_v39  ;;  %vm3295_vm0 = vcmp.eq.s32.totalorder %v3287_v40, 1 }
 0x362   :  { %v3374_v38 = vand.u32 31, %v3372_v11  ;;  %v3303_v31 = vsel %vm3295_vm0, %v6030_v33, %v3247_v61  ;;  %v10901_v5 = vand.u32 2147483648, %v10806_v32  ;;  %vm3294_vm13 = vcmp.eq.s32.totalorder %v3284_v15, 1 }
 0x363   :  { %10900 = vst [vmem:[#allocation58_spill] sm:$0xff] %v9122_v59  ;;  %v5631_v44 = vadd.s32 4294967169, %v3673_v10  ;;  %v3319_v7 = vmul.f32 0.3, %v2839_v1  ;;  %v3302_v0 = vsel %vm3294_vm13, %v6031_v28, %v3200_v48  ;;  %v3473_v52 = vadd.s32 1, %v5623_v14 }
 0x364   :  { %v2384_v60 = vor.u32 %v10901_v5, %v2382_v29  ;;  %vm3577_vm7 = vcmp.gt.s32.totalorder %v3576_v20, 0  ;;  %v9133_v30 = vadd.f32 %v3348_v47, %v9122_v59  ;;  %v3318_v2 = vmul.f32 0.3, %v2792_v3 }
 0x365   :  { %v3311_v13 = vmul.f32 0.5, %v2431_v16  ;;  %v3335_v42 = vmul.f32 0.2, %v3303_v31  ;;  %v3375_v39 = vsub.s32 32, %v3374_v38  ;;  %v3334_v63 = vmul.f32 0.2, %v3302_v0 }
 0x366   :  { %v3310_v58 = vmul.f32 0.5, %v2384_v60  ;;  %v3578_v50 = vsel %vm3577_vm7, %v3576_v20, 0  ;;  %v3679_v29 = vadd.s32 1, %v5631_v44  ;;  %vm3474_vm14 = vcmp.gt.s32.totalorder %v3473_v52, 0 }
 0x367   :  { %v3327_v40 = vadd.f32 %v3319_v7, %v3311_v13  ;;  %v3775_v43 = vand.u32 2139095040, %v9133_v30  ;;  %v3349_v61 = vmul.f32 0.3, %v3341_v6  ;;  %v9136_v10 = vmul.f32 0.7, %v6029_v49 }
 0x368   :  { %v3326_v55 = vadd.f32 %v3318_v2, %v3310_v58  ;;  %v9138_v1 = vmul.f32 0.7, %v6030_v33  ;;  %v9140_v48 = vmul.f32 0.7, %v6031_v28  ;;  %v9142_v15 = vshrl.u32 %v3372_v11, 5 }
 0x369   :  { %10902 = vst [vmem:[#allocation71_spill] sm:$0xff] %v9136_v10  ;;  %v3343_v4 = vadd.f32 %v3335_v42, %v3327_v40  ;;  %v10472_v47 = vand.u32 2147483647, %v8783_v21  ;;  %v10905_v20 = vmov 2475754826   ;;  %v9146_v16 = vsel %vm3474_vm14, %v3473_v52, 0 }
 0x36a   :  { %10903 = vst [vmem:[#allocation40_spill] sm:$0xff] %v9138_v1  ;;  %10904 = vst [vmem:[#allocation45_spill] sm:$0xff] %v9140_v48  ;;  %v3342_v14 = vadd.f32 %v3334_v63, %v3326_v55  ;;  %v3378_v3 = vshrl.u32 %v10905_v20, %v3375_v39  ;;  %v9148_v31 = vand.u32 31, %v3578_v50  ;;  %vm3680_vm4 = vcmp.gt.s32.totalorder %v3679_v29, 0 }
 0x36b   :  { %v10906_v6 = vmov 2131351028   ;;  %v3776_v5 = vshrl.u32 %v3775_v43, 23  ;;  %v9152_v33 = vadd.f32 %v3349_v61, %v9136_v10  ;;  %v10907_v60 = vmov 683565275  }
 0x36c   :  { %v3381_v49 = vshrl.u32 %v10906_v6, %v3375_v39  ;;  %v3377_v44 = vshll.u32 %v10907_v60, %v3374_v38  ;;  %v10908_v11 = vmov 2102212464   ;;  %v3351_v28 = vmul.f32 0.3, %v3343_v4 }
 0x36d   :  { %v3384_v7 = vshrl.u32 %v10908_v11, %v3375_v39  ;;  %v3380_v0 = vshll.u32 %v10905_v20, %v3374_v38  ;;  %v3383_v2 = vshll.u32 %v10906_v6, %v3374_v38  ;;  %v10909_v52 = vmov 920167782  }
 0x36e   :  { %v3387_v13 = vshrl.u32 %v10909_v52, %v3375_v39  ;;  %v3350_v42 = vmul.f32 0.3, %v3342_v14  ;;  %v3367_v58 = vand.u32 8388607, %v10472_v47  ;;  %v3379_v63 = vor.u32 %v3378_v3, %v3377_v44 }
 0x36f   :  { %v3386_v40 = vshll.u32 %v10908_v11, %v3374_v38  ;;  %v3382_v43 = vor.u32 %v3381_v49, %v3380_v0  ;;  %v3385_v61 = vor.u32 %v3384_v7, %v3383_v2  ;;  %v3389_v55 = vshll.u32 %v10909_v52, %v3374_v38 }
 0x370   :  { %v10910_v27 = vmov 1326507024   ;;  %v9164_v4 = vshrl.u32 %v3578_v50, 5  ;;  %v3581_v17 = vsub.s32 32, %v9148_v31  ;;  %v3878_v10 = vand.u32 2139095040, %v9152_v33 }
 0x371   :  { %v3390_v9 = vshrl.u32 %v10910_v27, %v3375_v39  ;;  %v3388_v41 = vor.u32 %v3387_v13, %v3386_v40  ;;  %v9169_v14 = vand.u32 31, %v9146_v16  ;;  %v9172_v3 = vsel %vm3680_vm4, %v3679_v29, 0 }
 0x372   :  { %v5635_v44 = vadd.s32 4294967169, %v3776_v5  ;;  %v9175_v7 = vadd.f32 %v3351_v28, %v9138_v1  ;;  %v3368_v38 = vor.u32 8388608, %v3367_v58  ;;  %vm3392_vm8 = vcmp.lt.s32.totalorder %v9142_v15, 1 }
 0x373   :  { %v3391_v49 = vor.u32 %v3390_v9, %v3389_v55  ;;  %vm3395_vm11 = vcmp.lt.s32.totalorder %v9142_v15, 4  ;;  %v9180_v50 = vadd.f32 %v3350_v42, %v9140_v48  ;;  %v3376_v0 = vshrl.u32 %v10907_v60, %v3375_v39 }
 0x374   :  { %v3397_v2 = vsel %vm3395_vm11, %v3385_v61, 2102212464  ;;  %v3400_v13 = vsel %vm3392_vm8, %v3379_v63, %v3382_v43  ;;  %v3879_v40 = vshrl.u32 %v3878_v10, 23  ;;  %vm3393_vm12 = vcmp.lt.s32.totalorder %v9142_v15, 2 }
 0x375   :  { %vm3394_vm3 = vcmp.lt.s32.totalorder %v9142_v15, 3  ;;  %v3401_v9 = vsel %vm3395_vm11, %v3388_v41, 920167782  ;;  %v3396_v29 = vsel %vm3392_vm8, %v3376_v0, %v3379_v63  ;;  %v3404_v28 = vsel %vm3392_vm8, %v3382_v43, %v3385_v61 }
 0x376   :  { %v3402_v5 = vsel %vm3394_vm3, %v3385_v61, %v3401_v9  ;;  %v3405_v58 = vsel %vm3395_vm11, %v3391_v49, 1326507024  ;;  %v3398_v55 = vsel %vm3394_vm3, %v3382_v43, %v3397_v2  ;;  %v3408_v1 = vshll.u32 %v3368_v38, 8 }
 0x377   :  { %v3403_v47 = vsel %vm3393_vm12, %v3400_v13, %v3402_v5  ;;  %v3406_v42 = vsel %vm3394_vm3, %v3388_v41, %v3405_v58  ;;  %v3782_v18 = vadd.s32 1, %v5635_v44  ;;  %v3981_v39 = vand.u32 2139095040, %v9180_v50 }
 0x378   :  { %v3407_v10 = vsel %vm3393_vm12, %v3404_v28, %v3406_v42  ;;  %v10476_v23 = vand.u32 2147483647, %v8899_v36  ;;  %v9194_v63 = vmul.u32.u64.low %v3408_v1, %v3403_v47  ;;  %v9195_v61 = vmul.u32.u64.high %v3408_v1, %v3403_v47, %v9194_v63 }
 0x379   :  { %v9191_v48 = vmul.u32.u64.low %v3408_v1, %v3407_v10  ;;  %v9192_v37 = vmul.u32.u64.high %v3408_v1, %v3407_v10, %v9191_v48  ;;  %v9199_v43 = vand.u32 31, %v9172_v3  ;;  %v5639_v41 = vadd.s32 4294967169, %v3879_v40 }
 0x37a   :  { %v4084_v44 = vand.u32 2139095040, %v9175_v7  ;;  %v3399_v49 = vsel %vm3393_vm12, %v3396_v29, %v3398_v55  ;;  %v3573_v38 = vand.u32 8388607, %v10476_v23  ;;  %v3583_v0 = vshll.u32 %v10907_v60, %v9148_v31 }
 0x37b   :  { %v3584_v48 = vshrl.u32 %v10905_v20, %v3581_v17  ;;  %v3587_v47 = vshrl.u32 %v10906_v6, %v3581_v17  ;;  %vm3783_vm5 = vcmp.gt.s32.totalorder %v3782_v18, 0  ;;  %v3982_v2 = vshrl.u32 %v3981_v39, 23 }
 0x37c   :  { %v3586_v13 = vshll.u32 %v10905_v20, %v9148_v31  ;;  %v3589_v40 = vshll.u32 %v10906_v6, %v9148_v31  ;;  %v3590_v15 = vshrl.u32 %v10908_v11, %v3581_v17  ;;  %v3415_v9 = vmul.u32 %v3408_v1, %v3399_v49 }
 0x37d   :  { %vm3417_vm15 = vc.u32 %v9192_v37, %v9194_v63  ;;  %v3418_v29 = vadd.s32 1, %v9195_v61  ;;  %v3585_v5 = vor.u32 %v3584_v48, %v3583_v0  ;;  %v3592_v55 = vshll.u32 %v10908_v11, %v9148_v31 }
 0x37e   :  { %v3588_v28 = vor.u32 %v3587_v47, %v3586_v13  ;;  %v3591_v58 = vor.u32 %v3590_v15, %v3589_v40  ;;  %v3593_v42 = vshrl.u32 %v10909_v52, %v3581_v17  ;;  %v3574_v10 = vor.u32 8388608, %v3573_v38 }
 0x37f   :  { %v3419_v39 = vsel %vm3417_vm15, %v3418_v29, %v9195_v61  ;;  %v3595_v23 = vshll.u32 %v10909_v52, %v9148_v31  ;;  %v3596_v1 = vshrl.u32 %v10910_v27, %v3581_v17  ;;  %v3582_v32 = vshrl.u32 %v10907_v60, %v3581_v17 }
 0x380   :  { %v3420_v49 = vadd.s32 %v3419_v39, %v3415_v9  ;;  %v3594_v34 = vor.u32 %v3593_v42, %v3592_v55  ;;  %vm3598_vm2 = vcmp.lt.s32.totalorder %v9164_v4, 1  ;;  %vm3600_vm10 = vcmp.lt.s32.totalorder %v9164_v4, 3 }
 0x381   :  { %v3597_v0 = vor.u32 %v3596_v1, %v3595_v23  ;;  %vm3601_vm1 = vcmp.lt.s32.totalorder %v9164_v4, 4  ;;  %v3606_v48 = vsel %vm3598_vm2, %v3585_v5, %v3588_v28  ;;  %v3610_v13 = vsel %vm3598_vm2, %v3588_v28, %v3591_v58 }
 0x382   :  { %v3421_v47 = vadd.s32 536870912, %v3420_v49  ;;  %v3603_v61 = vsel %vm3601_vm1, %v3591_v58, 2102212464  ;;  %v3607_v38 = vsel %vm3601_vm1, %v3594_v34, 920167782  ;;  %vm3599_vm9 = vcmp.lt.s32.totalorder %v9164_v4, 2 }
 0x383   :  { %v3608_v31 = vsel %vm3600_vm10, %v3591_v58, %v3607_v38  ;;  %v3611_v40 = vsel %vm3601_vm1, %v3597_v0, 1326507024  ;;  %v3614_v15 = vshll.u32 %v3574_v10, 8  ;;  %v3602_v17 = vsel %vm3598_vm2, %v3582_v32, %v3585_v5 }
 0x384   :  { %v3422_v9 = vshrl.u32 %v3421_v47, 30  ;;  %v3609_v29 = vsel %vm3599_vm9, %v3606_v48, %v3608_v31  ;;  %v3612_v23 = vsel %vm3600_vm10, %v3594_v34, %v3611_v40  ;;  %v3604_v55 = vsel %vm3600_vm10, %v3588_v28, %v3603_v61 }
 0x385   :  { %v3613_v42 = vsel %vm3599_vm9, %v3610_v13, %v3612_v23  ;;  %v9234_v39 = vmul.u32.u64.low %v3614_v15, %v3609_v29  ;;  %v9235_v1 = vmul.u32.u64.high %v3614_v15, %v3609_v29, %v9234_v39  ;;  %v9242_v58 = vshrl.u32 %v9146_v16, 5 }
 0x386   :  { %v3423_v46 = vshll.u32 %v3422_v9, 30  ;;  %v9238_v62 = vmul.u32.u64.low %v3614_v15, %v3613_v42  ;;  %v9239_v19 = vmul.u32.u64.high %v3614_v15, %v3613_v42, %v9238_v62  ;;  %v3784_v32 = vsel %vm3783_vm5, %v3782_v18, 0 }
 0x387   :  { %v4085_v5 = vshrl.u32 %v4084_v44, 23  ;;  %v5643_v10 = vadd.s32 4294967169, %v3982_v2  ;;  %v3478_v34 = vsub.s32 32, %v9169_v14  ;;  %v9247_v28 = vshrl.u32 %v9172_v3, 5 }
 0x388   :  { %v9249_v0 = vsub.s32 %v3420_v49, %v3423_v46  ;;  %v3605_v48 = vsel %vm3599_vm9, %v3602_v17, %v3604_v55  ;;  %v9254_v47 = vsub.s32 32, %v9199_v43  ;;  %v9256_v62 = vadd.s32 1, %v5639_v41 }
 0x389   :  { %vm3362_vm6 = vcmp.lt.s32.totalorder %v8783_v21, 0  ;;  %v3624_v18 = vadd.s32 1, %v9235_v1  ;;  %v10479_v16 = vand.u32 2147483647, %v8976_v57  ;;  %v9261_v44 = vshrl.u32 %v3784_v32, 5 }
 0x38a   :  { %v9263_v3 = vand.u32 31, %v3784_v32  ;;  %v3426_v46 = vsub.s32 0, %v9249_v0  ;;  %vm3623_vm0 = vc.u32 %v9239_v19, %v9234_v39  ;;  %v9268_v4 = vadd.s32 4294967169, %v4085_v5 }
 0x38b   :  { %v9270_v2 = vadd.s32 1, %v5643_v10  ;;  %v3621_v41 = vmul.u32 %v3614_v15, %v3605_v48  ;;  %v3625_v49 = vsel %vm3623_vm0, %v3624_v18, %v9235_v1  ;;  %v3416_v61 = vadd.s32 %v9194_v63, %v9192_v37 }
 0x38c   :  { %v5620_v38 = vmin.u32 %v3426_v46, %v9249_v0  ;;  %v3446_v13 = vsub.s32 4, %v3422_v9  ;;  %v3481_v31 = vshrl.u32 %v10905_v20, %v3478_v34  ;;  %v3470_v17 = vand.u32 8388607, %v10479_v16 }
 0x38d   :  { %v3626_v40 = vadd.s32 %v3625_v49, %v3621_v41  ;;  %v3484_v29 = vshrl.u32 %v10906_v6, %v3478_v34  ;;  %v3487_v23 = vshrl.u32 %v10908_v11, %v3478_v34  ;;  %v3486_v15 = vshll.u32 %v10906_v6, %v9169_v14 }
 0x38e   :  { %v3428_v55 = vclz %v5620_v38  ;;  %v3489_v37 = vshll.u32 %v10908_v11, %v9169_v14  ;;  %v3490_v63 = vshrl.u32 %v10909_v52, %v3478_v34  ;;  %v3480_v1 = vshll.u32 %v10907_v60, %v9169_v14 }
 0x38f   :  { %v3627_v42 = vadd.s32 536870912, %v3626_v40  ;;  %v3483_v32 = vshll.u32 %v10905_v20, %v9169_v14  ;;  %v3493_v5 = vshrl.u32 %v10910_v27, %v3478_v34  ;;  %v3479_v48 = vshrl.u32 %v10907_v60, %v3478_v34 }
 0x390   :  { %v5621_v10 = vadd.s32 4294967294, %v3428_v55  ;;  %v3488_v18 = vor.u32 %v3487_v23, %v3486_v15  ;;  %v3491_v46 = vor.u32 %v3490_v63, %v3489_v37  ;;  %v10911_v41 = vand.u32 2147483647, %v8783_v21 }
 0x391   :  { %v9298_v38 = vshrl.u32 %v3627_v42, 30  ;;  %v3482_v16 = vor.u32 %v3481_v31, %v3480_v1  ;;  %v3485_v35 = vor.u32 %v3484_v29, %v3483_v32  ;;  %v3492_v59 = vshll.u32 %v10909_v52, %v9169_v14 }
 0x392   :  { %vm9294_vm13 = vcmp.le.f32.partialorder %v10911_v41, 0.7853982  ;;  %vm3886_vm7 = vcmp.gt.s32.totalorder %v9256_v62, 0  ;;  %vm5622_vm14 = vcmp.lt.s32.totalorder %v5621_v10, 0  ;;  %v3447_v34 = vsel %vm3362_vm6, %v3446_v13, %v3422_v9 }
 0x393   :  { %v3471_v23 = vor.u32 8388608, %v3470_v17  ;;  %vm3498_vm4 = vcmp.lt.s32.totalorder %v9242_v58, 4  ;;  %v3431_v55 = vsel %vm5622_vm14, 0, %v5621_v10  ;;  %v3629_v15 = vshll.u32 %v9298_v38, 30 }
 0x394   :  { %v3494_v37 = vor.u32 %v3493_v5, %v3492_v59  ;;  %v3504_v31 = vsel %vm3498_vm4, %v3491_v46, 920167782  ;;  %v3432_v29 = vsub.s32 32, %v3431_v55  ;;  %v3436_v63 = vsub.s32 4294967266, %v3431_v55 }
 0x395   :  { %vm3495_vm8 = vcmp.lt.s32.totalorder %v9242_v58, 1  ;;  %v3500_v14 = vsel %vm3498_vm4, %v3488_v18, 2102212464  ;;  %v9312_v42 = vsub.s32 %v3626_v40, %v3629_v15  ;;  %vm3497_vm11 = vcmp.lt.s32.totalorder %v9242_v58, 3 }
 0x396   :  { %v3499_v9 = vsel %vm3495_vm8, %v3479_v48, %v3482_v16  ;;  %v3503_v13 = vsel %vm3495_vm8, %v3482_v16, %v3485_v35  ;;  %v3433_v17 = vshll.u32 %v9249_v0, %v3431_v55  ;;  %v3434_v1 = vshrl.u32 %v3416_v61, %v3432_v29 }
 0x397   :  { %v3437_v59 = vadd.s32 127, %v3436_v63  ;;  %v3505_v32 = vsel %vm3497_vm11, %v3488_v18, %v3504_v31  ;;  %v3632_v5 = vsub.s32 0, %v9312_v42  ;;  %v3501_v10 = vsel %vm3497_vm11, %v3485_v35, %v3500_v14 }
 0x398   :  { %v3507_v41 = vsel %vm3495_vm8, %v3485_v35, %v3488_v18  ;;  %v3508_v8 = vsel %vm3498_vm4, %v3494_v37, 1326507024  ;;  %v3435_v53 = vor.u32 %v3434_v1, %v3433_v17  ;;  %vm3496_vm12 = vcmp.lt.s32.totalorder %v9242_v58, 2 }
 0x399   :  { %v3438_v25 = vshll.u32 %v3437_v59, 23  ;;  %v3509_v40 = vsel %vm3497_vm11, %v3491_v46, %v3508_v8  ;;  %vm3989_vm3 = vcmp.gt.s32.totalorder %v9270_v2, 0  ;;  %v5628_v16 = vmin.u32 %v3632_v5, %v9312_v42 }
 0x39a   :  { %v3506_v0 = vsel %vm3496_vm12, %v3503_v13, %v3505_v32  ;;  %v3511_v61 = vshll.u32 %v3471_v23, 8  ;;  %v9324_v55 = vsel %vm9294_vm13, 0, %v3447_v34  ;;  %v3502_v35 = vsel %vm3496_vm12, %v3499_v9, %v3501_v10 }
 0x39b   :  { %v3439_v48 = vor.u32 4788187, %v3438_v25  ;;  %v3510_v18 = vsel %vm3496_vm12, %v3507_v41, %v3509_v40  ;;  %v3442_v15 = vcvt.s32.f32 %v3435_v53  ;;  %v3634_v37 = vclz %v5628_v16 }
 0x39c   :  { %v9326_v31 = vmul.u32.u64.low %v3511_v61, %v3510_v18  ;;  %v9327_v29 = vmul.u32.u64.high %v3511_v61, %v3510_v18, %v9326_v31  ;;  %v9329_v8 = vmul.u32.u64.low %v3511_v61, %v3506_v0  ;;  %v9330_v46 = vmul.u32.u64.high %v3511_v61, %v3506_v0, %v9329_v8 }
 0x39d   :  { %v3440_v58 = vand.u32 2147483647, %v3439_v48  ;;  %v10484_v63 = vand.u32 2147483647, %v9133_v30  ;;  %v9335_v25 = vsub.s32 32, %v9263_v3  ;;  %v9340_v34 = vsel %vm3886_vm7, %v9256_v62, 0 }
 0x39e   :  { %v9345_v53 = vsel %vm3989_vm3, %v9270_v2, 0  ;;  %v5629_v23 = vadd.s32 4294967294, %v3634_v37  ;;  %v9348_v9 = vand.u32 3, %v9324_v55  ;;  %vm3568_vm5 = vcmp.lt.s32.totalorder %v8899_v36, 0 }
 0x39f   :  { %v3443_v14 = vmul.f32 %v3442_v15, %v3440_v58  ;;  %v3622_v13 = vadd.s32 %v9234_v39, %v9239_v19  ;;  %v3652_v17 = vsub.s32 4, %v9298_v38  ;;  %v3518_v62 = vmul.u32 %v3511_v61, %v3502_v35 }
 0x3a0   :  { %vm5630_vm15 = vcmp.lt.s32.totalorder %v5629_v23, 0  ;;  %vm3520_vm2 = vc.u32 %v9327_v29, %v9329_v8  ;;  %v3521_v59 = vadd.s32 1, %v9330_v46  ;;  %v9359_v32 = vand.u32 8388607, %v10484_v63 }
 0x3a1   :  { %v3444_v1 = vxor.u32 2147483648, %v3443_v14  ;;  %v3637_v2 = vsel %vm5630_vm15, 0, %v5629_v23  ;;  %v3789_v19 = vshll.u32 %v10907_v60, %v9263_v3  ;;  %v3790_v39 = vshrl.u32 %v10905_v20, %v9335_v25 }
 0x3a2   :  { %v3638_v5 = vsub.s32 32, %v3637_v2  ;;  %v3642_v10 = vsub.s32 4294967266, %v3637_v2  ;;  %v3639_v40 = vshll.u32 %v9312_v42, %v3637_v2  ;;  %v3522_v16 = vsel %vm3520_vm2, %v3521_v59, %v9330_v46 }
 0x3a3   :  { %v3445_v41 = vsel %vm3362_vm6, %v3444_v1, %v3443_v14  ;;  %v3792_v0 = vshll.u32 %v10905_v20, %v9263_v3  ;;  %v3523_v18 = vadd.s32 %v3522_v16, %v3518_v62  ;;  %v3793_v15 = vshrl.u32 %v10906_v6, %v9335_v25 }
 0x3a4   :  { %v3448_v61 = vsel %vm9294_vm13, %v8783_v21, %v3445_v41  ;;  %v3640_v48 = vshrl.u32 %v3622_v13, %v3638_v5  ;;  %v3643_v35 = vadd.s32 127, %v3642_v10  ;;  %v3795_v37 = vshll.u32 %v10906_v6, %v9263_v3 }
 0x3a5   :  { %5983 = vcosq.f32 %v3448_v61  ;;  %v3796_v42 = vshrl.u32 %v10908_v11, %v9335_v25  ;;  %v3524_v46 = vadd.s32 536870912, %v3523_v18  ;;  %v3798_v49 = vshll.u32 %v10908_v11, %v9263_v3 }
 0x3a6   :  { %5985 = vsinq.f32 %v3448_v61  ;;  %v3641_v31 = vor.u32 %v3640_v48, %v3639_v40  ;;  %v3644_v58 = vshll.u32 %v3643_v35, 23  ;;  %v3799_v23 = vshrl.u32 %v10909_v52, %v9335_v25 }
 0x3a7   :  { %v3801_v14 = vshll.u32 %v10909_v52, %v9263_v3  ;;  %v3802_v13 = vshrl.u32 %v10910_v27, %v9335_v25  ;;  %v3653_v1 = vsel %vm3568_vm5, %v3652_v17, %v9298_v38  ;;  %v9391_v2 = vshrl.u32 %v3524_v46, 30 }
 0x3a8   :  { %v3645_v62 = vor.u32 4788187, %v3644_v58  ;;  %v3791_v59 = vor.u32 %v3790_v39, %v3789_v19  ;;  %v3794_v5 = vor.u32 %v3793_v15, %v3792_v0  ;;  %v3797_v10 = vor.u32 %v3796_v42, %v3795_v37 }
 0x3a9   :  { %v3800_v41 = vor.u32 %v3799_v23, %v3798_v49  ;;  %v3803_v40 = vor.u32 %v3802_v13, %v3801_v14  ;;  %v3648_v61 = vcvt.s32.f32 %v3641_v31  ;;  %v3526_v48 = vshll.u32 %v9391_v2, 30 }
 0x3aa   :  { %v3646_v16 = vand.u32 2147483647, %v3645_v62  ;;  %vm3807_vm10 = vcmp.lt.s32.totalorder %v9261_v44, 4  ;;  %v9396_v3 = vand.u32 31, %v9345_v53  ;;  %v10914_v35 = vand.u32 2147483647, %v8899_v36 }
 0x3ab   :  { %v3780_v17 = vor.u32 8388608, %v9359_v32  ;;  %v3813_v19 = vsel %vm3807_vm10, %v3800_v41, 920167782  ;;  %v9407_v0 = vsub.s32 %v3523_v18, %v3526_v48  ;;  %vm3804_vm9 = vcmp.lt.s32.totalorder %v9261_v44, 1 }
 0x3ac   :  { %vm9400_vm1 = vcmp.le.f32.partialorder %v10914_v35, 0.7853982  ;;  %v3649_v39 = vmul.f32 %v3648_v61, %v3646_v16  ;;  %vm3806_vm6 = vcmp.lt.s32.totalorder %v9261_v44, 3  ;;  %v3812_v37 = vsel %vm3804_vm9, %v3791_v59, %v3794_v5 }
 0x3ad   :  { %v9413_v15 = vsel %vm9400_vm1, 0, %v3653_v1  ;;  %v3814_v32 = vsel %vm3806_vm6, %v3797_v10, %v3813_v19  ;;  %v3817_v42 = vsel %vm3807_vm10, %v3803_v40, 1326507024  ;;  %vm3454_vm0 = vcmp.lt.s32.totalorder %v9348_v9, 2 }
 0x3ae   :  { %v3650_v18 = vxor.u32 2147483648, %v3649_v39  ;;  %vm3465_vm13 = vcmp.lt.s32.totalorder %v8976_v57, 0  ;;  %v3529_v31 = vsub.s32 0, %v9407_v0  ;;  %v3809_v58 = vsel %vm3807_vm10, %v3797_v10, 2102212464 }
 0x3af   :  { %v3816_v46 = vsel %vm3804_vm9, %v3794_v5, %v3797_v10  ;;  %vm3452_vm7 = vweird.f32 %v8783_v21  ;;  %v3549_v49 = vsub.s32 4, %v9391_v2  ;;  %v3788_v23 = vshrl.u32 %v10907_v60, %v9335_v25 }
 0x3b0   :  { %vm3805_vm14 = vcmp.lt.s32.totalorder %v9261_v44, 2  ;;  %v3818_v14 = vsel %vm3806_vm6, %v3800_v41, %v3817_v42  ;;  %v3651_v13 = vsel %vm3568_vm5, %v3650_v18, %v3649_v39  ;;  %v5624_v62 = vmin.u32 %v3529_v31, %v9407_v0 }
 0x3b1   :  { %v3815_v1 = vsel %vm3805_vm14, %v3812_v37, %v3814_v32  ;;  %v3820_v10 = vshll.u32 %v3780_v17, 8  ;;  %v3654_v40 = vsel %vm9400_vm1, %v8899_v36, %v3651_v13  ;;  %v3808_v25 = vsel %vm3804_vm9, %v3788_v23, %v3791_v59 }
 0x3b2   :  { %v3810_v16 = vsel %vm3806_vm6, %v3794_v5, %v3809_v58  ;;  %v3819_v41 = vsel %vm3805_vm14, %v3816_v46, %v3818_v14  ;;  %v9449_v61 = vpop.eup %5983  ;;  %5987 = vcosq.f32 %v3654_v40  ;;  %v3531_v48 = vclz %v5624_v62 }
 0x3b3   :  { %v9451_v35 = vmul.u32.u64.low %v3820_v10, %v3819_v41  ;;  %v9452_v19 = vmul.u32.u64.high %v3820_v10, %v3819_v41, %v9451_v35  ;;  %v9454_v17 = vpop.eup %5985  ;;  %v10481_v38 = vxor.u32 2147483648, %v9449_v61  ;;  %5989 = vsinq.f32 %v3654_v40 }
 0x3b4   :  { %v9457_v39 = vmul.u32.u64.low %v3820_v10, %v3815_v1  ;;  %v9458_v59 = vmul.u32.u64.high %v3820_v10, %v3815_v1, %v9457_v39  ;;  %vm3455_vm4 = vcmp.eq.s32.totalorder %v9348_v9, 0  ;;  %v10482_v5 = vxor.u32 2147483648, %v9454_v17 }
 0x3b5   :  { %vm3458_vm8 = vcmp.eq.s32.totalorder %v9348_v9, 2  ;;  %v5625_v37 = vadd.s32 4294967294, %v3531_v48  ;;  %v9468_v42 = vand.u32 3, %v9413_v15  ;;  %v3811_v18 = vsel %vm3805_vm14, %v3808_v25, %v3810_v16 }
 0x3b6   :  { %v3460_v32 = vsel %vm3458_vm8, %v10481_v38, %v9454_v17  ;;  %v10483_v31 = vand.u32 2147483647, %v9093_v24  ;;  %v3457_v58 = vsel %vm3455_vm4, %v9449_v61, %v10482_v5  ;;  %v3519_v46 = vadd.s32 %v9329_v8, %v9327_v29 }
 0x3b7   :  { %vm5626_vm11 = vcmp.lt.s32.totalorder %v5625_v37, 0  ;;  %vm3829_vm12 = vc.u32 %v9452_v19, %v9457_v39  ;;  %v3461_v23 = vsel %vm3454_vm0, %v3457_v58, %v3460_v32  ;;  %v3550_v44 = vsel %vm3465_vm13, %v3549_v49, %v9391_v2 }
 0x3b8   :  { %v3534_v14 = vsel %vm5626_vm11, 0, %v5625_v37  ;;  %v3830_v13 = vadd.s32 1, %v9458_v59  ;;  %v3462_v62 = vsel %vm3452_vm7, nan, %v3461_v23  ;;  %v3827_v29 = vmul.u32 %v3820_v10, %v3811_v18 }
 0x3b9   :  { %v3535_v1 = vsub.s32 32, %v3534_v14  ;;  %v3539_v40 = vsub.s32 4294967266, %v3534_v14  ;;  %v9489_v8 = vsub.s32 32, %v9396_v3  ;;  %4192 = vrot.lane.b32.xlu1 %v3462_v62, %s6073_s16  ;;  %v10917_v9 = vand.u32 2147483647, %v8976_v57 }
 0x3ba   :  { %v3831_v2 = vsel %vm3829_vm12, %v3830_v13, %v9458_v59  ;;  %v9501_v49 = vand.u32 8388607, %v10483_v31  ;;  %vm3661_vm5 = vcmp.eq.s32.totalorder %v9468_v42, 0  ;;  %v3536_v10 = vshll.u32 %v9407_v0, %v3534_v14 }
 0x3bb   :  { %vm9494_vm3 = vcmp.le.f32.partialorder %v10917_v9, 0.7853982  ;;  %v3537_v16 = vshrl.u32 %v3519_v46, %v3535_v1  ;;  %v3540_v41 = vadd.s32 127, %v3539_v40  ;;  %v3832_v48 = vadd.s32 %v3831_v2, %v3827_v29 }
 0x3bc   :  { %vm3660_vm15 = vcmp.lt.s32.totalorder %v9468_v42, 2  ;;  %vm3664_vm2 = vcmp.eq.s32.totalorder %v9468_v42, 2  ;;  %v9509_v35 = vsel %vm9494_vm3, 0, %v3550_v44  ;;  %v3687_v59 = vshrl.u32 %v10905_v20, %v9254_v47 }
 0x3bd   :  { %v3690_v37 = vshrl.u32 %v10906_v6, %v9254_v47  ;;  %vm3658_vm10 = vweird.f32 %v8899_v36  ;;  %v3538_v0 = vor.u32 %v3537_v16, %v3536_v10  ;;  %v3541_v32 = vshll.u32 %v3540_v41, 23 }
 0x3be   :  { %v3833_v18 = vadd.s32 536870912, %v3832_v48  ;;  %v3696_v58 = vshrl.u32 %v10909_v52, %v9254_v47  ;;  %v3686_v46 = vshll.u32 %v10907_v60, %v9199_v43  ;;  %v3689_v23 = vshll.u32 %v10905_v20, %v9199_v43 }
 0x3bf   :  { %v3693_v14 = vshrl.u32 %v10908_v11, %v9254_v47  ;;  %v3695_v44 = vshll.u32 %v10908_v11, %v9199_v43  ;;  %v3542_v13 = vor.u32 4788187, %v3541_v32  ;;  %v3677_v1 = vor.u32 8388608, %v9501_v49  ;;  %v9529_v29 = vpop.eup %5987 }
 0x3c0   :  { %v3834_v62 = vshrl.u32 %v3833_v18, 30  ;;  %v3692_v40 = vshll.u32 %v10906_v6, %v9199_v43  ;;  %v3688_v9 = vor.u32 %v3687_v59, %v3686_v46  ;;  %v3691_v2 = vor.u32 %v3690_v37, %v3689_v23  ;;  %v9533_v41 = vpop.eup %5989 }
 0x3c1   :  { %v3697_v10 = vor.u32 %v3696_v58, %v3695_v44  ;;  %v3699_v16 = vshrl.u32 %v10910_v27, %v9254_v47  ;;  %v10485_v38 = vxor.u32 2147483648, %v9529_v29  ;;  %v3543_v5 = vand.u32 2147483647, %v3542_v13 }
 0x3c2   :  { %v3545_v32 = vcvt.s32.f32 %v3538_v0  ;;  %v3835_v18 = vshll.u32 %v3834_v62, 30  ;;  %v10486_v49 = vxor.u32 2147483648, %v9533_v41  ;;  %v3694_v31 = vor.u32 %v3693_v14, %v3692_v40 }
 0x3c3   :  { %v3698_v63 = vshll.u32 %v10909_v52, %v9199_v43  ;;  %vm3701_vm1 = vcmp.lt.s32.totalorder %v9247_v28, 1  ;;  %v3666_v59 = vsel %vm3664_vm2, %v10485_v38, %v9533_v41  ;;  %vm3704_vm9 = vcmp.lt.s32.totalorder %v9247_v28, 4 }
 0x3c4   :  { %v3546_v37 = vmul.f32 %v3545_v32, %v3543_v5  ;;  %v9545_v58 = vsub.s32 %v3832_v48, %v3835_v18  ;;  %v3663_v0 = vsel %vm3661_vm5, %v9529_v29, %v10486_v49  ;;  %vm3703_vm6 = vcmp.lt.s32.totalorder %v9247_v28, 3 }
 0x3c5   :  { %v3700_v43 = vor.u32 %v3699_v16, %v3698_v63  ;;  %v3710_v46 = vsel %vm3704_vm9, %v3697_v10, 920167782  ;;  %v3667_v23 = vsel %vm3660_vm15, %v3663_v0, %v3666_v59  ;;  %v3709_v14 = vsel %vm3701_vm1, %v3688_v9, %v3691_v2 }
 0x3c6   :  { %v3547_v5 = vxor.u32 2147483648, %v3546_v37  ;;  %v3838_v48 = vsub.s32 0, %v9545_v58  ;;  %v3668_v44 = vsel %vm3658_vm10, nan, %v3667_v23  ;;  %v3685_v63 = vshrl.u32 %v10907_v60, %v9254_v47 }
 0x3c7   :  { %vm3702_vm0 = vcmp.lt.s32.totalorder %v9247_v28, 2  ;;  %v3711_v13 = vsel %vm3703_vm6, %v3694_v31, %v3710_v46  ;;  %4196 = vrot.lane.b32.xlu1 %v3668_v44, %s6073_s16  ;;  %v3706_v16 = vsel %vm3704_vm9, %v3694_v31, 2102212464  ;;  %v3713_v32 = vsel %vm3701_vm1, %v3691_v2, %v3694_v31 }
 0x3c8   :  { %v3548_v42 = vsel %vm3465_vm13, %v3547_v5, %v3546_v37  ;;  %v5636_v40 = vmin.u32 %v3838_v48, %v9545_v58  ;;  %v3858_v18 = vsub.s32 4, %v3834_v62  ;;  %v3712_v59 = vsel %vm3702_vm0, %v3709_v14, %v3711_v13 }
 0x3c9   :  { %v3551_v47 = vsel %vm9494_vm3, %v8976_v57, %v3548_v42  ;;  %v3714_v0 = vsel %vm3704_vm9, %v3700_v43, 1326507024  ;;  %v3717_v23 = vshll.u32 %v3677_v1, 8  ;;  %v3705_v31 = vsel %vm3701_vm1, %v3685_v63, %v3688_v9 }
 0x3ca   :  { %5991 = vcosq.f32 %v3551_v47  ;;  %v3840_v37 = vclz %v5636_v40  ;;  %v3715_v46 = vsel %vm3703_vm6, %v3697_v10, %v3714_v0  ;;  %v3707_v25 = vsel %vm3703_vm6, %v3691_v2, %v3706_v16 }
 0x3cb   :  { %5993 = vsinq.f32 %v3551_v47  ;;  %v3716_v5 = vsel %vm3702_vm0, %v3713_v32, %v3715_v46  ;;  %vm3774_vm13 = vcmp.lt.s32.totalorder %v9133_v30, 0  ;;  %v9596_v44 = vand.u32 3, %v9509_v35 }
 0x3cc   :  { %v5637_v48 = vadd.s32 4294967294, %v3840_v37  ;;  %v9592_v43 = vmul.u32.u64.low %v3717_v23, %v3716_v5  ;;  %v9593_v14 = vmul.u32.u64.high %v3717_v23, %v3716_v5, %v9592_v43  ;;  %v3859_v1 = vsel %vm3774_vm13, %v3858_v18, %v3834_v62 }
 0x3cd   :  { %v9600_v10 = vmul.u32.u64.low %v3717_v23, %v3712_v59  ;;  %v9601_v9 = vmul.u32.u64.high %v3717_v23, %v3712_v59, %v9600_v10  ;;  %v9605_v2 = vand.u32 31, %v9340_v34  ;;  %v9608_v63 = vadd.s32 1, %v9268_v4 }
 0x3ce   :  { %vm5638_vm14 = vcmp.lt.s32.totalorder %v5637_v48, 0  ;;  %v3708_v13 = vsel %vm3702_vm0, %v3705_v31, %v3707_v25  ;;  %v9613_v42 = vshrl.u32 %v9345_v53, 5  ;;  %v10920_v40 = vand.u32 2147483647, %v9133_v30 }
 0x3cf   :  { %v3828_v16 = vadd.s32 %v9457_v39, %v9452_v19  ;;  %v3843_v32 = vsel %vm5638_vm14, 0, %v5637_v48  ;;  %v10490_v28 = vand.u32 2147483647, %v9180_v50  ;;  %vm3561_vm8 = vcmp.eq.s32.totalorder %v9596_v44, 2 }
 0x3d0   :  { %vm9617_vm4 = vcmp.le.f32.partialorder %v10920_v40, 0.7853982  ;;  %v3844_v47 = vsub.s32 32, %v3843_v32  ;;  %v3848_v4 = vsub.s32 4294967266, %v3843_v32  ;;  %v3724_v53 = vmul.u32 %v3717_v23, %v3708_v13 }
 0x3d1   :  { %v9625_v18 = vsel %vm9617_vm4, 0, %v3859_v1  ;;  %vm3726_vm11 = vc.u32 %v9593_v14, %v9600_v10  ;;  %v3727_v59 = vadd.s32 1, %v9601_v9  ;;  %v3996_v19 = vshrl.u32 %v10905_v20, %v9489_v8 }
 0x3d2   :  { %vm3558_vm12 = vcmp.eq.s32.totalorder %v9596_v44, 0  ;;  %v3845_v39 = vshll.u32 %v9545_v58, %v3843_v32  ;;  %v3846_v0 = vshrl.u32 %v3828_v16, %v3844_v47  ;;  %v3849_v37 = vadd.s32 127, %v3848_v4 }
 0x3d3   :  { %v3999_v46 = vshrl.u32 %v10906_v6, %v9489_v8  ;;  %vm3557_vm3 = vcmp.lt.s32.totalorder %v9596_v44, 2  ;;  %v3728_v23 = vsel %vm3726_vm11, %v3727_v59, %v9601_v9  ;;  %v4002_v31 = vshrl.u32 %v10908_v11, %v9489_v8 }
 0x3d4   :  { %v4004_v25 = vshll.u32 %v10908_v11, %v9396_v3  ;;  %v4005_v5 = vshrl.u32 %v10909_v52, %v9489_v8  ;;  %vm3555_vm5 = vweird.f32 %v8976_v57  ;;  %v3847_v58 = vor.u32 %v3846_v0, %v3845_v39 }
 0x3d5   :  { %v3850_v48 = vshll.u32 %v3849_v37, 23  ;;  %v3729_v43 = vadd.s32 %v3728_v23, %v3724_v53  ;;  %v3995_v1 = vshll.u32 %v10907_v60, %v9396_v3  ;;  %v3998_v9 = vshll.u32 %v10905_v20, %v9396_v3 }
 0x3d6   :  { %v4001_v13 = vshll.u32 %v10906_v6, %v9396_v3  ;;  %v4006_v40 = vor.u32 %v4005_v5, %v4004_v25  ;;  %v4008_v16 = vshrl.u32 %v10910_v27, %v9489_v8  ;;  %v3985_v4 = vand.u32 8388607, %v10490_v28 }
 0x3d7   :  { %v3851_v32 = vor.u32 4788187, %v3850_v48  ;;  %v3730_v47 = vadd.s32 536870912, %v3729_v43  ;;  %v3997_v59 = vor.u32 %v3996_v19, %v3995_v1  ;;  %v9657_v53 = vpop.eup %5991  ;;  %vm4092_vm15 = vcmp.gt.s32.totalorder %v9608_v63, 0 }
 0x3d8   :  { %v3854_v39 = vcvt.s32.f32 %v3847_v58  ;;  %v4000_v0 = vor.u32 %v3999_v46, %v3998_v9  ;;  %v4003_v37 = vor.u32 %v4002_v31, %v4001_v13  ;;  %v4007_v23 = vshll.u32 %v10909_v52, %v9396_v3  ;;  %v9662_v25 = vpop.eup %5993 }
 0x3d9   :  { %v10487_v5 = vxor.u32 2147483648, %v9657_v53  ;;  %v3852_v48 = vand.u32 2147483647, %v3851_v32  ;;  %v9665_v38 = vshrl.u32 %v3730_v47, 30  ;;  %vm4013_vm2 = vcmp.lt.s32.totalorder %v9613_v42, 4 }
 0x3da   :  { %v10488_v19 = vxor.u32 2147483648, %v9662_v25  ;;  %v4009_v1 = vor.u32 %v4008_v16, %v4007_v23  ;;  %vm4010_vm1 = vcmp.lt.s32.totalorder %v9613_v42, 1  ;;  %v4019_v46 = vsel %vm4013_vm2, %v4006_v40, 920167782 }
 0x3db   :  { %v3563_v3 = vsel %vm3561_vm8, %v10487_v5, %v9662_v25  ;;  %v3855_v31 = vmul.f32 %v3854_v39, %v3852_v48  ;;  %v3732_v58 = vshll.u32 %v9665_v38, 30  ;;  %vm4012_vm9 = vcmp.lt.s32.totalorder %v9613_v42, 3 }
 0x3dc   :  { %v3560_v9 = vsel %vm3558_vm12, %v9657_v53, %v10488_v19  ;;  %v3986_v13 = vor.u32 8388608, %v3985_v4  ;;  %v4018_v16 = vsel %vm4010_vm1, %v3997_v59, %v4000_v0  ;;  %v4020_v32 = vsel %vm4012_vm9, %v4003_v37, %v4019_v46 }
 0x3dd   :  { %v3564_v47 = vsel %vm3557_vm3, %v3560_v9, %v3563_v3  ;;  %v3856_v39 = vxor.u32 2147483648, %v3855_v31  ;;  %v9690_v23 = vsub.s32 %v3729_v43, %v3732_v58  ;;  %v4022_v48 = vsel %vm4010_vm1, %v4000_v0, %v4003_v37 }
 0x3de   :  { %v3565_v49 = vsel %vm3555_vm5, nan, %v3564_v47  ;;  %v3994_v4 = vshrl.u32 %v10907_v60, %v9489_v8  ;;  %v4015_v5 = vsel %vm4013_vm2, %v4003_v37, 2102212464  ;;  %v4023_v46 = vsel %vm4013_vm2, %v4009_v1, 1326507024 }
 0x3df   :  { %4194 = vrot.lane.b32.xlu0 %v3565_v49, %s6073_s16  ;;  %v3857_v44 = vsel %vm3774_vm13, %v3856_v39, %v3855_v31  ;;  %v3735_v43 = vsub.s32 0, %v9690_v23  ;;  %vm4011_vm6 = vcmp.lt.s32.totalorder %v9613_v42, 2  ;;  %v4024_v3 = vsel %vm4012_vm9, %v4006_v40, %v4023_v46 }
 0x3e0   :  { %v3860_v8 = vsel %vm9617_vm4, %v9133_v30, %v3857_v44  ;;  %v4021_v37 = vsel %vm4011_vm6, %v4018_v16, %v4020_v32  ;;  %v4025_v49 = vsel %vm4011_vm6, %v4022_v48, %v4024_v3  ;;  %v4026_v1 = vshll.u32 %v3986_v13, 8 }
 0x3e1   :  { %5995 = vcosq.f32 %v3860_v8  ;;  %v5632_v31 = vmin.u32 %v3735_v43, %v9690_v23  ;;  %v4014_v58 = vsel %vm4010_vm1, %v3994_v4, %v3997_v59  ;;  %v4016_v40 = vsel %vm4012_vm9, %v4000_v0, %v4015_v5 }
 0x3e2   :  { %5997 = vsinq.f32 %v3860_v8  ;;  %v9721_v9 = vmul.u32.u64.low %v4026_v1, %v4025_v49  ;;  %v9722_v62 = vmul.u32.u64.high %v4026_v1, %v4025_v49, %v9721_v9  ;;  %v9727_v16 = vsel %vm4092_vm15, %v9608_v63, 0 }
 0x3e3   :  { %v3737_v32 = vclz %v5632_v31  ;;  %v9729_v13 = vmul.u32.u64.low %v4026_v1, %v4021_v37  ;;  %v9730_v47 = vmul.u32.u64.high %v4026_v1, %v4021_v37, %v9729_v13  ;;  %v9734_v39 = vsub.s32 32, %v9605_v2 }
 0x3e4   :  { %v9737_v59 = vand.u32 3, %v9625_v18  ;;  %v4017_v0 = vsel %vm4011_vm6, %v4014_v58, %v4016_v40  ;;  %v10489_v48 = vand.u32 2147483647, %v9152_v33  ;;  %v9743_v63 = vshrl.u32 %v9340_v34, 5 }
 0x3e5   :  { %v5633_v5 = vadd.s32 4294967294, %v3737_v32  ;;  %v9746_v4 = vand.u32 31, %v9727_v16  ;;  %v3725_v46 = vadd.s32 %v9600_v10, %v9593_v14  ;;  %vm4035_vm0 = vc.u32 %v9722_v62, %v9729_v13 }
 0x3e6   :  { %v4033_v44 = vmul.u32 %v4026_v1, %v4017_v0  ;;  %v4036_v42 = vadd.s32 1, %v9730_v47  ;;  %v3892_v43 = vshll.u32 %v10907_v60, %v9605_v2  ;;  %vm3870_vm14 = vcmp.eq.s32.totalorder %v9737_v59, 2 }
 0x3e7   :  { %vm5634_vm13 = vcmp.lt.s32.totalorder %v5633_v5, 0  ;;  %v3893_v3 = vshrl.u32 %v10905_v20, %v9734_v39  ;;  %v3895_v8 = vshll.u32 %v10905_v20, %v9605_v2  ;;  %v3896_v14 = vshrl.u32 %v10906_v6, %v9734_v39 }
 0x3e8   :  { %v3740_v34 = vsel %vm5634_vm13, 0, %v5633_v5  ;;  %vm3867_vm4 = vcmp.eq.s32.totalorder %v9737_v59, 0  ;;  %v4037_v49 = vsel %vm4035_vm0, %v4036_v42, %v9730_v47  ;;  %v3882_v1 = vand.u32 8388607, %v10489_v48 }
 0x3e9   :  { %v3741_v10 = vsub.s32 32, %v3740_v34  ;;  %v3745_v37 = vsub.s32 4294967266, %v3740_v34  ;;  %vm3866_vm8 = vcmp.lt.s32.totalorder %v9737_v59, 2  ;;  %v3742_v31 = vshll.u32 %v9690_v23, %v3740_v34 }
 0x3ea   :  { %v4038_v58 = vadd.s32 %v4037_v49, %v4033_v44  ;;  %v3899_v40 = vshrl.u32 %v10908_v11, %v9734_v39  ;;  %v3902_v9 = vshrl.u32 %v10909_v52, %v9734_v39  ;;  %vm3864_vm11 = vweird.f32 %v9133_v30 }
 0x3eb   :  { %v3743_v32 = vshrl.u32 %v3725_v46, %v3741_v10  ;;  %v3746_v0 = vadd.s32 127, %v3745_v37  ;;  %v3901_v47 = vshll.u32 %v10908_v11, %v9605_v2  ;;  %v3905_v5 = vshrl.u32 %v10910_v27, %v9734_v39 }
 0x3ec   :  { %v4039_v42 = vadd.s32 536870912, %v4038_v58  ;;  %v3894_v19 = vor.u32 %v3893_v3, %v3892_v43  ;;  %v3897_v23 = vor.u32 %v3896_v14, %v3895_v8  ;;  %v3898_v44 = vshll.u32 %v10906_v6, %v9605_v2 }
 0x3ed   :  { %vm3671_vm12 = vcmp.lt.s32.totalorder %v9093_v24, 0  ;;  %v3744_v34 = vor.u32 %v3743_v32, %v3742_v31  ;;  %v3747_v49 = vshll.u32 %v3746_v0, 23  ;;  %v3903_v48 = vor.u32 %v3902_v9, %v3901_v47 }
 0x3ee   :  { %v3904_v46 = vshll.u32 %v10909_v52, %v9605_v2  ;;  %v9782_v10 = vpop.eup %5995  ;;  %v4040_v37 = vshrl.u32 %v4039_v42, 30  ;;  %v3883_v28 = vor.u32 8388608, %v3882_v1  ;;  %v3900_v22 = vor.u32 %v3899_v40, %v3898_v44 }
 0x3ef   :  { %vm3907_vm3 = vcmp.lt.s32.totalorder %v9743_v63, 1  ;;  %v9785_v43 = vpop.eup %5997  ;;  %v10491_v3 = vxor.u32 2147483648, %v9782_v10  ;;  %v10923_v8 = vand.u32 2147483647, %v9093_v24  ;;  %v3748_v31 = vor.u32 4788187, %v3747_v49 }
 0x3f0   :  { %v3906_v9 = vor.u32 %v3905_v5, %v3904_v46  ;;  %vm3909_vm2 = vcmp.lt.s32.totalorder %v9743_v63, 3  ;;  %v10492_v2 = vxor.u32 2147483648, %v9785_v43  ;;  %v4041_v1 = vshll.u32 %v4040_v37, 30 }
 0x3f1   :  { %vm9790_vm15 = vcmp.le.f32.partialorder %v10923_v8, 0.7853982  ;;  %vm3910_vm1 = vcmp.lt.s32.totalorder %v9743_v63, 4  ;;  %v3915_v40 = vsel %vm3907_vm3, %v3894_v19, %v3897_v23  ;;  %v3872_v32 = vsel %vm3870_vm14, %v10491_v3, %v9785_v43 }
 0x3f2   :  { %v3749_v0 = vand.u32 2147483647, %v3748_v31  ;;  %v3751_v47 = vcvt.s32.f32 %v3744_v34  ;;  %v3916_v5 = vsel %vm3910_vm1, %v3903_v48, 920167782  ;;  %v3869_v42 = vsel %vm3867_vm4, %v9782_v10, %v10492_v2 }
 0x3f3   :  { %v3755_v44 = vsub.s32 4, %v9665_v38  ;;  %v9812_v49 = vsub.s32 %v4038_v58, %v4041_v1  ;;  %v3917_v46 = vsel %vm3909_vm2, %v3900_v22, %v3916_v5  ;;  %v3873_v8 = vsel %vm3866_vm8, %v3869_v42, %v3872_v32 }
 0x3f4   :  { %v3752_v34 = vmul.f32 %v3751_v47, %v3749_v0  ;;  %vm3908_vm9 = vcmp.lt.s32.totalorder %v9743_v63, 2  ;;  %v3912_v31 = vsel %vm3910_vm1, %v3900_v22, 2102212464  ;;  %v3874_v3 = vsel %vm3864_vm11, nan, %v3873_v8 }
 0x3f5   :  { %v4044_v2 = vsub.s32 0, %v9812_v49  ;;  %v3891_v58 = vshrl.u32 %v10907_v60, %v9734_v39  ;;  %v3918_v1 = vsel %vm3908_vm9, %v3915_v40, %v3917_v46  ;;  %4200 = vrot.lane.b32.xlu1 %v3874_v3, %s6073_s16  ;;  %v3919_v32 = vsel %vm3907_vm3, %v3897_v23, %v3900_v22 }
 0x3f6   :  { %v3753_v59 = vxor.u32 2147483648, %v3752_v34  ;;  %v3920_v0 = vsel %vm3910_vm1, %v3906_v9, 1326507024  ;;  %v3923_v47 = vshll.u32 %v3883_v28, 8  ;;  %v3756_v5 = vsel %vm3671_vm12, %v3755_v44, %v9665_v38 }
 0x3f7   :  { %v5644_v42 = vmin.u32 %v4044_v2, %v9812_v49  ;;  %v3911_v39 = vsel %vm3907_vm3, %v3891_v58, %v3894_v19  ;;  %v3913_v3 = vsel %vm3909_vm2, %v3897_v23, %v3912_v31  ;;  %v3921_v22 = vsel %vm3909_vm2, %v3903_v48, %v3920_v0 }
 0x3f8   :  { %v3754_v40 = vsel %vm3671_vm12, %v3753_v59, %v3752_v34  ;;  %v9845_v9 = vmul.u32.u64.low %v3923_v47, %v3918_v1  ;;  %v9846_v28 = vmul.u32.u64.high %v3923_v47, %v3918_v1, %v9845_v9  ;;  %v4064_v44 = vsub.s32 4, %v4040_v37 }
 0x3f9   :  { %v3757_v38 = vsel %vm9790_vm15, %v9093_v24, %v3754_v40  ;;  %v4046_v2 = vclz %v5644_v42  ;;  %v3922_v19 = vsel %vm3908_vm9, %v3919_v32, %v3921_v22  ;;  %v9859_v48 = vsel %vm9790_vm15, 0, %v3756_v5 }
 0x3fa   :  { %5999 = vcosq.f32 %v3757_v38  ;;  %v9854_v23 = vmul.u32.u64.low %v3923_v47, %v3922_v19  ;;  %v9855_v46 = vmul.u32.u64.high %v3923_v47, %v3922_v19, %v9854_v23  ;;  %v3914_v34 = vsel %vm3908_vm9, %v3911_v39, %v3913_v3 }
 0x3fb   :  { %6001 = vsinq.f32 %v3757_v38  ;;  %v5645_v8 = vadd.s32 4294967294, %v4046_v2  ;;  %v4096_v31 = vsub.s32 32, %v9746_v4  ;;  %vm3980_vm6 = vcmp.lt.s32.totalorder %v9180_v50, 0 }
 0x3fc   :  { %v3933_v58 = vadd.s32 1, %v9846_v28  ;;  %v4317_v1 = vadd.s32 3, %v9324_v55  ;;  %v10926_v59 = vand.u32 2147483647, %v9180_v50  ;;  %v4065_v14 = vsel %vm3980_vm6, %v4064_v44, %v4040_v37 }
 0x3fd   :  { %vm5646_vm13 = vcmp.lt.s32.totalorder %v5645_v8, 0  ;;  %v10493_v63 = vand.u32 2147483647, %v9175_v7  ;;  %v3762_v0 = vand.u32 3, %v9859_v48  ;;  %v3930_v42 = vmul.u32 %v3923_v47, %v3914_v34 }
 0x3fe   :  { %vm9869_vm0 = vcmp.le.f32.partialorder %v10926_v59, 0.7853982  ;;  %v4049_v5 = vsel %vm5646_vm13, 0, %v5645_v8  ;;  %vm3932_vm14 = vc.u32 %v9855_v46, %v9845_v9  ;;  %v4034_v55 = vadd.s32 %v9729_v13, %v9722_v62 }
 0x3ff   :  { %v4050_v39 = vsub.s32 32, %v4049_v5  ;;  %v4054_v3 = vsub.s32 4294967266, %v4049_v5  ;;  %v3934_v40 = vsel %vm3932_vm14, %v3933_v58, %v9846_v28  ;;  %v9884_v22 = vsel %vm9869_vm0, 0, %v4065_v14 }
 0x400   :  { %v3935_v37 = vadd.s32 %v3934_v40, %v3930_v42  ;;  %v9886_v38 = vand.u32 3, %v4317_v1  ;;  %v4051_v2 = vshll.u32 %v9812_v49, %v4049_v5  ;;  %v9891_v19 = vand.u32 8388607, %v10493_v63 }
 0x401   :  { %v4052_v47 = vshrl.u32 %v4034_v55, %v4050_v39  ;;  %v4055_v44 = vadd.s32 127, %v4054_v3  ;;  %v9894_v62 = vshrl.u32 %v9727_v16, 5  ;;  %vm3764_vm4 = vcmp.eq.s32.totalorder %v3762_v0, 0 }
 0x402   :  { %v3936_v13 = vadd.s32 536870912, %v3935_v37  ;;  %v4099_v28 = vshrl.u32 %v10905_v20, %v4096_v31  ;;  %vm3763_vm8 = vcmp.lt.s32.totalorder %v3762_v0, 2  ;;  %vm3767_vm12 = vcmp.eq.s32.totalorder %v3762_v0, 2 }
 0x403   :  { %v4053_v23 = vor.u32 %v4052_v47, %v4051_v2  ;;  %v4056_v8 = vshll.u32 %v4055_v44, 23  ;;  %v9898_v34 = vand.u32 3, %v9884_v22  ;;  %vm3761_vm3 = vweird.f32 %v9093_v24 }
 0x404   :  { %v9901_v49 = vshrl.u32 %v3936_v13, 30  ;;  %vm4320_vm15 = vcmp.eq.s32.totalorder %v9886_v38, 0  ;;  %v4097_v16 = vshrl.u32 %v10907_v60, %v4096_v31  ;;  %v4098_v58 = vshll.u32 %v10907_v60, %v9746_v4 }
 0x405   :  { %v4057_v1 = vor.u32 4788187, %v4056_v8  ;;  %v10929_v59 = vxor.u32 2147483648, %v9454_v17  ;;  %vm4323_vm2 = vcmp.eq.s32.totalorder %v9886_v38, 2  ;;  %v4089_v5 = vor.u32 8388608, %v9891_v19 }
 0x406   :  { %v3938_v42 = vshll.u32 %v9901_v49, 30  ;;  %v10930_v55 = vxor.u32 2147483648, %v9449_v61  ;;  %v4100_v3 = vor.u32 %v4099_v28, %v4098_v58  ;;  %v4102_v40 = vshrl.u32 %v10906_v6, %v4096_v31 }
 0x407   :  { %v9910_v14 = vsel %vm4320_vm15, %v9449_v61, %v10929_v59  ;;  %v9919_v60 = vpop.eup %5999  ;;  %v4058_v2 = vand.u32 2147483647, %v4057_v1  ;;  %v4060_v47 = vcvt.s32.f32 %v4053_v23  ;;  %v4105_v44 = vshrl.u32 %v10908_v11, %v4096_v31 }
 0x408   :  { %v4325_v39 = vsel %vm4323_vm2, %v10930_v55, %v9454_v17  ;;  %v4108_v13 = vshrl.u32 %v10909_v52, %v4096_v31  ;;  %v9923_v8 = vpop.eup %6001  ;;  %v3768_v19 = vxor.u32 2147483648, %v9919_v60  ;;  %v9926_v59 = vsub.s32 %v3935_v37, %v3938_v42 }
 0x409   :  { %v4101_v61 = vshll.u32 %v10905_v20, %v9746_v4  ;;  %v4111_v17 = vshrl.u32 %v10910_v27, %v4096_v31  ;;  %v3765_v28 = vxor.u32 2147483648, %v9923_v8  ;;  %v4061_v58 = vmul.f32 %v4060_v47, %v4058_v2 }
 0x40a   :  { %v4104_v23 = vshll.u32 %v10906_v6, %v9746_v4  ;;  %v4107_v1 = vshll.u32 %v10908_v11, %v9746_v4  ;;  %v3769_v37 = vsel %vm3767_vm12, %v3768_v19, %v9923_v8  ;;  %v3941_v42 = vsub.s32 0, %v9926_v59 }
 0x40b   :  { %v4103_v55 = vor.u32 %v4102_v40, %v4101_v61  ;;  %v4110_v27 = vshll.u32 %v10909_v52, %v9746_v4  ;;  %v3766_v20 = vsel %vm3764_vm4, %v9919_v60, %v3765_v28  ;;  %v4062_v6 = vxor.u32 2147483648, %v4061_v58 }
 0x40c   :  { %vm4319_vm1 = vcmp.lt.s32.totalorder %v9886_v38, 2  ;;  %v4106_v11 = vor.u32 %v4105_v44, %v4104_v23  ;;  %v4109_v31 = vor.u32 %v4108_v13, %v4107_v1  ;;  %v3770_v2 = vsel %vm3763_vm8, %v3766_v20, %v3769_v37 }
 0x40d   :  { %v5640_v47 = vmin.u32 %v3941_v42, %v9926_v59  ;;  %v4112_v63 = vor.u32 %v4111_v17, %v4110_v27  ;;  %vm4113_vm9 = vcmp.lt.s32.totalorder %v9894_v62, 1  ;;  %v3771_v52 = vsel %vm3761_vm3, nan, %v3770_v2 }
 0x40e   :  { %v4063_v4 = vsel %vm3980_vm6, %v4062_v6, %v4061_v58  ;;  %vm4114_vm13 = vcmp.lt.s32.totalorder %v9894_v62, 2  ;;  %vm4115_vm14 = vcmp.lt.s32.totalorder %v9894_v62, 3  ;;  %4198 = vrot.lane.b32.xlu0 %v3771_v52, %s6073_s16  ;;  %vm4116_vm4 = vcmp.lt.s32.totalorder %v9894_v62, 4 }
 0x40f   :  { %v4066_v0 = vsel %vm9869_vm0, %v9180_v50, %v4063_v4  ;;  %v3943_v40 = vclz %v5640_v47  ;;  %v4121_v44 = vsel %vm4113_vm9, %v4100_v3, %v4103_v55  ;;  %v4118_v13 = vsel %vm4116_vm4, %v4106_v11, 2102212464 }
 0x410   :  { %6003 = vcosq.f32 %v4066_v0  ;;  %v4122_v61 = vsel %vm4116_vm4, %v4109_v31, 920167782  ;;  %v4125_v17 = vsel %vm4113_vm9, %v4103_v55, %v4106_v11  ;;  %v4126_v1 = vsel %vm4116_vm4, %v4112_v63, 1326507024 }
 0x411   :  { %6005 = vsinq.f32 %v4066_v0  ;;  %v5641_v58 = vadd.s32 4294967294, %v3943_v40  ;;  %v4123_v23 = vsel %vm4115_vm14, %v4106_v11, %v4122_v61  ;;  %v4117_v32 = vsel %vm4113_vm9, %v4097_v16, %v4100_v3 }
 0x412   :  { %v4124_v37 = vsel %vm4114_vm13, %v4121_v44, %v4123_v23  ;;  %v4127_v42 = vsel %vm4115_vm14, %v4109_v31, %v4126_v1  ;;  %v4129_v27 = vshll.u32 %v4089_v5, 8  ;;  %v4525_v6 = vadd.s32 3, %v9413_v15 }
 0x413   :  { %vm5642_vm6 = vcmp.lt.s32.totalorder %v5641_v58, 0  ;;  %v4128_v20 = vsel %vm4114_vm13, %v4125_v17, %v4127_v42  ;;  %v4421_v2 = vadd.s32 3, %v9509_v35  ;;  %v4119_v63 = vsel %vm4115_vm14, %v4103_v55, %v4118_v13 }
 0x414   :  { %v3946_v11 = vsel %vm5642_vm6, 0, %v5641_v58  ;;  %v9980_v16 = vmul.u32.u64.low %v4129_v27, %v4128_v20  ;;  %v9981_v3 = vmul.u32.u64.high %v4129_v27, %v4128_v20, %v9980_v16  ;;  %v3931_v47 = vadd.s32 %v9845_v9, %v9855_v46 }
 0x415   :  { %v3947_v31 = vsub.s32 32, %v3946_v11  ;;  %v3951_v5 = vsub.s32 4294967266, %v3946_v11  ;;  %v4326_v52 = vsel %vm4319_vm1, %v9910_v14, %v4325_v39  ;;  %v9992_v35 = vand.u32 3, %v4525_v6 }
 0x416   :  { %v9988_v4 = vmul.u32.u64.low %v4129_v27, %v4124_v37  ;;  %v9989_v15 = vmul.u32.u64.high %v4129_v27, %v4124_v37, %v9988_v4  ;;  %v4422_v0 = vand.u32 3, %v4421_v2  ;;  %v3948_v55 = vshll.u32 %v9926_v59, %v3946_v11 }
 0x417   :  { %v3949_v40 = vshrl.u32 %v3931_v47, %v3947_v31  ;;  %v3952_v44 = vadd.s32 127, %v3951_v5  ;;  %v4120_v9 = vsel %vm4114_vm13, %v4117_v32, %v4119_v63  ;;  %vm4073_vm0 = vcmp.eq.s32.totalorder %v9898_v34, 0 }
 0x418   :  { %vm4076_vm8 = vcmp.eq.s32.totalorder %v9898_v34, 2  ;;  %v10001_v46 = vsel %vm3452_vm7, nan, %v4326_v52  ;;  %v4733_v38 = vadd.s32 3, %v9625_v18  ;;  %vm4072_vm12 = vcmp.lt.s32.totalorder %v9898_v34, 2 }
 0x419   :  { %v3950_v14 = vor.u32 %v3949_v40, %v3948_v55  ;;  %v3953_v39 = vshll.u32 %v3952_v44, 23  ;;  %v3961_v59 = vsub.s32 4, %v9901_v49  ;;  %vm4138_vm15 = vc.u32 %v9981_v3, %v9988_v4 }
 0x41a   :  { %vm4070_vm2 = vweird.f32 %v9180_v50  ;;  %vm3877_vm1 = vcmp.lt.s32.totalorder %v9152_v33, 0  ;;  %v4136_v62 = vmul.u32 %v4129_v27, %v4120_v9  ;;  %v4139_v21 = vadd.s32 1, %v9989_v15 }
 0x41b   :  { %vm4528_vm7 = vcmp.eq.s32.totalorder %v9992_v35, 0  ;;  %vm4424_vm9 = vcmp.eq.s32.totalorder %v4422_v0, 0  ;;  %v10931_v18 = vand.u32 2147483647, %v9152_v33  ;;  %v3954_v61 = vor.u32 4788187, %v3953_v39 }
 0x41c   :  { %vm4423_vm14 = vcmp.lt.s32.totalorder %v4422_v0, 2  ;;  %v10934_v17 = vxor.u32 2147483648, %v9662_v25  ;;  %vm4427_vm4 = vcmp.eq.s32.totalorder %v4422_v0, 2  ;;  %v4140_v23 = vsel %vm4138_vm15, %v4139_v21, %v9989_v15 }
 0x41d   :  { %vm10014_vm13 = vcmp.le.f32.partialorder %v10931_v18, 0.7853982  ;;  %v10935_v1 = vxor.u32 2147483648, %v9657_v53  ;;  %v4734_v37 = vand.u32 3, %v4733_v38  ;;  %v4629_v42 = vadd.s32 3, %v9859_v48  ;;  %v6004_v27 = vpop.eup %6003 }
 0x41e   :  { %v4426_v58 = vsel %vm4424_vm9, %v9657_v53, %v10934_v17  ;;  %v3955_v20 = vand.u32 2147483647, %v3954_v61  ;;  %v3957_v6 = vcvt.s32.f32 %v3950_v14  ;;  %v4141_v2 = vadd.s32 %v4140_v23, %v4136_v62  ;;  %v6006_v63 = vpop.eup %6005 }
 0x41f   :  { %v4429_v32 = vsel %vm4427_vm4, %v10935_v1, %v9662_v25  ;;  %v4077_v16 = vxor.u32 2147483648, %v6004_v27  ;;  %v10936_v47 = vxor.u32 2147483648, %v9533_v41  ;;  %vm4736_vm6 = vcmp.eq.s32.totalorder %v4734_v37, 0 }
 0x420   :  { %v4430_v11 = vsel %vm4423_vm14, %v4426_v58, %v4429_v32  ;;  %v4074_v25 = vxor.u32 2147483648, %v6006_v63  ;;  %v3958_v48 = vmul.f32 %v3957_v6, %v3955_v20  ;;  %v4142_v5 = vadd.s32 536870912, %v4141_v2 }
 0x421   :  { %v4530_v31 = vsel %vm4528_vm7, %v9529_v29, %v10936_v47  ;;  %v10033_v53 = vsel %vm3555_vm5, nan, %v4430_v11  ;;  %v10937_v52 = vxor.u32 2147483648, %v9785_v43  ;;  %v4078_v0 = vsel %vm4076_vm8, %v4077_v16, %v6006_v63 }
 0x422   :  { %vm4735_vm15 = vcmp.lt.s32.totalorder %v4734_v37, 2  ;;  %vm4739_vm9 = vcmp.eq.s32.totalorder %v4734_v37, 2  ;;  %v4630_v55 = vand.u32 3, %v4629_v42  ;;  %v4075_v40 = vsel %vm4073_vm0, %v6004_v27, %v4074_v25  ;;  %v10941_v42 = vld [vmem:[#allocation7_spill] sm:$0xff] }
 0x423   :  { %v4738_v15 = vsel %vm4736_vm6, %v9782_v10, %v10937_v52  ;;  %v3959_v57 = vxor.u32 2147483648, %v3958_v48  ;;  %v10042_v44 = vshrl.u32 %v4142_v5, 30  ;;  %v10938_v9 = vxor.u32 2147483648, %v9782_v10 }
 0x424   :  { %v4079_v14 = vsel %vm4072_vm12, %v4075_v40, %v4078_v0  ;;  %vm4531_vm5 = vcmp.eq.s32.totalorder %v9992_v35, 2  ;;  %v4941_v62 = vadd.s32 3, %v9884_v22  ;;  %vm4632_vm0 = vcmp.eq.s32.totalorder %v4630_v55, 0 }
 0x425   :  { %v4741_v38 = vsel %vm4739_vm9, %v10938_v9, %v9785_v43  ;;  %v4080_v21 = vsel %vm4070_vm2, nan, %v4079_v14  ;;  %v3960_v18 = vsel %vm3877_vm1, %v3959_v57, %v3958_v48  ;;  %v4144_v61 = vshll.u32 %v10042_v44, 30 }
 0x426   :  { %v4742_v39 = vsel %vm4735_vm15, %v4738_v15, %v4741_v38  ;;  %4204 = vrot.lane.b32.xlu1 %v4080_v21, %s6073_s16  ;;  %v3963_v10 = vsel %vm10014_vm13, %v9152_v33, %v3960_v18  ;;  %v10939_v43 = vxor.u32 2147483648, %v9529_v29  ;;  %v4634_v22 = vsel %vm4632_vm0, %v9919_v60, %v3765_v28 }
 0x427   :  { %vm4635_vm8 = vcmp.eq.s32.totalorder %v4630_v55, 2  ;;  %6007 = vcosq.f32 %v3963_v10  ;;  %v4145_v17 = vsub.s32 %v4141_v2, %v4144_v61  ;;  %vm4631_vm12 = vcmp.lt.s32.totalorder %v4630_v55, 2 }
 0x428   :  { %v4533_v34 = vsel %vm4531_vm5, %v10939_v43, %v9533_v41  ;;  %v4637_v58 = vsel %vm4635_vm8, %v3768_v19, %v9923_v8  ;;  %v3962_v23 = vsel %vm3877_vm1, %v3961_v59, %v9901_v49  ;;  %6009 = vsinq.f32 %v3963_v10 }
 0x429   :  { %vm4527_vm7 = vcmp.lt.s32.totalorder %v9992_v35, 2  ;;  %v4638_v29 = vsel %vm4631_vm12, %v4634_v22, %v4637_v58  ;;  %v4147_v41 = vsub.s32 0, %v4145_v17  ;;  %v4942_v32 = vand.u32 3, %v4941_v62  ;;  %v10940_v35 = vld [vmem:[#allocation18_spill] sm:$0xff] }
 0x42a   :  { %v4534_v1 = vsel %vm4527_vm7, %v4530_v31, %v4533_v34  ;;  %v10075_v28 = vsel %vm3761_vm3, nan, %v4638_v29  ;;  %5064 = vrot.lane.b32.xlu1 %v10001_v46, %s6073_s16  ;;  %v10081_v8 = vsel %vm10014_vm13, 0, %v3962_v23  ;;  %v1968_v59 = vmul.f32 0.21, %v10940_v35  ;;  %v10942_v46 = vld [vmem:[#allocation26_spill] sm:$0xff] }
 0x42b   :  { %v5648_v60 = vmin.u32 %v4147_v41, %v4145_v17  ;;  %v4535_v49 = vsel %vm3658_vm10, nan, %v4534_v1  ;;  %vm4944_vm1 = vcmp.eq.s32.totalorder %v4942_v32, 0  ;;  %vm4947_vm14 = vcmp.eq.s32.totalorder %v4942_v32, 2 }
 0x42c   :  { %v4946_v24 = vsel %vm4944_vm1, %v6004_v27, %v4074_v25  ;;  %v4949_v37 = vsel %vm4947_vm14, %v4077_v16, %v6006_v63  ;;  %v1960_v20 = vmul.f32 0.5, %v10941_v42  ;;  %v1984_v6 = vmul.f32 0.2, %v10942_v46 }
 0x42d   :  { %v4149_v19 = vclz %v5648_v60  ;;  %vm4943_vm3 = vcmp.lt.s32.totalorder %v4942_v32, 2  ;;  %v1970_v11 = vmul.f32 0.21, %v10800_v12  ;;  %v3968_v36 = vand.u32 3, %v10081_v8 }
 0x42e   :  { %5068 = vrot.lane.b32.xlu1 %v4535_v49, %s6073_s16  ;;  %v1976_v13 = vadd.f32 %v1968_v59, %v1960_v20  ;;  %v4743_v47 = vsel %vm3864_vm11, nan, %v4742_v39  ;;  %v4950_v31 = vsel %vm4943_vm3, %v4946_v24, %v4949_v37  ;;  %v1962_v63 = vmul.f32 0.5, %v10796_v45 }
 0x42f   :  { %v5649_v2 = vadd.s32 4294967294, %v4149_v19  ;;  %v1986_v16 = vmul.f32 0.2, %v10746_v56  ;;  %v4137_v25 = vadd.s32 %v9988_v4, %v9981_v3  ;;  %v4951_v30 = vsel %vm4070_vm2, nan, %v4950_v31  ;;  %v4193_v56 = vpop.permute.xlu1 %4192 }
 0x430   :  { %v1992_v27 = vadd.f32 %v1984_v6, %v1976_v13  ;;  %v1978_v0 = vadd.f32 %v1970_v11, %v1962_v63  ;;  %vm3973_vm11 = vcmp.eq.s32.totalorder %v3968_v36, 2  ;;  %vm3970_vm2 = vcmp.eq.s32.totalorder %v3968_v36, 0  ;;  %v10944_v11 = vld [vmem:[#allocation20_spill] sm:$0xff] }
 0x431   :  { %vm5650_vm10 = vcmp.lt.s32.totalorder %v5649_v2, 0  ;;  %vm3969_vm13 = vcmp.lt.s32.totalorder %v3968_v36, 2  ;;  %vm3967_vm4 = vweird.f32 %v9152_v33  ;;  %vm4083_vm6 = vcmp.lt.s32.totalorder %v9175_v7, 0 }
 0x432   :  { %v4152_v48 = vsel %vm5650_vm10, 0, %v5649_v2  ;;  %5072 = vrot.lane.b32.xlu1 %v4743_v47, %s6073_s16  ;;  %v2008_v15 = vmul.f32 0.3, %v1992_v27  ;;  %v1994_v50 = vadd.f32 %v1986_v16, %v1978_v0  ;;  %v10943_v41 = vand.u32 2147483647, %v9175_v7  ;;  %v10945_v47 = vld [vmem:[#allocation11_spill] sm:$0xff] }
 0x433   :  { %v4153_v5 = vsub.s32 32, %v4152_v48  ;;  %v4157_v12 = vsub.s32 4294967266, %v4152_v48  ;;  %v4154_v57 = vshll.u32 %v4145_v17, %v4152_v48  ;;  %v4167_v60 = vsub.s32 4, %v10042_v44  ;;  %v10946_v27 = vld [vmem:[#allocation22_spill] sm:$0xff] }
 0x434   :  { %v10098_v52 = vpop.eup %6007  ;;  %v10108_v3 = vadd.f32 %v2008_v15, %v10803_v51  ;;  %v2010_v10 = vmul.f32 0.3, %v1994_v50  ;;  %vm4082_vm15 = vcmp.le.f32.partialorder %v10943_v41, 0.7853982  ;;  %v4837_v20 = vadd.s32 3, %v10081_v8 }
 0x435   :  { %v10102_v55 = vpop.eup %6009  ;;  %v3974_v40 = vxor.u32 2147483648, %v10098_v52  ;;  %v4155_v45 = vshrl.u32 %v4137_v25, %v4153_v5  ;;  %v4158_v9 = vadd.s32 127, %v4157_v12  ;;  %vm4173_vm8 = vweird.f32 %v9175_v7  ;;  %v10947_v12 = vld [vmem:[#allocation14_spill] sm:$0xff] }
 0x436   :  { %v3971_v38 = vxor.u32 2147483648, %v10102_v55  ;;  %5076 = vrot.lane.b32.xlu1 %v4951_v30, %s6073_s16  ;;  %v4216_v21 = vmul.f32 %v4193_v56, %v10108_v3  ;;  %v10123_v17 = vadd.f32 %v2010_v10, %v10828_v26  ;;  %v4168_v26 = vsel %vm4083_vm6, %v4167_v60, %v10042_v44  ;;  %v10951_v10 = vld [vmem:[#allocation19_spill] sm:$0xff] }
 0x437   :  { %v3975_v4 = vsel %vm3973_vm11, %v3974_v40, %v10102_v55  ;;  %v4156_v14 = vor.u32 %v4155_v45, %v4154_v57  ;;  %v4159_v39 = vshll.u32 %v4158_v9, 23  ;;  %v4170_v49 = vsel %vm4082_vm15, 0, %v4168_v26  ;;  %v10948_v57 = vld [vmem:[#allocation8_spill] sm:$0xff] }
 0x438   :  { %v3972_v62 = vsel %vm3970_vm2, %v10098_v52, %v3971_v38  ;;  %v4174_v19 = vand.u32 3, %v4170_v49  ;;  %v4838_v44 = vand.u32 3, %v4837_v20  ;;  %v5045_v13 = vadd.s32 3, %v4170_v49  ;;  %v10955_v49 = vld [vmem:[#allocation21_spill] sm:$0xff] }
 0x439   :  { %v3976_v18 = vsel %vm3969_vm13, %v3972_v62, %v3975_v4  ;;  %v4160_v51 = vor.u32 4788187, %v4159_v39  ;;  %v4163_v34 = vcvt.s32.f32 %v4156_v14  ;;  %v4197_v23 = vpop.permute.xlu1 %4196  ;;  %v1969_v36 = vmul.f32 0.21, %v10944_v11  ;;  %v10949_v4 = vld [vmem:[#allocation66_spill] sm:$0xff]  ;;  %v10959_v11 = vld [vmem:[#allocation24_spill] sm:$0xff] }
 0x43a   :  { %v3977_v61 = vsel %vm3967_vm4, nan, %v3976_v18  ;;  %5200 = vrot.lane.b32.xlu1 %v4216_v21, %s6074_s17  ;;  %v4218_v29 = vmul.f32 %v4197_v23, %v10123_v17  ;;  %vm4179_vm9 = vcmp.eq.s32.totalorder %v4174_v19, 2  ;;  %vm4176_vm5 = vcmp.eq.s32.totalorder %v4174_v19, 0  ;;  %v10950_v18 = vld [vmem:[#allocation58_spill] sm:$0xff] }
 0x43b   :  { %4202 = vrot.lane.b32.xlu0 %v3977_v61, %s6073_s16  ;;  %v4161_v43 = vand.u32 2147483647, %v4160_v51  ;;  %vm4175_vm0 = vcmp.lt.s32.totalorder %v4174_v19, 2  ;;  %v1961_v31 = vmul.f32 0.5, %v10945_v47  ;;  %v1985_v48 = vmul.f32 0.2, %v10793_v54 }
 0x43c   :  { %v1972_v8 = vmul.f32 0.21, %v10946_v27  ;;  %vm4840_vm12 = vcmp.eq.s32.totalorder %v4838_v44, 0  ;;  %vm4843_vm7 = vcmp.eq.s32.totalorder %v4838_v44, 2  ;;  %v5046_v63 = vand.u32 3, %v5045_v13 }
 0x43d   :  { %v4164_v22 = vmul.f32 %v4163_v34, %v4161_v43  ;;  %v1977_v16 = vadd.f32 %v1969_v36, %v1961_v31  ;;  %v4842_v25 = vsel %vm4840_vm12, %v10098_v52, %v3971_v38  ;;  %v4845_v5 = vsel %vm4843_vm7, %v3974_v40, %v10102_v55  ;;  %v5191_v54 = vld [vmem:[%s10262_s3] sm:$0xf] }
 0x43e   :  { %5204 = vrot.lane.b32.xlu1 %v4218_v29, %s6074_s17  ;;  %v1964_v30 = vmul.f32 0.5, %v10947_v12  ;;  %vm5233_vm1 = vcmask 1043456   ;;  %vm4839_vm14 = vcmp.lt.s32.totalorder %v4838_v44, 2  ;;  %vm5048_vm3 = vcmp.eq.s32.totalorder %v5046_v63, 0  ;;  %v10952_v34 = vld [vmem:[#allocation9_spill] sm:$0xff] }
 0x43f   :  { %v4165_v58 = vxor.u32 2147483648, %v4164_v22  ;;  %v1993_v15 = vadd.f32 %v1985_v48, %v1977_v16  ;;  %5768 = vmatprep.subr.msk.mxu1 %vm5233_vm1, %v5191_v54  ;;  %v4846_v52 = vsel %vm4839_vm14, %v4842_v25, %v4845_v5  ;;  %vm5051_vm10 = vcmp.eq.s32.totalorder %v5046_v63, 2  ;;  %v10960_v48 = vld [vmem:[#allocation16_spill] sm:$0xff]  ;;  %v10961_v25 = vld [vmem:[#allocation13_spill] sm:$0xff] }
 0x440   :  { %v1980_v0 = vadd.f32 %v1972_v8, %v1964_v30  ;;  %5769 = vmatpush3.msk.msra.mxu1 %vm5233_vm1, %v5191_v54  ;;  %v1988_v45 = vmul.f32 0.2, %v10948_v57  ;;  %v4847_v56 = vsel %vm3967_vm4, nan, %v4846_v52  ;;  %vm5047_vm11 = vcmp.lt.s32.totalorder %v5046_v63, 2  ;;  %v10962_v52 = vld [vmem:[#allocation71_spill] sm:$0xff] }
 0x441   :  { %v4166_v1 = vsel %vm4083_vm6, %v4165_v58, %v4164_v22  ;;  %v2009_v9 = vmul.f32 0.3, %v1993_v15  ;;  %v1971_v43 = vmul.f32 0.21, %v10951_v10  ;;  %v1963_v22 = vmul.f32 0.5, %v10952_v34  ;;  %v10953_v58 = vld [vmem:[#allocation27_spill] sm:$0xff] }
 0x442   :  { %v4169_v32 = vsel %vm4082_vm15, %v9175_v7, %v4166_v1  ;;  %v1996_v38 = vadd.f32 %v1988_v45, %v1980_v0  ;;  %v1987_v7 = vmul.f32 0.2, %v10953_v58  ;;  %v10954_v1 = vld [vmem:[#allocation67_spill] sm:$0xff]  ;;  %v1974_v19 = vmul.f32 0.21, %v10955_v49  ;;  %v6036_v49 = vld [vmem:[%s10260_s1 + $0x8] sm:$0xff] }
 0x443   :  { %6011 = vcosq.f32 %v4169_v32  ;;  %v10170_v14 = vadd.f32 %v2009_v9, %v10949_v4  ;;  %v1979_v23 = vadd.f32 %v1971_v43, %v1963_v22  ;;  %v1973_v36 = vmul.f32 0.21, %v10959_v11  ;;  %v10963_v45 = vld [vmem:[#allocation23_spill] sm:$0xff]  ;;  %v6032_v22 = vld [vmem:[%s10260_s1] sm:$0xff] }
 0x444   :  { %6013 = vsinq.f32 %v4169_v32  ;;  %v2012_v62 = vmul.f32 0.3, %v1996_v38  ;;  %v1965_v27 = vmul.f32 0.5, %v10960_v48  ;;  %v1989_v5 = vmul.f32 0.2, %v10961_v25 }
 0x445   :  { %v1995_v29 = vadd.f32 %v1987_v7, %v1979_v23  ;;  %vm5216_vm2 = vcmask 31744   ;;  %v1975_v9 = vmul.f32 0.21, %v10963_v45  ;;  %v6075_v43 = vmov 13   ;;  %v6033_v23 = vld [vmem:[%s10260_s1 + $0x10] sm:$0xff] }
 0x446   :  { %v2020_v33 = vadd.f32 %v2012_v62, %v10950_v18  ;;  %v1981_v8 = vadd.f32 %v1973_v36, %v1965_v27  ;;  %5887 = vset.pattern.permute.xlu1 %v6075_v43  ;;  %5888 = vset.pattern.permute.xlu0 %v6075_v43 }
 0x447   :  { %v2011_v41 = vmul.f32 0.3, %v1995_v29 }
 0x448   :  { %v1997_v12 = vadd.f32 %v1989_v5, %v1981_v8 }
 0x449   :  { %v2019_v32 = vadd.f32 %v2011_v41, %v10954_v1  ;;  %v6034_v41 = vld [vmem:[%s10260_s1 + $0x18] sm:$0xff] }
 0x44a   :  { %v2013_v15 = vmul.f32 0.3, %v1997_v12 }
 0x450   :  { %v6012_v35 = vpop.eup %6011 }
 0x451   :  { %v6014_v59 = vpop.eup %6013  ;;  %v4180_v24 = vxor.u32 2147483648, %v6012_v35 }
 0x452   :  { %v4177_v37 = vxor.u32 2147483648, %v6014_v59 }
 0x453   :  { %v4181_v42 = vsel %vm4179_vm9, %v4180_v24, %v6014_v59  ;;  %v5053_v40 = vsel %vm5051_vm10, %v4180_v24, %v6014_v59 }
 0x454   :  { %v4178_v46 = vsel %vm4176_vm5, %v6012_v35, %v4177_v37  ;;  %v5050_v55 = vsel %vm5048_vm3, %v6012_v35, %v4177_v37  ;;  %v10956_v35 = vld [vmem:[#allocation12_spill] sm:$0xff]  ;;  %v10957_v37 = vld [vmem:[#allocation6_spill] sm:$0xff] }
 0x455   :  { %v4182_v6 = vsel %vm4175_vm0, %v4178_v46, %v4181_v42  ;;  %v5054_v50 = vsel %vm5047_vm11, %v5050_v55, %v5053_v40  ;;  %v1966_v59 = vmul.f32 0.5, %v10956_v35  ;;  %v1990_v42 = vmul.f32 0.2, %v10957_v37  ;;  %v6038_v35 = vld [vmem:[%s10260_s1 + $0x20] sm:$0xff] }
 0x456   :  { %v4183_v2 = vsel %vm4173_vm8, nan, %v4182_v6  ;;  %v5055_v39 = vsel %vm4173_vm8, nan, %v5054_v50  ;;  %v10958_v6 = vld [vmem:[#allocation45_spill] sm:$0xff]  ;;  %v2021_v55 = vadd.f32 %v2013_v15, %v10962_v52 }
 0x457   :  { %4206 = vrot.lane.b32.xlu0 %v4183_v2, %s6073_s16  ;;  %v1982_v24 = vadd.f32 %v1974_v19, %v1966_v59  ;;  %v6037_v19 = vld [vmem:[%s10260_s1 + $0x38] sm:$0xff]  ;;  %v6076_v59 = vmov 12  }
 0x459   :  { %v1998_v20 = vadd.f32 %v1990_v42, %v1982_v24 }
 0x45b   :  { %5066 = vrot.lane.b32.xlu0 %v10033_v53, %s6073_s16  ;;  %v10157_v53 = vld [vmem:[%s10263_s4] sm:$0xf]  ;;  %v2014_v46 = vmul.f32 0.3, %v1998_v20 }
 0x45c   :  { %5782 = vmatprep.subr.msk.mxu1 %vm5233_vm1, %v10157_v53 }
 0x45d   :  { %v2022_v2 = vadd.f32 %v2014_v46, %v10958_v6 }
 0x45f   :  { %5070 = vrot.lane.b32.xlu0 %v10075_v28, %s6073_s16  ;;  %v4195_v28 = vpop.permute.xlu0 %4194 }
 0x460   :  { %v4217_v21 = vmul.f32 %v4195_v28, %v10170_v14  ;;  %v10965_v28 = vld [vmem:[#allocation10_spill] sm:$0xff] }
 0x461   :  { %v1991_v4 = vmul.f32 0.2, %v10965_v28 }
 0x463   :  { %5074 = vrot.lane.b32.xlu0 %v4847_v56, %s6073_s16  ;;  %v10964_v56 = vld [vmem:[#allocation15_spill] sm:$0xff] }
 0x464   :  { %v1967_v38 = vmul.f32 0.5, %v10964_v56 }
 0x466   :  { %v1983_v50 = vadd.f32 %v1975_v9, %v1967_v38 }
 0x467   :  { %5078 = vrot.lane.b32.xlu0 %v5055_v39, %s6073_s16  ;;  %v4201_v51 = vpop.permute.xlu1 %4200 }
 0x468   :  { %v4220_v61 = vmul.f32 %v4201_v51, %v2020_v33  ;;  %v1999_v39 = vadd.f32 %v1991_v4, %v1983_v50 }
 0x46a   :  { %5208 = vrot.lane.b32.xlu1 %v4220_v61, %s6074_s17  ;;  %v2015_v62 = vmul.f32 0.3, %v1999_v39 }
 0x46b   :  { %5202 = vrot.lane.b32.xlu0 %v4217_v21, %s6074_s17  ;;  %v10966_v21 = vld [vmem:[#allocation40_spill] sm:$0xff] }
 0x46c   :  { %v2023_v18 = vadd.f32 %v2015_v62, %v10966_v21 }
 0x480   :  { %v4199_v60 = vpop.permute.xlu0 %4198 }
 0x481   :  { %v4219_v26 = vmul.f32 %v4199_v60, %v2019_v32 }
 0x483   :  { %5206 = vrot.lane.b32.xlu0 %v4219_v26, %s6074_s17  ;;  %v6035_v26 = vld [vmem:[%s10260_s1 + $0x28] sm:$0xff] }
 0x498   :  { %v4205_v44 = vpop.permute.xlu1 %4204 }
 0x499   :  { %v4222_v13 = vmul.f32 %v4205_v44, %v2022_v2 }
 0x49b   :  { %5212 = vrot.lane.b32.xlu1 %v4222_v13, %s6074_s17 }
 0x49c   :  { %v5065_v47 = vpop.permute.xlu1 %5064 }
 0x49d   :  { %v5088_v31 = vmul.f32 %v5065_v47, %v10108_v3 }
 0x49f   :  { %5359 = vrot.lane.b32.xlu1 %v5088_v31, %s6074_s17 }
 0x4a0   :  { %v5069_v63 = vpop.permute.xlu1 %5068 }
 0x4a1   :  { %v5090_v16 = vmul.f32 %v5069_v63, %v10123_v17 }
 0x4a3   :  { %5363 = vrot.lane.b32.xlu1 %v5090_v16, %s6074_s17 }
 0x4a4   :  { %v5073_v30 = vpop.permute.xlu1 %5072 }
 0x4a5   :  { %v5092_v54 = vmul.f32 %v5073_v30, %v2020_v33 }
 0x4a7   :  { %5367 = vrot.lane.b32.xlu1 %v5092_v54, %s6074_s17 }
 0x4a8   :  { %v5077_v0 = vpop.permute.xlu1 %5076 }
 0x4a9   :  { %v5094_v3 = vmul.f32 %v5077_v0, %v2022_v2 }
 0x4ab   :  { %5371 = vrot.lane.b32.xlu1 %v5094_v3, %s6074_s17 }
 0x4ac   :  { %v5201_v40 = vpop.permute.xlu1 %5200 }
 0x4ad   :  { %v4203_v57 = vpop.permute.xlu0 %4202  ;;  %5770 = vmatprep.mubr.msk.f32.mxu1 %vm5216_vm2, %v5201_v40 }
 0x4ae   :  { %v4221_v17 = vmul.f32 %v4203_v57, %v2021_v55 }
 0x4af   :  { %5099 = vperm.xlu1 %5887, %v6032_v22  }
 0x4b0   :  { %5210 = vrot.lane.b32.xlu0 %v4221_v17, %s6074_s17 }
 0x4b3   :  { %5109 = vperm.xlu1 %5887, %v6033_v23  }
 0x4b7   :  { %5114 = vperm.xlu1 %5887, %v6034_v41  }
 0x4bb   :  { %5124 = vperm.xlu1 %5887, %v6035_v26  }
 0x4bf   :  { %5134 = vperm.xlu1 %5887, %v6037_v19  }
 0x4c3   :  { %5890 = vset.pattern.permute.xlu1 %v6076_v59 }
 0x4c4   :  { %5156 = vperm.xlu1 %5890, %v6036_v49  }
 0x4c8   :  { %5160 = vperm.xlu1 %5890, %v6033_v23  }
 0x4c9   :  { %v4207_v33 = vpop.permute.xlu0 %4206 }
 0x4ca   :  { %v4223_v51 = vmul.f32 %v4207_v33, %v2023_v18 }
 0x4cc   :  { %5214 = vrot.lane.b32.xlu0 %v4223_v51, %s6074_s17  ;;  %5168 = vperm.xlu1 %5890, %v6038_v35  }
 0x4cd   :  { %v5067_v61 = vpop.permute.xlu0 %5066 }
 0x4ce   :  { %v5089_v10 = vmul.f32 %v5067_v61, %v10170_v14 }
 0x4d0   :  { %5361 = vrot.lane.b32.xlu0 %v5089_v10, %s6074_s17 }
 0x4d1   :  { %v5071_v34 = vpop.permute.xlu0 %5070 }
 0x4d2   :  { %v5091_v58 = vmul.f32 %v5071_v34, %v2019_v32  ;;  %v5205_v32 = vpop.permute.xlu1 %5204 }
 0x4d4   :  { %5365 = vrot.lane.b32.xlu0 %v5091_v58, %s6074_s17 }
 0x4d5   :  { %v5075_v7 = vpop.permute.xlu0 %5074 }
 0x4d6   :  { %v5093_v14 = vmul.f32 %v5075_v7, %v2021_v55  ;;  %v5683_v55 = vld [vmem:[%s10261_s2] ss:$0 sm:$0xff]  ;;  %s6077_s2 = smov [#allocation2]  }
 0x4d7   :  { %s5520_s12 = sshll.u32 %s6077_s2, 4  ;;  %s5521_s12 = int_to_ptr.vmem [resolvable:$true] %s5520_s12 }
 0x4d8   :  { %5369 = vrot.lane.b32.xlu0 %v5093_v14, %s6074_s17  ;;  %s6040_s0 = scalar_lea.vmem %s5521_s12, 1024  ;;  %p6045_p1 = scmp.lt.s32.totalorder %s5521_s12, %s5521_s12 }
 0x4d9   :  { %v5079_v29 = vpop.permute.xlu0 %5078  ;;  %p6041_p0 = scmp.ne.s32.totalorder %s5521_s12, %s6040_s0  ;;  %p6046_p2 = scmp.lt.s32.totalorder %s6040_s0, %s6040_s0 }
 0x4da   :  { %v5095_v1 = vmul.f32 %v5079_v29, %v2023_v18 }
 0x4db   :  { %p6047_p3 = por %p6046_p2, %p6045_p1 }
 0x4dc   :  { %5373 = vrot.lane.b32.xlu0 %v5095_v1, %s6074_s17  ;;  %v5209_v24 = vpop.permute.xlu1 %5208 }
 0x4dd   :  { %v5203_v60 = vpop.permute.xlu0 %5202  ;;  %p6048_p4 = pnand %p6047_p3, %p6041_p0 }
 0x4de   :  { %5771 = vmatmul.mubr.msk.f32.vlgmr.msra.gmra.mxu1 %vm5216_vm2, %v5203_v60 }
 0x4df   :  { %5783 = vmatpush3.msk.msra.mxu1 %vm5233_vm1, %v10157_v53  ;;  %5773 = vmatprep.mubr.msk.f32.mxu1 %vm5216_vm2, %v5205_v32  ;;  %v6039_v53 = vld [vmem:[%s10260_s1 + $0x30] sm:$0xff] }
 0x4e0   :  { %5104 = vperm.xlu0 %5888, %v6036_v49   ;;  %5176 = vperm.xlu1 %5890, %v6039_v53  }
 0x4e4   :  { %5119 = vperm.xlu0 %5888, %v6038_v35  }
 0x4e8   :  { %5129 = vperm.xlu0 %5888, %v6039_v53  }
 0x4ec   :  { %5889 = vset.pattern.permute.xlu0 %v6076_v59 }
 0x4ed   :  { %5152 = vperm.xlu0 %5889, %v6032_v22  }
 0x4f1   :  { %5164 = vperm.xlu0 %5889, %v6034_v41  }
 0x4f5   :  { %5172 = vperm.xlu0 %5889, %v6035_v26   ;;  %v5207_v37 = vpop.permute.xlu0 %5206 }
 0x4f6   :  { %5774 = vmatmul.mubr.msk.f32.gmra.mxu1 %vm5216_vm2, %v5207_v37 }
 0x4f7   :  { %5776 = vmatprep.mubr.msk.f32.mxu1 %vm5216_vm2, %v5209_v24 }
 0x4f9   :  { %5180 = vperm.xlu0 %5889, %v6037_v19  }
 0x50d   :  { %v5213_v42 = vpop.permute.xlu1 %5212 }
 0x511   :  { %v5360_v46 = vpop.permute.xlu1 %5359 }
 0x515   :  { %v5364_v6 = vpop.permute.xlu1 %5363 }
 0x519   :  { %v5368_v13 = vpop.permute.xlu1 %5367 }
 0x51d   :  { %v5372_v36 = vpop.permute.xlu1 %5371 }
 0x522   :  { %v5211_v20 = vpop.permute.xlu0 %5210 }
 0x523   :  { %5777 = vmatmul.mubr.msk.f32.gmra.mxu1 %vm5216_vm2, %v5211_v20 }
 0x524   :  { %5779 = vmatprep.mubr.msk.f32.mxu1 %vm5216_vm2, %v5213_v42 }
 0x52a   :  { %v5100_v48 = vpop.permute.xlu1 %5099 }
 0x52b   :  { %v5143_v9 = vmul.f32 %v5683_v55, %v5100_v48 }
 0x52e   :  { %v5110_v27 = vpop.permute.xlu1 %5109 }
 0x52f   :  { %v5145_v39 = vmul.f32 %v5683_v55, %v5110_v27 }
 0x532   :  { %v5115_v63 = vpop.permute.xlu1 %5114 }
 0x533   :  { %v5146_v28 = vmul.f32 %v5683_v55, %v5115_v63 }
 0x536   :  { %v5125_v12 = vpop.permute.xlu1 %5124 }
 0x537   :  { %v5148_v51 = vmul.f32 %v5683_v55, %v5125_v12 }
 0x53a   :  { %v5135_v15 = vpop.permute.xlu1 %5134 }
 0x53b   :  { %v5150_v41 = vmul.f32 %v5683_v55, %v5135_v15 }
 0x53e   :  { %v5215_v2 = vpop.permute.xlu0 %5214 }
 0x53f   :  { %5780 = vmatmul.mubr.msk.f32.gmra.mxu1 %vm5216_vm2, %v5215_v2  ;;  %v5157_v40 = vpop.permute.xlu1 %5156 }
 0x540   :  { %5784 = vmatprep.mubr.msk.f32.mxu1 %vm5216_vm2, %v5360_v46 }
 0x542   :  { %v5362_v44 = vpop.permute.xlu0 %5361 }
 0x543   :  { %5785 = vmatmul.mubr.msk.f32.vlgmr.msra.gmra.mxu1 %vm5216_vm2, %v5362_v44  ;;  %v5161_v38 = vpop.permute.xlu1 %5160 }
 0x544   :  { %5787 = vmatprep.mubr.msk.f32.mxu1 %vm5216_vm2, %v5364_v6  ;;  %v5185_v7 = vadd.f32 %v5161_v38, %v5145_v39 }
 0x546   :  { %v5366_v11 = vpop.permute.xlu0 %5365 }
 0x547   :  { %5788 = vmatmul.mubr.msk.f32.gmra.mxu1 %vm5216_vm2, %v5366_v11  ;;  %v5169_v34 = vpop.permute.xlu1 %5168 }
 0x548   :  { %5790 = vmatprep.mubr.msk.f32.mxu1 %vm5216_vm2, %v5368_v13 }
 0x54a   :  { %v5370_v47 = vpop.permute.xlu0 %5369 }
 0x54b   :  { %5791 = vmatmul.mubr.msk.f32.gmra.mxu1 %vm5216_vm2, %v5370_v47 }
 0x54c   :  { %5793 = vmatprep.mubr.msk.f32.mxu1 %vm5216_vm2, %v5372_v36 }
 0x54e   :  { %v5374_v31 = vpop.permute.xlu0 %5373 }
 0x54f   :  { %5794 = vmatmul.mubr.msk.f32.gmra.mxu1 %vm5216_vm2, %v5374_v31 }
 0x55b   :  { %v5105_v8 = vpop.permute.xlu0 %5104  ;;  %v5177_v24 = vpop.permute.xlu1 %5176 }
 0x55c   :  { %v5144_v57 = vmul.f32 %v5683_v55, %v5105_v8 }
 0x55e   :  { %v5184_v56 = vadd.f32 %v5157_v40, %v5144_v57 }
 0x55f   :  { %v5120_v25 = vpop.permute.xlu0 %5119 }
 0x560   :  { %v5147_v58 = vmul.f32 %v5683_v55, %v5120_v25 }
 0x562   :  { %v5187_v35 = vadd.f32 %v5169_v34, %v5147_v58 }
 0x563   :  { %v5130_v54 = vpop.permute.xlu0 %5129 }
 0x564   :  { %v5149_v19 = vmul.f32 %v5683_v55, %v5130_v54 }
 0x566   :  { %v5189_v2 = vadd.f32 %v5177_v24, %v5149_v19 }
 0x568   :  { %v5153_v3 = vpop.permute.xlu0 %5152 }
 0x569   :  { %v5183_v62 = vadd.f32 %v5153_v3, %v5143_v9 }
 0x56c   :  { %v5165_v45 = vpop.permute.xlu0 %5164 }
 0x56d   :  { %v5186_v61 = vadd.f32 %v5165_v45, %v5146_v28 }
 0x570   :  { %v5173_v18 = vpop.permute.xlu0 %5172 }
 0x571   :  { %v5188_v1 = vadd.f32 %v5173_v18, %v5148_v51 }
 0x574   :  { %v5181_v26 = vpop.permute.xlu0 %5180 }
 0x575   :  { %v5190_v42 = vadd.f32 %v5181_v26, %v5150_v41 }
 0x59e   :  { %v5772_v16 = vpop.f32.mrf.mxu1 }
 0x59f   :  { %v5343_v21 = vadd.f32 %v5772_v16, %v5184_v56 }
 0x5a0   :  { %v5303_v5 = vpop.f32.mrf.mxu1 }
 0x5a1   :  { %v5342_v10 = vadd.f32 %v5303_v5, %v5183_v62 }
 0x5b6   :  { %v5775_v30 = vpop.f32.mrf.mxu1 }
 0x5b7   :  { %v5345_v23 = vadd.f32 %v5775_v30, %v5186_v61 }
 0x5b8   :  { %v5313_v0 = vpop.f32.mrf.mxu1 }
 0x5b9   :  { %v5344_v32 = vadd.f32 %v5313_v0, %v5185_v7 }
 0x5e3   :  { %v5778_v52 = vpop.f32.mrf.mxu1 }
 0x5e4   :  { %v5347_v59 = vadd.f32 %v5778_v52, %v5188_v1 }
 0x5e5   :  { %v5323_v17 = vpop.f32.mrf.mxu1 }
 0x5e6   :  { %v5346_v20 = vadd.f32 %v5323_v17, %v5187_v35 }
 0x5ff   :  { %v5781_v50 = vpop.f32.mrf.mxu1 }
 0x600   :  { %v5349_v44 = vadd.f32 %v5781_v50, %v5190_v42 }
 0x601   :  { %v5333_v4 = vpop.f32.mrf.mxu1 }
 0x602   :  { %v5348_v36 = vadd.f32 %v5333_v4, %v5189_v2 }
 0x603   :  { %v5786_v33 = vpop.f32.mrf.mxu1 }
 0x604   :  { %v5500_v43 = vadd.f32 %v5786_v33, %v5343_v21 }
 0x605   :  { %v5460_v22 = vpop.f32.mrf.mxu1 }
 0x606   :  { %5508 = vst [vmem:[#allocation2 + $0x8] sm:$0xff] %v5500_v43  ;;  %v5499_v14 = vadd.f32 %v5460_v22, %v5342_v10 }
 0x607   :  { %v5789_v29 = vpop.f32.mrf.mxu1 }
 0x608   :  { %5507 = vst [vmem:[#allocation2] sm:$0xff] %v5499_v14  ;;  %v5502_v60 = vadd.f32 %v5789_v29, %v5345_v23 }
 0x609   :  { %v5470_v49 = vpop.f32.mrf.mxu1 }
 0x60a   :  { %5510 = vst [vmem:[#allocation2 + $0x18] sm:$0xff] %v5502_v60  ;;  %v5501_v53 = vadd.f32 %v5470_v49, %v5344_v32 }
 0x60b   :  { %v5792_v37 = vpop.f32.mrf.mxu1 }
 0x60c   :  { %5509 = vst [vmem:[#allocation2 + $0x10] sm:$0xff] %v5501_v53  ;;  %v5504_v46 = vadd.f32 %v5792_v37, %v5347_v59 }
 0x60d   :  { %v5480_v6 = vpop.f32.mrf.mxu1 }
 0x60e   :  { %5512 = vst [vmem:[#allocation2 + $0x28] sm:$0xff] %v5504_v46  ;;  %v5503_v13 = vadd.f32 %v5480_v6, %v5346_v20 }
 0x60f   :  { %v5795_v11 = vpop.f32.mrf.mxu1 }
 0x610   :  { %5511 = vst [vmem:[#allocation2 + $0x20] sm:$0xff] %v5503_v13  ;;  %v5506_v47 = vadd.f32 %v5795_v11, %v5349_v44 }
 0x611   :  { %v5490_v31 = vpop.f32.mrf.mxu1 }
 0x612   :  { %5514 = vst [vmem:[#allocation2 + $0x38] sm:$0xff] %v5506_v47  ;;  %v5505_v48 = vadd.f32 %v5490_v31, %v5348_v36 }
 0x614   :  { %5513 = vst [vmem:[#allocation2 + $0x30] sm:$0xff] %v5505_v48 }
 0x615   :  { %6051 = shalt.err (!%p6048_p4)
}
 0x616   :  { %s6078_s13 = smov 128  }
 0x617   :  { %5526 = dma.vmem_to_hbm [thread:$0]  %s5521_s12, 1024, %s10264_s5, [#allocation3], %s6078_s13, %s6078_s13, %s6073_s16  }
 0x618   :  { %6060 = dma.done.wait [#allocation3], 1024  }
 0x619   :  { %6061 = vsyncadd [#allocation3], 4294966272 }
 0x61a   :  { %5530 = vsyncpa [#allocation3], 1 }

</bundles_post_ra>
